<compile_context>
chip_gen: v5e
topology: v5e:2x2
jax: 0.10.0
libtpu: 0.0.40
codegen_flags: <defaults>
</compile_context>

<pallas_src>
import jax
import jax.numpy as jnp
from jax.experimental import pallas as pl
from jax.experimental.pallas import tpu as pltpu


# ---------------------------------------------------------------------------
# Fused ESIM kernel: soft-alignment + folded enhancement/projection + pooling
# + classifier MLP. One grid step handles `block_b` batch elements.
# ---------------------------------------------------------------------------
def esim_fused_kernel(a_ref, b_ref, wp_ref, bp_ref, w1_ref, b1_ref,
                      w2_ref, b2_ref, out_ref):
    f32 = jnp.float32
    bf16 = jnp.bfloat16

    Bb, Sa, H = a_ref.shape
    Sb = b_ref.shape[1]

    a = a_ref[...]                                   # (Bb, Sa, H) bf16
    b = b_ref[...]                                   # (Bb, Sb, H) bf16

    # ---- cross soft-alignment scores (bf16 MXU operands, f32 accumulate) --
    e = jnp.einsum("bqd,bkd->bqk", a, b,
                   preferred_element_type=f32)       # (Bb, Sa, Sb) f32

    wp = wp_ref[...]                                 # (3H, H) bf16 [wa;wbp;wc]
    bp = bp_ref[...]                                 # (1, H)  f32

    def compose_pool(x_bf, attn_f32, S):
        # [x; x~; x-x~; x*x~] @ Wp  ==  [x ; x~ ; x*x~] @ [wa; wbp; wc]
        # Flatten to (Bb*S, 3H) so the projection is ONE tall 2-D MXU matmul.
        x2 = x_bf.reshape(Bb * S, H)                           # bf16
        at2 = attn_f32.reshape(Bb * S, H)                      # f32
        prod = x2.astype(f32) * at2                            # f32 VPU (v5e-safe)
        feat = jnp.concatenate(
            [x2, at2.astype(bf16), prod.astype(bf16)], axis=1)  # (Bb*S, 3H)
        y = jnp.dot(feat, wp, preferred_element_type=f32) + bp  # (Bb*S, H) f32
        y = jnp.maximum(y, 0.0).reshape(Bb, S, H)                # ReLU
        # avg + max pooling over the sequence axis
        return jnp.mean(y, axis=1), jnp.max(y, axis=1)           # (Bb, H) each

    # ---- row path (softmax over Sb) — finished before column path starts --
    ea = jnp.exp(e - jnp.max(e, axis=2, keepdims=True))          # f32
    inv_a = pl.reciprocal(jnp.sum(ea, axis=2, keepdims=True), approx=True)
    pa = (ea * inv_a).astype(bf16)                               # probs <= 1
    attn_a = jnp.einsum("bqk,bkd->bqd", pa, b,
                        preferred_element_type=f32)              # (Bb, Sa, H)
    va_avg, va_max = compose_pool(a, attn_a, Sa)

    # ---- column path (softmax over Sa), no explicit transpose of e --------
    eb = jnp.exp(e - jnp.max(e, axis=1, keepdims=True))
    inv_b = pl.reciprocal(jnp.sum(eb, axis=1, keepdims=True), approx=True)
    pb = (eb * inv_b).astype(bf16)                               # (Bb, Sa, Sb)
    attn_b = jnp.einsum("bqk,bqd->bkd", pb, a,
                        preferred_element_type=f32)              # (Bb, Sb, H)
    vb_avg, vb_max = compose_pool(b, attn_b, Sb)

    # ---- fused classifier: one (Bb,4H)@(4H,H) matmul + padded 128-wide head
    v = jnp.concatenate([va_avg, va_max, vb_avg, vb_max], axis=1).astype(bf16)
    h = jnp.tanh(jnp.dot(v, w1_ref[...], preferred_element_type=f32)
                 + b1_ref[...])                                  # (Bb, H) f32
    out = jnp.dot(h.astype(bf16), w2_ref[...],
                  preferred_element_type=f32) + b2_ref[...]      # (Bb, 128)
    out_ref[...] = out                                           # full-tile vst


# ---------------------------------------------------------------------------
# Wrapper: host-side weight folding + pallas_call
# ---------------------------------------------------------------------------
def esim_pallas(a_emb, b_emb, params, *, block_b=16):
    B, Sa, H = a_emb.shape
    Sb = b_emb.shape[1]
    bf16 = jnp.bfloat16
    NPAD = 128                                   # lane-pad the 2-wide logits

    # pad batch to a multiple of block_b (per-grid-step batching)
    Bp = ((B + block_b - 1) // block_b) * block_b
    if Bp != B:
        pad = ((0, Bp - B), (0, 0), (0, 0))
        a_emb = jnp.pad(a_emb, pad)
        b_emb = jnp.pad(b_emb, pad)
    G = Bp // block_b

    a_bf = a_emb.astype(bf16)
    b_bf = b_emb.astype(bf16)

    # fold the enhancement concat [x; x~; x-x~; x*x~] @ Wp into a single
    # pre-stacked (3H, H) projection matching the in-kernel [x ; x~ ; x*x~]
    wp = params["wp"]
    wa  = wp[0 * H:1 * H] + wp[2 * H:3 * H]
    wbp = wp[1 * H:2 * H] - wp[2 * H:3 * H]
    wc  = wp[3 * H:4 * H]
    wp_fused = jnp.concatenate([wa, wbp, wc], axis=0).astype(bf16)   # (3H, H)

    # classifier first layer used directly on the pooled concat (4H, H)
    w1_bf = params["w1"].astype(bf16)

    # pad the 2-wide classifier head to a full 128-lane slab
    w2p = jnp.zeros((H, NPAD), jnp.float32).at[:, :2].set(params["w2"]).astype(bf16)
    b2p = jnp.zeros((1, NPAD), jnp.float32).at[:, :2].set(params["b2"])

    def wspec(shape):
        return pl.BlockSpec(shape, lambda i: (0,) * len(shape))

    out_padded = pl.pallas_call(
        esim_fused_kernel,
        out_shape=jax.ShapeDtypeStruct((Bp, NPAD), jnp.float32),
        grid_spec=pltpu.PrefetchScalarGridSpec(
            num_scalar_prefetch=0,
            grid=(G,),
            in_specs=[
                pl.BlockSpec((block_b, Sa, H), lambda i: (i, 0, 0)),
                pl.BlockSpec((block_b, Sb, H), lambda i: (i, 0, 0)),
                wspec((3 * H, H)), wspec((1, H)),
                wspec((4 * H, H)), wspec((1, H)),
                wspec((H, NPAD)), wspec((1, NPAD)),
            ],
            out_specs=pl.BlockSpec((block_b, NPAD), lambda i: (i, 0)),
        ),
        compiler_params=pltpu.CompilerParams(
            dimension_semantics=("parallel",),   # batch axis feeds 2nd TC on v7x
            vmem_limit_bytes=32 * 1024 * 1024,   # ample at demo dims
        ),
    )(a_bf, b_bf, wp_fused, params["bp"], w1_bf, params["b1"], w2p, b2p)

    return out_padded[:B, :2]


def encoder(params, ids, attention_mask):
    # TODO(synk): pretrained RoBERTa transformer stack not reproduced (no
    # checkpoint allowed); stand-in encoder = token embedding + position
    # embedding + LayerNorm, with masked positions zeroed.
    tok = params["tok_emb"][ids]                          # (B, S, H)
    pos = params["pos_emb"][None, :ids.shape[1], :]       # (1, S, H)
    h = tok + pos
    mu = jnp.mean(h, axis=-1, keepdims=True)
    var = jnp.var(h, axis=-1, keepdims=True)
    h = (h - mu) * jax.lax.rsqrt(var + 1e-5)
    return h * attention_mask[..., None].astype(h.dtype)


def etmm_forward(params, input1_ids, input1_mask, input2_ids, input2_mask):
    a = encoder(params, input1_ids, input1_mask)
    b = encoder(params, input2_ids, input2_mask)
    return esim_pallas(a, b, params)


# ---------------------------------------------------------------------------
# Pure-JAX reference for the ESIM head (correctness check of the kernel).
# ---------------------------------------------------------------------------
def esim_ref(a, b, p):
    e = jnp.einsum("bik,bjk->bij", a, b)
    pa = jax.nn.softmax(e, axis=-1)
    pb = jax.nn.softmax(e, axis=1)
    attn_a = jnp.einsum("bij,bjk->bik", pa, b)
    attn_b = jnp.einsum("bij,bik->bjk", pb, a)
    ma = jnp.concatenate([a, attn_a, a - attn_a, a * attn_a], -1)
    mb = jnp.concatenate([b, attn_b, b - attn_b, b * attn_b], -1)
    ca = jax.nn.relu(ma @ p["wp"] + p["bp"])
    cb = jax.nn.relu(mb @ p["wp"] + p["bp"])
    v = jnp.concatenate([ca.mean(1), ca.max(1), cb.mean(1), cb.max(1)], -1)
    h = jnp.tanh(v @ p["w1"] + p["b1"])
    return h @ p["w2"] + p["b2"]


# ---------------------------------------------------------------------------
# Main
# ---------------------------------------------------------------------------
if __name__ == "__main__":
    # block_b=16, S=8 -> 128 MXU rows per projection matmul, grid of 2 steps
    B, S, H, VOCAB = 32, 8, 128, 100

    key = jax.random.PRNGKey(0)
    k_tok, k_pos, k_wp, k_w1, k_w2, k_id1, k_id2 = jax.random.split(key, 7)

    params = {
        "tok_emb": 0.02 * jax.random.normal(k_tok, (VOCAB, H), jnp.float32),
        "pos_emb": 0.02 * jax.random.normal(k_pos, (S, H), jnp.float32),
        "wp": 0.05 * jax.random.normal(k_wp, (4 * H, H), jnp.float32),
        "bp": jnp.zeros((1, H), jnp.float32),
        "w1": 0.05 * jax.random.normal(k_w1, (4 * H, H), jnp.float32),
        "b1": jnp.zeros((1, H), jnp.float32),
        "w2": 0.05 * jax.random.normal(k_w2, (H, 2), jnp.float32),
        "b2": jnp.zeros((1, 2), jnp.float32),
    }

    input1_ids = jax.random.randint(k_id1, (B, S), 0, VOCAB, jnp.int32)
    input2_ids = jax.random.randint(k_id2, (B, S), 0, VOCAB, jnp.int32)
    input1_mask = jnp.ones((B, S), jnp.int32)
    input2_mask = jnp.ones((B, S), jnp.int32)

    # jit so host-side weight folding / padding is fused out of the hot path
    etmm_jit = jax.jit(etmm_forward)
    logits = etmm_jit(params, input1_ids, input1_mask,
                      input2_ids, input2_mask)
    logits = jax.block_until_ready(logits)

    # correctness check of the fused Pallas ESIM head against pure JAX.
    # reference is evaluated on the same bf16-rounded activations so the
    # comparison isolates kernel errors (bf16 weights, approx reciprocal).
    a = encoder(params, input1_ids, input1_mask)
    b = encoder(params, input2_ids, input2_mask)
    a_r = a.astype(jnp.bfloat16).astype(jnp.float32)
    b_r = b.astype(jnp.bfloat16).astype(jnp.float32)
    ref = esim_ref(a_r, b_r, params)
    assert logits.shape == (B, 2)
    assert jnp.allclose(logits, ref, atol=2e-2, rtol=2e-2), (logits, ref)

    print("KERNEL_OK")
</pallas_src>

<mosaic_0001>
module attributes {stable_mosaic.version = 11 : i64} {
  func.func @esim_fused_kernel(%arg0: i32, %arg1: memref<16x8x128xbf16, #tpu.memory_space<vmem>>, %arg2: memref<16x8x128xbf16, #tpu.memory_space<vmem>>, %arg3: memref<384x128xbf16, #tpu.memory_space<vmem>>, %arg4: memref<1x128xf32, #tpu.memory_space<vmem>>, %arg5: memref<512x128xbf16, #tpu.memory_space<vmem>>, %arg6: memref<1x128xf32, #tpu.memory_space<vmem>>, %arg7: memref<128x128xbf16, #tpu.memory_space<vmem>>, %arg8: memref<1x128xf32, #tpu.memory_space<vmem>>, %arg9: memref<16x128xf32, #tpu.memory_space<vmem>>) attributes {dimension_semantics = [#tpu.dimension_semantics<parallel>], iteration_bounds = array<i64: 2>, scalar_prefetch = 0 : i64, scratch_operands = 0 : i64, tpu.core_type = #tpu.core_type<tc>, window_params = [{transform_indices = @transform_0, window_bounds = array<i64: 16, 8, 128>}, {transform_indices = @transform_1, window_bounds = array<i64: 16, 8, 128>}, {pipeline_mode = #tpu.pipeline_mode<synchronous>, transform_indices = @transform_2, window_bounds = array<i64: 384, 128>}, {pipeline_mode = #tpu.pipeline_mode<synchronous>, transform_indices = @transform_3, window_bounds = array<i64: 1, 128>}, {pipeline_mode = #tpu.pipeline_mode<synchronous>, transform_indices = @transform_4, window_bounds = array<i64: 512, 128>}, {pipeline_mode = #tpu.pipeline_mode<synchronous>, transform_indices = @transform_5, window_bounds = array<i64: 1, 128>}, {pipeline_mode = #tpu.pipeline_mode<synchronous>, transform_indices = @transform_6, window_bounds = array<i64: 128, 128>}, {pipeline_mode = #tpu.pipeline_mode<synchronous>, transform_indices = @transform_7, window_bounds = array<i64: 1, 128>}, {transform_indices = @transform_8, window_bounds = array<i64: 16, 128>}]} {
    %c0 = arith.constant 0 : index
    %c0_0 = arith.constant 0 : index
    %c0_1 = arith.constant 0 : index
    %0 = vector.load %arg1[%c0, %c0_0, %c0_1] : memref<16x8x128xbf16, #tpu.memory_space<vmem>>, vector<16x8x128xbf16>
    %c0_2 = arith.constant 0 : index
    %c0_3 = arith.constant 0 : index
    %c0_4 = arith.constant 0 : index
    %1 = vector.load %arg2[%c0_2, %c0_3, %c0_4] : memref<16x8x128xbf16, #tpu.memory_space<vmem>>, vector<16x8x128xbf16>
    "tpu.trace_start"() <{level = 10 : i32, message = "bqd,bkd->bqk"}> : () -> ()
    %cst = arith.constant dense<0.000000e+00> : vector<16x8x8xf32>
    %2 = tpu.matmul %0, %1, %cst {dimension_numbers = #tpu.dot_dimension_numbers<[2], [2], [1], [1], [0, 0, 0, 1, 1, 1], [0], [0]>} : vector<16x8x128xbf16>, vector<16x8x128xbf16>, vector<16x8x8xf32> -> vector<16x8x8xf32>
    "tpu.trace_stop"() : () -> ()
    %c0_5 = arith.constant 0 : index
    %c0_6 = arith.constant 0 : index
    %3 = vector.load %arg3[%c0_5, %c0_6] : memref<384x128xbf16, #tpu.memory_space<vmem>>, vector<384x128xbf16>
    %c0_7 = arith.constant 0 : index
    %c0_8 = arith.constant 0 : index
    %4 = vector.load %arg4[%c0_7, %c0_8] : memref<1x128xf32, #tpu.memory_space<vmem>>, vector<1x128xf32>
    %cst_9 = arith.constant dense<0xFF800000> : vector<16x8xf32>
    %5 = vector.multi_reduction <maximumf>, %2, %cst_9 [2] : vector<16x8x8xf32> to vector<16x8xf32>
    %6 = vector.shape_cast %5 : vector<16x8xf32> to vector<16x8x1xf32>
    %7 = vector.broadcast %6 : vector<16x8x1xf32> to vector<16x8x8xf32>
    %8 = arith.subf %2, %7 : vector<16x8x8xf32>
    %9 = math.exp %8 : vector<16x8x8xf32>
    %cst_10 = arith.constant dense<0.000000e+00> : vector<16x8xf32>
    %10 = vector.multi_reduction <add>, %9, %cst_10 [2] : vector<16x8x8xf32> to vector<16x8xf32>
    %11 = vector.shape_cast %10 : vector<16x8xf32> to vector<16x8x1xf32>
    %12 = tpu.reciprocal %11 {approx = true} : vector<16x8x1xf32> -> vector<16x8x1xf32>
    %13 = vector.broadcast %12 : vector<16x8x1xf32> to vector<16x8x8xf32>
    %14 = arith.mulf %9, %13 : vector<16x8x8xf32>
    %15 = arith.truncf %14 : vector<16x8x8xf32> to vector<16x8x8xbf16>
    "tpu.trace_start"() <{level = 10 : i32, message = "bqk,bkd->bqd"}> : () -> ()
    %cst_11 = arith.constant dense<0.000000e+00> : vector<16x8x128xf32>
    %16 = tpu.matmul %15, %1, %cst_11 {dimension_numbers = #tpu.dot_dimension_numbers<[2], [1], [1], [2], [0, 0, 0, 1, 1, 2], [0], [0]>} : vector<16x8x8xbf16>, vector<16x8x128xbf16>, vector<16x8x128xf32> -> vector<16x8x128xf32>
    "tpu.trace_stop"() : () -> ()
    %17 = vector.shape_cast %0 : vector<16x8x128xbf16> to vector<128x128xbf16>
    %18 = vector.shape_cast %16 : vector<16x8x128xf32> to vector<128x128xf32>
    %19 = arith.extf %17 : vector<128x128xbf16> to vector<128x128xf32>
    %20 = arith.mulf %19, %18 : vector<128x128xf32>
    %21 = arith.truncf %18 : vector<128x128xf32> to vector<128x128xbf16>
    %22 = arith.truncf %20 : vector<128x128xf32> to vector<128x128xbf16>
    %23 = tpu.concatenate %17, %21, %22 in 1 : vector<128x128xbf16>, vector<128x128xbf16>, vector<128x128xbf16> -> vector<128x384xbf16>
    %cst_12 = arith.constant dense<0.000000e+00> : vector<128x128xf32>
    %24 = tpu.matmul %23, %3, %cst_12 {dimension_numbers = #tpu.dot_dimension_numbers<[1], [0], [0], [1], [0, 0, 1, 1], [], []>} : vector<128x384xbf16>, vector<384x128xbf16>, vector<128x128xf32> -> vector<128x128xf32>
    %25 = vector.broadcast %4 : vector<1x128xf32> to vector<128x128xf32>
    %26 = arith.addf %24, %25 : vector<128x128xf32>
    %cst_13 = arith.constant 0.000000e+00 : f32
    %27 = vector.broadcast %cst_13 : f32 to vector<128x128xf32>
    %28 = arith.maximumf %26, %27 : vector<128x128xf32>
    %29 = vector.shape_cast %28 : vector<128x128xf32> to vector<16x8x128xf32>
    %cst_14 = arith.constant dense<0.000000e+00> : vector<16x128xf32>
    %30 = vector.multi_reduction <add>, %29, %cst_14 [1] : vector<16x8x128xf32> to vector<16x128xf32>
    %cst_15 = arith.constant 8.000000e+00 : f32
    %31 = vector.broadcast %cst_15 : f32 to vector<16x128xf32>
    %32 = arith.divf %30, %31 : vector<16x128xf32>
    %cst_16 = arith.constant dense<0xFF800000> : vector<16x128xf32>
    %33 = vector.multi_reduction <maximumf>, %29, %cst_16 [1] : vector<16x8x128xf32> to vector<16x128xf32>
    %cst_17 = arith.constant dense<0xFF800000> : vector<16x8xf32>
    %34 = vector.multi_reduction <maximumf>, %2, %cst_17 [1] : vector<16x8x8xf32> to vector<16x8xf32>
    %35 = vector.shape_cast %34 : vector<16x8xf32> to vector<16x1x8xf32>
    %36 = vector.broadcast %35 : vector<16x1x8xf32> to vector<16x8x8xf32>
    %37 = arith.subf %2, %36 : vector<16x8x8xf32>
    %38 = math.exp %37 : vector<16x8x8xf32>
    %cst_18 = arith.constant dense<0.000000e+00> : vector<16x8xf32>
    %39 = vector.multi_reduction <add>, %38, %cst_18 [1] : vector<16x8x8xf32> to vector<16x8xf32>
    %40 = vector.shape_cast %39 : vector<16x8xf32> to vector<16x1x8xf32>
    %41 = tpu.reciprocal %40 {approx = true} : vector<16x1x8xf32> -> vector<16x1x8xf32>
    %42 = vector.broadcast %41 : vector<16x1x8xf32> to vector<16x8x8xf32>
    %43 = arith.mulf %38, %42 : vector<16x8x8xf32>
    %44 = arith.truncf %43 : vector<16x8x8xf32> to vector<16x8x8xbf16>
    "tpu.trace_start"() <{level = 10 : i32, message = "bqk,bqd->bkd"}> : () -> ()
    %cst_19 = arith.constant dense<0.000000e+00> : vector<16x8x128xf32>
    %45 = tpu.matmul %44, %0, %cst_19 {dimension_numbers = #tpu.dot_dimension_numbers<[1], [1], [2], [2], [0, 0, 0, 2, 1, 2], [0], [0]>} : vector<16x8x8xbf16>, vector<16x8x128xbf16>, vector<16x8x128xf32> -> vector<16x8x128xf32>
    "tpu.trace_stop"() : () -> ()
    %46 = vector.shape_cast %1 : vector<16x8x128xbf16> to vector<128x128xbf16>
    %47 = vector.shape_cast %45 : vector<16x8x128xf32> to vector<128x128xf32>
    %48 = arith.extf %46 : vector<128x128xbf16> to vector<128x128xf32>
    %49 = arith.mulf %48, %47 : vector<128x128xf32>
    %50 = arith.truncf %47 : vector<128x128xf32> to vector<128x128xbf16>
    %51 = arith.truncf %49 : vector<128x128xf32> to vector<128x128xbf16>
    %52 = tpu.concatenate %46, %50, %51 in 1 : vector<128x128xbf16>, vector<128x128xbf16>, vector<128x128xbf16> -> vector<128x384xbf16>
    %cst_20 = arith.constant dense<0.000000e+00> : vector<128x128xf32>
    %53 = tpu.matmul %52, %3, %cst_20 {dimension_numbers = #tpu.dot_dimension_numbers<[1], [0], [0], [1], [0, 0, 1, 1], [], []>} : vector<128x384xbf16>, vector<384x128xbf16>, vector<128x128xf32> -> vector<128x128xf32>
    %54 = vector.broadcast %4 : vector<1x128xf32> to vector<128x128xf32>
    %55 = arith.addf %53, %54 : vector<128x128xf32>
    %cst_21 = arith.constant 0.000000e+00 : f32
    %56 = vector.broadcast %cst_21 : f32 to vector<128x128xf32>
    %57 = arith.maximumf %55, %56 : vector<128x128xf32>
    %58 = vector.shape_cast %57 : vector<128x128xf32> to vector<16x8x128xf32>
    %cst_22 = arith.constant dense<0.000000e+00> : vector<16x128xf32>
    %59 = vector.multi_reduction <add>, %58, %cst_22 [1] : vector<16x8x128xf32> to vector<16x128xf32>
    %cst_23 = arith.constant 8.000000e+00 : f32
    %60 = vector.broadcast %cst_23 : f32 to vector<16x128xf32>
    %61 = arith.divf %59, %60 : vector<16x128xf32>
    %cst_24 = arith.constant dense<0xFF800000> : vector<16x128xf32>
    %62 = vector.multi_reduction <maximumf>, %58, %cst_24 [1] : vector<16x8x128xf32> to vector<16x128xf32>
    %63 = tpu.concatenate %32, %33, %61, %62 in 1 : vector<16x128xf32>, vector<16x128xf32>, vector<16x128xf32>, vector<16x128xf32> -> vector<16x512xf32>
    %64 = arith.truncf %63 : vector<16x512xf32> to vector<16x512xbf16>
    %c0_25 = arith.constant 0 : index
    %c0_26 = arith.constant 0 : index
    %65 = vector.load %arg5[%c0_25, %c0_26] : memref<512x128xbf16, #tpu.memory_space<vmem>>, vector<512x128xbf16>
    %cst_27 = arith.constant dense<0.000000e+00> : vector<16x128xf32>
    %66 = tpu.matmul %64, %65, %cst_27 {dimension_numbers = #tpu.dot_dimension_numbers<[1], [0], [0], [1], [0, 0, 1, 1], [], []>} : vector<16x512xbf16>, vector<512x128xbf16>, vector<16x128xf32> -> vector<16x128xf32>
    %c0_28 = arith.constant 0 : index
    %c0_29 = arith.constant 0 : index
    %67 = vector.load %arg6[%c0_28, %c0_29] : memref<1x128xf32, #tpu.memory_space<vmem>>, vector<1x128xf32>
    %68 = vector.broadcast %67 : vector<1x128xf32> to vector<16x128xf32>
    %69 = arith.addf %66, %68 : vector<16x128xf32>
    %70 = math.tanh %69 : vector<16x128xf32>
    %71 = arith.truncf %70 : vector<16x128xf32> to vector<16x128xbf16>
    %c0_30 = arith.constant 0 : index
    %c0_31 = arith.constant 0 : index
    %72 = vector.load %arg7[%c0_30, %c0_31] : memref<128x128xbf16, #tpu.memory_space<vmem>>, vector<128x128xbf16>
    %cst_32 = arith.constant dense<0.000000e+00> : vector<16x128xf32>
    %73 = tpu.matmul %71, %72, %cst_32 {dimension_numbers = #tpu.dot_dimension_numbers<[1], [0], [0], [1], [0, 0, 1, 1], [], []>} : vector<16x128xbf16>, vector<128x128xbf16>, vector<16x128xf32> -> vector<16x128xf32>
    %c0_33 = arith.constant 0 : index
    %c0_34 = arith.constant 0 : index
    %74 = vector.load %arg8[%c0_33, %c0_34] : memref<1x128xf32, #tpu.memory_space<vmem>>, vector<1x128xf32>
    %75 = vector.broadcast %74 : vector<1x128xf32> to vector<16x128xf32>
    %76 = arith.addf %73, %75 : vector<16x128xf32>
    %c0_35 = arith.constant 0 : index
    %c0_36 = arith.constant 0 : index
    %77 = vector.load %arg9[%c0_35, %c0_36] : memref<16x128xf32, #tpu.memory_space<vmem>>, vector<16x128xf32>
    tpu.vector_store %arg9[%c0_35, %c0_36], %76 {strides = array<i32>} : memref<16x128xf32, #tpu.memory_space<vmem>>, vector<16x128xf32>,
    return
  }
  func.func @transform_0(%arg0: i32) -> (i32, i32, i32) {
    %c0_i32 = arith.constant 0 : i32
    %c0_i32_0 = arith.constant 0 : i32
    %c0_i32_1 = arith.constant 0 : i32
    return %arg0, %c0_i32, %c0_i32_0 : i32, i32, i32
  }
  func.func @transform_1(%arg0: i32) -> (i32, i32, i32) {
    %c0_i32 = arith.constant 0 : i32
    %c0_i32_0 = arith.constant 0 : i32
    %c0_i32_1 = arith.constant 0 : i32
    return %arg0, %c0_i32, %c0_i32_0 : i32, i32, i32
  }
  func.func @transform_2(%arg0: i32) -> (i32, i32) {
    %c0_i32 = arith.constant 0 : i32
    %c0_i32_0 = arith.constant 0 : i32
    %c0_i32_1 = arith.constant 0 : i32
    return %c0_i32, %c0_i32_0 : i32, i32
  }
  func.func @transform_3(%arg0: i32) -> (i32, i32) {
    %c0_i32 = arith.constant 0 : i32
    %c0_i32_0 = arith.constant 0 : i32
    %c0_i32_1 = arith.constant 0 : i32
    return %c0_i32, %c0_i32_0 : i32, i32
  }
  func.func @transform_4(%arg0: i32) -> (i32, i32) {
    %c0_i32 = arith.constant 0 : i32
    %c0_i32_0 = arith.constant 0 : i32
    %c0_i32_1 = arith.constant 0 : i32
    return %c0_i32, %c0_i32_0 : i32, i32
  }
  func.func @transform_5(%arg0: i32) -> (i32, i32) {
    %c0_i32 = arith.constant 0 : i32
    %c0_i32_0 = arith.constant 0 : i32
    %c0_i32_1 = arith.constant 0 : i32
    return %c0_i32, %c0_i32_0 : i32, i32
  }
  func.func @transform_6(%arg0: i32) -> (i32, i32) {
    %c0_i32 = arith.constant 0 : i32
    %c0_i32_0 = arith.constant 0 : i32
    %c0_i32_1 = arith.constant 0 : i32
    return %c0_i32, %c0_i32_0 : i32, i32
  }
  func.func @transform_7(%arg0: i32) -> (i32, i32) {
    %c0_i32 = arith.constant 0 : i32
    %c0_i32_0 = arith.constant 0 : i32
    %c0_i32_1 = arith.constant 0 : i32
    return %c0_i32, %c0_i32_0 : i32, i32
  }
  func.func @transform_8(%arg0: i32) -> (i32, i32) {
    %c0_i32 = arith.constant 0 : i32
    %c0_i32_0 = arith.constant 0 : i32
    return %arg0, %c0_i32 : i32, i32
  }
}

</mosaic_0001>

<bundles_post_ra>
// kernel: etmm_forward.1
= control target key start
LH: loop header
LB: loop body
LE: loop exit
PB: predicated region body
PF: predicated region fallthrough
CT: control target
= control target key end

     0   :  { %s4592_s27 = smov 0   ;;  %s5848_s0 = inlined_call_operand.vmem [shape: bf16[32,8,128], index: 0, kind: input, shape index: {}]   ;;  %s5849_s1 = inlined_call_operand.vmem [shape: bf16[32,8,128], index: 1, kind: input, shape index: {}]   ;;  %s5850_s2 = inlined_call_operand.vmem [shape: bf16[384,128], index: 2, kind: input, shape index: {}]   ;;  %s5851_s3 = inlined_call_operand.vmem [shape: f32[1,128], index: 3, kind: input, shape index: {}]   ;;  %s5852_s4 = inlined_call_operand.vmem [shape: bf16[512,128], index: 4, kind: input, shape index: {}]   ;;  %s5853_s5 = inlined_call_operand.vmem [shape: f32[1,128], index: 5, kind: input, shape index: {}]   ;;  %s5854_s6 = inlined_call_operand.vmem [shape: bf16[128,128], index: 6, kind: input, shape index: {}]   ;;  %s5855_s7 = inlined_call_operand.vmem [shape: f32[1,128], index: 7, kind: input, shape index: {}]   ;;  %s5856_s8 = inlined_call_operand.vmem [shape: f32[32,128], index: 8, kind: output, shape index: {}]  }
   0x1 LB: > { %s3905_s28 = sadd.s32 4294967295, %s4544_s27   ;;  %p3909_p0 = scmp.ge.s32.totalorder %s4544_s27, 1  ;;  %s4544_s27 = sphi %s4592_s27, %s18_s27  }
   0x2   : > { %p274_p1 = scmp.lt.s32.totalorder %s4544_s27, 3 }
   0x4   : > { %p275_p2 = pnand %p3909_p0, %p274_p1 }
   0x5   : > { %s3910_s29 = sshll.u32 (!%p275_p2), %s3905_s28, 4  ;;  %s3914_s15 = sshll.u32 (!%p275_p2), %s3905_s28, 1 }
   0x6   : > { %278 = sbr.rel (%p275_p2) target bundleno = 1435 (0x59b), region = 52  ;;  %p314_p3 = scmp.lt.s32.totalorder (!%p275_p2), %s3910_s29, 31 }
   0x7   : > { %p326_p4 = scmp.lt.s32.totalorder (!%p275_p2), %s3914_s15, 3 }
   0xb   : > { %s5858_s29 = smov (!%p314_p3, %s3910_s29), 31  ;;  %vm621_vm0 = vcmask 64512   ;;  %vm817_vm1 = vcmask 1043456   ;;  %vm3311_vm3 = vcmask 1041409   ;;  %vm3313_vm4 = vcmask 1042434   ;;  %s5860_s15 = smov (!%p326_p4, %s3914_s15), 3 }
   0xc   : > { %s3911_s30 = sshll.u32 %s5858_s29, 2  ;;  %vm3315_vm5 = vcmask 1043459   ;;  %vm3317_vm6 = vcmask 1044484   ;;  %vm3319_vm7 = vcmask 1045509   ;;  %vm3321_vm8 = vcmask 1046534   ;;  %s3915_s16 = sshll.u32 %s5860_s15, 3 }
   0xd   : > { %s4605_s11 = scalar_lea.vmem %s5849_s1, %s3911_s30  ;;  %s4626_s14 = scalar_lea.vmem %s5848_s0, %s3911_s30  ;;  %vm3323_vm9 = vcmask 1047559  }
   0xe   : > { %v4608_v0 = vld [vmem:[%s4605_s11] sm:$0xf]  ;;  %v4611_v1 = vld [vmem:[%s4605_s11 + $0x4] sm:$0xf]  ;;  %v4614_v2 = vld [vmem:[%s4605_s11 + $0x8] sm:$0xf]  ;;  %s329_s21 = scalar_lea.vmem %s5856_s8, %s3915_s16 }
   0xf   : > { %371 = vmatpush.bf16.xpose.msra.mxu0 %v4608_v0  ;;  %384 = vmatpush.bf16.xpose.msra.mxu1 %v4611_v1  ;;  %v4619_v3 = vld [vmem:[%s4605_s11 + $0xc] sm:$0xf]  ;;  %v4629_v4 = vld [vmem:[%s4605_s11 + $0x10] sm:$0xf]  ;;  %v4633_v5 = vld [vmem:[%s4605_s11 + $0x14] sm:$0xf] }
  0x10   : > { %397 = vmatpush.bf16.xpose.msra.mxu2 %v4614_v2  ;;  %410 = vmatpush.bf16.xpose.msra.mxu3 %v4619_v3  ;;  %v4636_v6 = vld [vmem:[%s4605_s11 + $0x18] sm:$0xf]  ;;  %v4639_v7 = vld [vmem:[%s4605_s11 + $0x1c] sm:$0xf]  ;;  %v332_v8 = vld [vmem:[%s4626_s14] sm:$0xf] }
  0x11   : > { %v333_v9 = vld [vmem:[%s4626_s14 + $0x4] sm:$0xf]  ;;  %v334_v10 = vld [vmem:[%s4626_s14 + $0x8] sm:$0xf]  ;;  %v335_v11 = vld [vmem:[%s4626_s14 + $0xc] sm:$0xf] }
  0x12   : > { %v358_v12 = vld [vmem:[%s4605_s11 + $0x28] sm:$0xf]  ;;  %v356_v13 = vld [vmem:[%s4605_s11 + $0x20] sm:$0xf]  ;;  %v359_v14 = vld [vmem:[%s4605_s11 + $0x2c] sm:$0xf] }
  0x13   : > { %v357_v15 = vld [vmem:[%s4605_s11 + $0x24] sm:$0xf]  ;;  %v336_v16 = vld [vmem:[%s4626_s14 + $0x10] sm:$0xf]  ;;  %v337_v17 = vld [vmem:[%s4626_s14 + $0x14] sm:$0xf] }
  0x14   : > { %v338_v18 = vld [vmem:[%s4626_s14 + $0x18] sm:$0xf]  ;;  %v339_v19 = vld [vmem:[%s4626_s14 + $0x1c] sm:$0xf]  ;;  %v340_v20 = vld [vmem:[%s4626_s14 + $0x20] sm:$0xf] }
  0x15   : > { %v341_v21 = vld [vmem:[%s4626_s14 + $0x24] sm:$0xf]  ;;  %v342_v22 = vld [vmem:[%s4626_s14 + $0x28] sm:$0xf]  ;;  %v343_v23 = vld [vmem:[%s4626_s14 + $0x2c] sm:$0xf] }
  0x16   : > { %372 = vmatmul.bf16.vlgmr.msra.gmra.mxu0 %v332_v8  ;;  %385 = vmatmul.bf16.vlgmr.msra.gmra.mxu1 %v333_v9  ;;  %v360_v24 = vld [vmem:[%s4605_s11 + $0x30] sm:$0xf]  ;;  %v362_v25 = vld [vmem:[%s4605_s11 + $0x38] sm:$0xf]  ;;  %v363_v26 = vld [vmem:[%s4605_s11 + $0x3c] sm:$0xf] }
  0x17   : > { %423 = vmatpush.bf16.xpose.msrb.mxu0 %v4629_v4  ;;  %436 = vmatpush.bf16.xpose.msrb.mxu1 %v4633_v5  ;;  %v361_v27 = vld [vmem:[%s4605_s11 + $0x34] sm:$0xf]  ;;  %v344_v28 = vld [vmem:[%s4626_s14 + $0x30] sm:$0xf]  ;;  %v346_v29 = vld [vmem:[%s4626_s14 + $0x38] sm:$0xf] }
  0x18   : > { %449 = vmatpush.bf16.xpose.msrb.mxu2 %v4636_v6  ;;  %462 = vmatpush.bf16.xpose.msrb.mxu3 %v4639_v7  ;;  %v347_v30 = vld [vmem:[%s4626_s14 + $0x3c] sm:$0xf]  ;;  %v345_v31 = vld [vmem:[%s4626_s14 + $0x34] sm:$0xf] }
  0x19   : > { %398 = vmatmul.bf16.vlgmr.msra.gmra.mxu2 %v334_v10  ;;  %411 = vmatmul.bf16.vlgmr.msra.gmra.mxu3 %v335_v11 }
  0x1f   : > { %475 = vmatpush.bf16.xpose.msra.mxu0 %v356_v13  ;;  %488 = vmatpush.bf16.xpose.msra.mxu1 %v357_v15 }
  0x20   : > { %501 = vmatpush.bf16.xpose.msra.mxu2 %v358_v12  ;;  %514 = vmatpush.bf16.xpose.msra.mxu3 %v359_v14 }
  0x26   : > { %424 = vmatmul.bf16.vlgmr.msrb.gmra.mxu0 %v336_v16  ;;  %437 = vmatmul.bf16.vlgmr.msrb.gmra.mxu1 %v337_v17 }
  0x27   : > { %527 = vmatpush.bf16.xpose.msrb.mxu0 %v360_v24  ;;  %540 = vmatpush.bf16.xpose.msrb.mxu1 %v361_v27 }
  0x29   : > { %450 = vmatmul.bf16.vlgmr.msrb.gmra.mxu2 %v338_v18  ;;  %463 = vmatmul.bf16.vlgmr.msrb.gmra.mxu3 %v339_v19 }
  0x2a   : > { %553 = vmatpush.bf16.xpose.msrb.mxu2 %v362_v25  ;;  %566 = vmatpush.bf16.xpose.msrb.mxu3 %v363_v26 }
  0x36   : > { %476 = vmatmul.bf16.vlgmr.msra.gmra.mxu0 %v340_v20  ;;  %489 = vmatmul.bf16.vlgmr.msra.gmra.mxu1 %v341_v21 }
  0x39   : > { %502 = vmatmul.bf16.vlgmr.msra.gmra.mxu2 %v342_v22  ;;  %515 = vmatmul.bf16.vlgmr.msra.gmra.mxu3 %v343_v23 }
  0x46   : > { %528 = vmatmul.bf16.vlgmr.msrb.gmra.mxu0 %v344_v28  ;;  %541 = vmatmul.bf16.vlgmr.msrb.gmra.mxu1 %v345_v31 }
  0x49   : > { %554 = vmatmul.bf16.vlgmr.msrb.gmra.mxu2 %v346_v29  ;;  %567 = vmatmul.bf16.vlgmr.msrb.gmra.mxu3 %v347_v30 }
  0x93   : > { %v4668_v32 = vpop.f32.mrf.mxu0  ;;  %v4670_v33 = vpop.f32.mrf.mxu1 }
  0x94   : > { %v4674_v34 = vsel %vm621_vm0, %v4668_v32, -inf  ;;  %v4688_v40 = vsel %vm621_vm0, %v4670_v33, -inf }
  0x95   : > { %623 = vmax.xlane.f32.xlu0 %v4674_v34 }
  0x9b   : > { %v375_v38 = vpop.f32.mrf.mxu0  ;;  %v388_v39 = vpop.f32.mrf.mxu1 }
  0x9c   : > { %v4677_v35 = vpop.f32.mrf.mxu2  ;;  %v4679_v36 = vpop.f32.mrf.mxu3 }
  0x9d   : > { %v4683_v37 = vsel %vm621_vm0, %v4677_v35, -inf  ;;  %626 = vmax.xlane.f32.xlu0 %v4688_v40  ;;  %v4693_v43 = vsel %vm621_vm0, %v4679_v36, -inf }
  0x9e   : > { %629 = vmax.xlane.f32.xlu1 %v4683_v37 }
  0xa3   : > { %v4695_v44 = vpop.f32.mrf.mxu0  ;;  %v4697_v45 = vpop.f32.mrf.mxu1 }
  0xa4   : > { %v401_v41 = vpop.f32.mrf.mxu2  ;;  %v414_v42 = vpop.f32.mrf.mxu3  ;;  %v4702_v46 = vsel %vm621_vm0, %v4695_v44, -inf  ;;  %v4721_v53 = vsel %vm621_vm0, %v4697_v45, -inf }
  0xa5   : > { %635 = vmax.xlane.f32.xlu2 %v4702_v46 }
  0xa6   : > { %632 = vmax.xlane.f32.xlu1 %v4693_v43 }
  0xab   : > { %v427_v51 = vpop.f32.mrf.mxu0  ;;  %v440_v52 = vpop.f32.mrf.mxu1 }
  0xac   : > { %v4705_v47 = vpop.f32.mrf.mxu2  ;;  %v4707_v48 = vpop.f32.mrf.mxu3 }
  0xad   : > { %v4711_v49 = vsel %vm621_vm0, %v4707_v48, -inf  ;;  %v4715_v50 = vsel %vm621_vm0, %v4705_v47, -inf  ;;  %638 = vmax.xlane.f32.xlu2 %v4721_v53 }
  0xae   : > { %644 = vmax.xlane.f32.xlu1 %v4711_v49  ;;  %641 = vmax.xlane.f32.xlu0 %v4715_v50 }
  0xb3   : > { %v4724_v56 = vpop.f32.mrf.mxu0  ;;  %v4728_v60 = vpop.f32.mrf.mxu1 }
  0xb4   : > { %v453_v54 = vpop.f32.mrf.mxu2  ;;  %v466_v55 = vpop.f32.mrf.mxu3 }
  0xbb   : > { %v479_v58 = vpop.f32.mrf.mxu0  ;;  %v492_v62 = vpop.f32.mrf.mxu1 }
  0xbc   : > { %v4726_v57 = vpop.f32.mrf.mxu2  ;;  %v4730_v61 = vpop.f32.mrf.mxu3 }
  0xc3   : > { %v4732_v8 = vpop.f32.mrf.mxu0  ;;  %v4734_v9 = vpop.f32.mrf.mxu1 }
  0xc4   : > { %v505_v59 = vpop.f32.mrf.mxu2  ;;  %v518_v63 = vpop.f32.mrf.mxu3 }
  0xcb   : > { %v531_v10 = vpop.f32.mrf.mxu0  ;;  %v544_v13 = vpop.f32.mrf.mxu1 }
  0xcc   : > { %v4736_v11 = vpop.f32.mrf.mxu2  ;;  %v4738_v12 = vpop.f32.mrf.mxu3  ;;  %v4764_v10 = vsel %vm621_vm0, %v4728_v60, -inf }
  0xd4   : > { %v557_v16 = vpop.f32.mrf.mxu2  ;;  %v570_v18 = vpop.f32.mrf.mxu3 }
 0x108   : > { %v624_v14 = vpop.xlane.xlu0 %623 }
 0x109   : > { %v670_v15 = vsub.f32 %v4668_v32, %v624_v14  ;;  %v4771_v14 = vsel %vm621_vm0, %v4724_v56, -inf }
 0x10b   : > { %v686_v17 = vmul.f32 1.442695, %v670_v15 }
 0x10d   : > { %4363 = vpow2.f32 %v686_v17 }
 0x110   : > { %v627_v21 = vpop.xlane.xlu0 %626 }
 0x111   : > { %v630_v19 = vpop.xlane.xlu1 %629  ;;  %v671_v22 = vsub.f32 %v4670_v33, %v627_v21  ;;  %v4785_v21 = vsel %vm621_vm0, %v4730_v61, -inf }
 0x112   : > { %v672_v20 = vsub.f32 %v4677_v35, %v630_v19  ;;  %v4778_v19 = vsel %vm621_vm0, %v4726_v57, -inf }
 0x113   : > { %v4743_v24 = vpop.eup %4363  ;;  %v688_v25 = vmul.f32 1.442695, %v671_v22 }
 0x114   : > { %v690_v23 = vmul.f32 1.442695, %v672_v20  ;;  %v718_v26 = vsel %vm621_vm0, %v4743_v24, 0.0 }
 0x115   : > { %719 = vadd.xlane.f32.xlu2 %v718_v26 }
 0x116   : > { %4365 = vpow2.f32 %v690_v23 }
 0x117   : > { %4367 = vpow2.f32 %v688_v25 }
 0x118   : > { %v636_v29 = vpop.xlane.xlu2 %635 }
 0x119   : > { %v633_v27 = vpop.xlane.xlu1 %632  ;;  %v674_v38 = vsub.f32 %v4695_v44, %v636_v29  ;;  %v4802_v29 = vsel %vm621_vm0, %v4738_v12, -inf }
 0x11a   : > { %v673_v28 = vsub.f32 %v4679_v36, %v633_v27 }
 0x11b   : > { %v694_v51 = vmul.f32 1.442695, %v674_v38  ;;  %v4812_v38 = vsel %vm621_vm0, %v4734_v9, -inf }
 0x11c   : > { %v4748_v30 = vpop.eup %4365  ;;  %v692_v31 = vmul.f32 1.442695, %v673_v28 }
 0x11d   : > { %v4751_v39 = vpop.eup %4367  ;;  %v724_v41 = vsel %vm621_vm0, %v4748_v30, 0.0 }
 0x11e   : > { %4369 = vpow2.f32 %v692_v31  ;;  %725 = vadd.xlane.f32.xlu1 %v724_v41  ;;  %v721_v42 = vsel %vm621_vm0, %v4751_v39, 0.0  ;;  %v4806_v31 = vsel %vm621_vm0, %v4732_v8, -inf  ;;  %v4817_v41 = vsel %vm621_vm0, %v4736_v11, -inf }
 0x11f   : > { %722 = vadd.xlane.f32.xlu0 %v721_v42  ;;  %4371 = vpow2.f32 %v694_v51  ;;  %v819_v42 = vsel %vm817_vm1, %v4608_v0, 0  ;;  %v857_v51 = vsel %vm817_vm1, %v4614_v2, 0 }
 0x120   : > { %v639_v55 = vpop.xlane.xlu2 %638  ;;  %828 = vmatpush.bf16.msra.mxu0 %v819_v42  ;;  %866 = vmatpush.bf16.msra.mxu2 %v857_v51 }
 0x121   : > { %v645_v52 = vpop.xlane.xlu1 %644  ;;  %v642_v54 = vpop.xlane.xlu0 %641  ;;  %v675_v62 = vsub.f32 %v4697_v45, %v639_v55 }
 0x122   : > { %v677_v58 = vsub.f32 %v4707_v48, %v645_v52  ;;  %v676_v63 = vsub.f32 %v4705_v47, %v642_v54  ;;  %v838_v52 = vsel %vm817_vm1, %v4611_v1, 0  ;;  %v876_v54 = vsel %vm817_vm1, %v4619_v3, 0 }
 0x123   : > { %v696_v16 = vmul.f32 1.442695, %v675_v62  ;;  %847 = vmatpush.bf16.msra.mxu1 %v838_v52  ;;  %885 = vmatpush.bf16.msra.mxu3 %v876_v54  ;;  %v1858_v62 = vrot.slane %v4688_v40, 4  ;;  %v914_v1 = vsel %vm817_vm1, %v4633_v5, 0  ;;  %v952_v3 = vsel %vm817_vm1, %v4639_v7, 0 }
 0x124   : > { %v4758_v59 = vpop.eup %4369  ;;  %v700_v15 = vmul.f32 1.442695, %v677_v58  ;;  %v698_v17 = vmul.f32 1.442695, %v676_v63  ;;  %v895_v58 = vsel %vm817_vm1, %v4629_v4, 0 }
 0x125   : > { %v727_v13 = vsel %vm621_vm0, %v4758_v59, 0.0  ;;  %v4774_v18 = vpop.eup %4371  ;;  %904 = vmatpush.bf16.msrb.mxu0 %v895_v58 }
 0x126   : > { %650 = vmax.xlane.f32.xlu1 %v4764_v10  ;;  %728 = vadd.xlane.f32.xlu2 %v727_v13  ;;  %4373 = vpow2.f32 %v700_v15  ;;  %v730_v20 = vsel %vm621_vm0, %v4774_v18, 0.0  ;;  %v933_v15 = vsel %vm817_vm1, %v4636_v6, 0 }
 0x127   : > { %647 = vmax.xlane.f32.xlu0 %v4771_v14  ;;  %4375 = vpow2.f32 %v696_v16  ;;  %923 = vmatpush.bf16.msrb.mxu1 %v914_v1  ;;  %v1852_v16 = vrot.slane %v4674_v34, 4 }
 0x128   : > { %4377 = vpow2.f32 %v698_v17  ;;  %961 = vmatpush.bf16.msrb.mxu3 %v952_v3  ;;  %942 = vmatpush.bf16.msrb.mxu2 %v933_v15 }
 0x129   : > { %v1853_v5 = vmax.f32 %v4674_v34, %v1852_v16 }
 0x12b   : > { %v1854_v58 = vrot.slane %v1853_v5, 2 }
 0x12c   : > { %v4788_v22 = vpop.eup %4373 }
 0x12d   : > { %v4790_v23 = vpop.eup %4375  ;;  %v739_v26 = vsel %vm621_vm0, %v4788_v22, 0.0 }
 0x12e   : > { %653 = vmax.xlane.f32.xlu2 %v4778_v19  ;;  %731 = vadd.xlane.f32.xlu1 %v730_v20  ;;  %v4792_v25 = vpop.eup %4377  ;;  %v733_v27 = vsel %vm621_vm0, %v4790_v23, 0.0 }
 0x12f   : > { %656 = vmax.xlane.f32.xlu0 %v4785_v21  ;;  %v736_v28 = vsel %vm621_vm0, %v4792_v25, 0.0 }
 0x136   : > { %740 = vadd.xlane.f32.xlu1 %v739_v26  ;;  %734 = vadd.xlane.f32.xlu2 %v733_v27 }
 0x137   : > { %737 = vadd.xlane.f32.xlu0 %v736_v28 }
 0x13e   : > { %668 = vmax.xlane.f32.xlu1 %v4802_v29  ;;  %659 = vmax.xlane.f32.xlu2 %v4806_v31 }
 0x13f   : > { %662 = vmax.xlane.f32.xlu0 %v4812_v38 }
 0x146   : > { %665 = vmax.xlane.f32.xlu2 %v4817_v41 }
 0x188   : > { %v720_v55 = vpop.xlane.xlu2 %719 }
 0x189   : > { %4379 = vrcp.f32 %v720_v55 }
 0x18f   : > { %v4380_v0 = vpop.eup %4379 }
 0x190   : > { %v782_v2 = vmul.f32 %v4380_v0, %v4743_v24  ;;  %v1859_v24 = vmax.f32 %v4688_v40, %v1858_v62  ;;  %v1870_v62 = vrot.slane %v4693_v43, 4 }
 0x191   : > { %v726_v63 = vpop.xlane.xlu1 %725 }
 0x192   : > { %4381 = vrcp.f32 %v726_v63  ;;  %v723_v13 = vpop.xlane.xlu0 %722  ;;  %v798_v4 = vpack.c.bf16 %v782_v2, %v782_v2  ;;  %v1860_v28 = vrot.slane %v1859_v24, 2 }
 0x193   : > { %4383 = vrcp.f32 %v723_v13 }
 0x194   : > { %3916 = vmatmul.msk.bf16.vlgmr.msra.gmra.mxu0 %vm621_vm0, %v798_v4  ;;  %v1861_v34 = vmax.f32 %v1859_v24, %v1860_v28 }
 0x196   : > { %v1862_v1 = vrot.slane %v1861_v34, 1 }
 0x198   : > { %v4382_v17 = vpop.eup %4381  ;;  %v1863_v28 = vmax.f32 %v1861_v34, %v1862_v1 }
 0x199   : > { %v4384_v20 = vpop.eup %4383  ;;  %v784_v7 = vmul.f32 %v4382_v17, %v4748_v30  ;;  %v651_v26 = vpop.xlane.xlu1 %650  ;;  %v1876_v17 = vrot.slane %v4702_v46, 4 }
 0x19a   : > { %v729_v27 = vpop.xlane.xlu2 %728  ;;  %v783_v42 = vmul.f32 %v4384_v20, %v4751_v39  ;;  %v679_v6 = vsub.f32 %v4728_v60, %v651_v26  ;;  %v648_v51 = vpop.xlane.xlu0 %647  ;;  %v1855_v39 = vmax.f32 %v1853_v5, %v1854_v58  ;;  %v1949_v34 = vsub.f32 %v4670_v33, %v1863_v28 }
 0x19b   : > { %4385 = vrcp.f32 %v729_v27  ;;  %v800_v52 = vpack.c.bf16 %v784_v7, %v784_v7  ;;  %v678_v40 = vsub.f32 %v4724_v56, %v648_v51  ;;  %v1864_v51 = vrot.slane %v4683_v37, 4 }
 0x19c   : > { %v799_v54 = vpack.c.bf16 %v783_v42, %v783_v42  ;;  %v704_v55 = vmul.f32 1.442695, %v679_v6  ;;  %v1856_v7 = vrot.slane %v1855_v39, 1  ;;  %v1966_v1 = vmul.f32 1.442695, %v1949_v34 }
 0x19d   : > { %v702_v0 = vmul.f32 1.442695, %v678_v40  ;;  %3918 = vmatmul.msk.bf16.vlgmr.msra.gmra.mxu2 %vm621_vm0, %v800_v52  ;;  %v1877_v52 = vmax.f32 %v4702_v46, %v1876_v17  ;;  %v1882_v17 = vrot.slane %v4721_v53, 4 }
 0x19e   : > { %4387 = vpow2.f32 %v704_v55  ;;  %3917 = vmatmul.msk.bf16.vlgmr.msra.gmra.mxu1 %vm621_vm0, %v799_v54 }
 0x19f   : > { %4389 = vpow2.f32 %v702_v0 }
 0x1a1   : > { %v4386_v30 = vpop.eup %4385  ;;  %v732_v2 = vpop.xlane.xlu1 %731 }
 0x1a2   : > { %v785_v63 = vmul.f32 %v4386_v30, %v4758_v59  ;;  %v654_v13 = vpop.xlane.xlu2 %653  ;;  %4391 = vrcp.f32 %v732_v2  ;;  %v657_v4 = vpop.xlane.xlu0 %656  ;;  %v1871_v59 = vmax.f32 %v4693_v43, %v1870_v62  ;;  %v1857_v43 = vmax.f32 %v1855_v39, %v1856_v7 }
 0x1a3   : > { %v680_v3 = vsub.f32 %v4726_v57, %v654_v13  ;;  %v681_v16 = vsub.f32 %v4730_v61, %v657_v4  ;;  %v1878_v2 = vrot.slane %v1877_v52, 2 }
 0x1a4   : > { %v801_v15 = vpack.c.bf16 %v785_v63, %v785_v63  ;;  %v4852_v24 = vpop.eup %4387  ;;  %v1872_v40 = vrot.slane %v1871_v59, 2  ;;  %v1865_v63 = vmax.f32 %v4683_v37, %v1864_v51  ;;  %v1948_v39 = vsub.f32 %v4668_v32, %v1857_v43 }
 0x1a5   : > { %v706_v20 = vmul.f32 1.442695, %v680_v3  ;;  %v4855_v5 = vpop.eup %4389  ;;  %v708_v26 = vmul.f32 1.442695, %v681_v16  ;;  %v745_v27 = vsel %vm621_vm0, %v4852_v24, 0.0  ;;  %v1879_v4 = vmax.f32 %v1877_v52, %v1878_v2 }
 0x1a6   : > { %3919 = vmatmul.msk.bf16.vlgmr.msra.gmra.mxu3 %vm621_vm0, %v801_v15  ;;  %746 = vadd.xlane.f32.xlu1 %v745_v27  ;;  %v742_v42 = vsel %vm621_vm0, %v4855_v5, 0.0  ;;  %v1873_v46 = vmax.f32 %v1871_v59, %v1872_v40  ;;  %v1866_v37 = vrot.slane %v1865_v63, 2  ;;  %v1888_v51 = vrot.slane %v4715_v50, 4 }
 0x1a7   : > { %4393 = vpow2.f32 %v706_v20  ;;  %743 = vadd.xlane.f32.xlu0 %v742_v42 }
 0x1a8   : > { %4395 = vpow2.f32 %v708_v26  ;;  %v4392_v6 = vpop.eup %4391  ;;  %v1874_v16 = vrot.slane %v1873_v46, 1  ;;  %v1964_v26 = vmul.f32 1.442695, %v1948_v39 }
 0x1a9   : > { %v786_v54 = vmul.f32 %v4392_v6, %v4774_v18  ;;  %v741_v55 = vpop.xlane.xlu1 %740 }
 0x1aa   : > { %v735_v58 = vpop.xlane.xlu2 %734  ;;  %4397 = vrcp.f32 %v741_v55  ;;  %v738_v0 = vpop.xlane.xlu0 %737  ;;  %v1875_v2 = vmax.f32 %v1873_v46, %v1874_v16 }
 0x1ab   : > { %v802_v30 = vpack.c.bf16 %v786_v54, %v786_v54  ;;  %4399 = vrcp.f32 %v735_v58 }
 0x1ac   : > { %4401 = vrcp.f32 %v738_v0  ;;  %v1867_v0 = vmax.f32 %v1865_v63, %v1866_v37 }
 0x1ad   : > { %v4867_v62 = vpop.eup %4393  ;;  %3920 = vmatmul.msk.bf16.vlgmr.msrb.gmra.mxu0 %vm621_vm0, %v802_v30  ;;  %4403 = vpow2.f32 %v1966_v1  ;;  %v1883_v30 = vmax.f32 %v4721_v53, %v1882_v17 }
 0x1ae   : > { %v4870_v13 = vpop.eup %4395  ;;  %v748_v18 = vsel %vm621_vm0, %v4867_v62, 0.0  ;;  %4405 = vpow2.f32 %v1964_v26  ;;  %v1868_v63 = vrot.slane %v1867_v0, 1  ;;  %v1894_v26 = vrot.slane %v4711_v49, 4 }
 0x1af   : > { %749 = vadd.xlane.f32.xlu2 %v748_v18  ;;  %v751_v33 = vsel %vm621_vm0, %v4870_v13, 0.0  ;;  %v1884_v1 = vrot.slane %v1883_v30, 2 }
 0x1b0   : > { %752 = vadd.xlane.f32.xlu0 %v751_v33  ;;  %v4398_v3 = vpop.eup %4397 }
 0x1b1   : > { %v4400_v15 = vpop.eup %4399  ;;  %v789_v20 = vmul.f32 %v4398_v3, %v4788_v22  ;;  %v669_v7 = vpop.xlane.xlu1 %668  ;;  %v1880_v22 = vrot.slane %v1879_v4, 1 }
 0x1b2   : > { %v660_v59 = vpop.xlane.xlu2 %659  ;;  %v4402_v27 = vpop.eup %4401  ;;  %v787_v32 = vmul.f32 %v4400_v15, %v4790_v23  ;;  %v685_v28 = vsub.f32 %v4738_v12, %v669_v7  ;;  %v1951_v15 = vsub.f32 %v4679_v36, %v1875_v2 }
 0x1b3   : > { %v682_v42 = vsub.f32 %v4732_v8, %v660_v59  ;;  %v663_v6 = vpop.xlane.xlu0 %662  ;;  %v805_v52 = vpack.c.bf16 %v789_v20, %v789_v20  ;;  %v788_v43 = vmul.f32 %v4402_v27, %v4792_v25  ;;  %v1889_v25 = vmax.f32 %v4715_v50, %v1888_v51  ;;  %v4891_v18 = vpop.eup %4403 }
 0x1b4   : > { %v683_v40 = vsub.f32 %v4734_v9, %v663_v6  ;;  %v803_v54 = vpack.c.bf16 %v787_v32, %v787_v32  ;;  %v716_v55 = vmul.f32 1.442695, %v685_v28  ;;  %v1881_v39 = vmax.f32 %v1879_v4, %v1880_v22  ;;  %v4894_v37 = vpop.eup %4405 }
 0x1b5   : > { %v710_v58 = vmul.f32 1.442695, %v682_v42  ;;  %v804_v34 = vpack.c.bf16 %v788_v43, %v788_v43  ;;  %v1890_v53 = vrot.slane %v1889_v25, 2  ;;  %v1869_v20 = vmax.f32 %v1867_v0, %v1868_v63 }
 0x1b6   : > { %v712_v23 = vmul.f32 1.442695, %v683_v40  ;;  %3923 = vmatmul.msk.bf16.vlgmr.msrb.gmra.mxu3 %vm621_vm0, %v805_v52  ;;  %4407 = vpow2.f32 %v716_v55  ;;  %3921 = vmatmul.msk.bf16.vlgmr.msrb.gmra.mxu1 %vm621_vm0, %v803_v54  ;;  %v1952_v16 = vsub.f32 %v4695_v44, %v1881_v39  ;;  %v2003_v7 = vsel %vm621_vm0, %v4891_v18, 0.0 }
 0x1b7   : > { %4409 = vpow2.f32 %v710_v58  ;;  %3922 = vmatmul.msk.bf16.vlgmr.msrb.gmra.mxu2 %vm621_vm0, %v804_v34  ;;  %v1885_v27 = vmax.f32 %v1883_v30, %v1884_v1  ;;  %v1891_v44 = vmax.f32 %v1889_v25, %v1890_v53  ;;  %v1996_v28 = vsel %vm621_vm0, %v4894_v37, 0.0 }
 0x1b8   : > { %4411 = vpow2.f32 %v712_v23  ;;  %v1970_v42 = vmul.f32 1.442695, %v1951_v15  ;;  %v2004_v6 = vrot.slane %v2003_v7, 4  ;;  %v1972_v51 = vmul.f32 1.442695, %v1952_v16 }
 0x1b9   : > { %v1895_v52 = vmax.f32 %v4711_v49, %v1894_v26  ;;  %v1886_v43 = vrot.slane %v1885_v27, 1  ;;  %v1997_v40 = vrot.slane %v1996_v28, 4  ;;  %v1950_v22 = vsub.f32 %v4677_v35, %v1869_v20 }
 0x1ba   : > { %v666_v33 = vpop.xlane.xlu2 %665  ;;  %v1892_v54 = vrot.slane %v1891_v44, 1  ;;  %v1906_v58 = vrot.slane %v4764_v10, 4  ;;  %v2005_v0 = vadd.f32 %v2004_v6, %v2003_v7  ;;  %v1900_v34 = vrot.slane %v4771_v14, 4 }
 0x1bb   : > { %v684_v3 = vsub.f32 %v4736_v11, %v666_v33  ;;  %v1896_v30 = vrot.slane %v1895_v52, 2  ;;  %v1887_v2 = vmax.f32 %v1885_v27, %v1886_v43  ;;  %v1998_v49 = vadd.f32 %v1997_v40, %v1996_v28 }
 0x1bc   : > { %v4897_v46 = vpop.eup %4407  ;;  %v1968_v25 = vmul.f32 1.442695, %v1950_v22  ;;  %v1893_v39 = vmax.f32 %v1891_v44, %v1892_v54  ;;  %v1907_v35 = vmax.f32 %v4764_v10, %v1906_v58  ;;  %v2006_v63 = vrot.slane %v2005_v0, 2 }
 0x1bd   : > { %v714_v50 = vmul.f32 1.442695, %v684_v3  ;;  %v4900_v17 = vpop.eup %4409  ;;  %v763_v4 = vsel %vm621_vm0, %v4897_v46, 0.0  ;;  %v1901_v1 = vmax.f32 %v4771_v14, %v1900_v34  ;;  %v1897_v53 = vmax.f32 %v1895_v52, %v1896_v30 }
 0x1be   : > { %v4906_v59 = vpop.eup %4411  ;;  %764 = vadd.xlane.f32.xlu0 %v763_v4  ;;  %v754_v36 = vsel %vm621_vm0, %v4900_v17, 0.0  ;;  %v1999_v15 = vrot.slane %v1998_v49, 2  ;;  %v1954_v16 = vsub.f32 %v4705_v47, %v1893_v39  ;;  %v1908_v20 = vrot.slane %v1907_v35, 2 }
 0x1bf   : > { %4413 = vpow2.f32 %v714_v50  ;;  %755 = vadd.xlane.f32.xlu1 %v754_v36  ;;  %v757_v32 = vsel %vm621_vm0, %v4906_v59, 0.0  ;;  %v1953_v50 = vsub.f32 %v4697_v45, %v1887_v2  ;;  %v2007_v4 = vadd.f32 %v2006_v63, %v2005_v0 }
 0x1c0   : > { %758 = vadd.xlane.f32.xlu2 %v757_v32  ;;  %4415 = vpow2.f32 %v1970_v42  ;;  %v1902_v7 = vrot.slane %v1901_v1, 2  ;;  %v1898_v27 = vrot.slane %v1897_v53, 1  ;;  %v1918_v14 = vrot.slane %v4785_v21, 4 }
 0x1c1   : > { %4417 = vpow2.f32 %v1972_v51  ;;  %v2000_v36 = vadd.f32 %v1999_v15, %v1998_v49  ;;  %v1974_v44 = vmul.f32 1.442695, %v1953_v50  ;;  %v1976_v32 = vmul.f32 1.442695, %v1954_v16 }
 0x1c2   : > { %4419 = vpow2.f32 %v1968_v25  ;;  %v1909_v45 = vmax.f32 %v1907_v35, %v1908_v20  ;;  %v2008_v42 = vrot.slane %v2007_v4, 1  ;;  %v1903_v6 = vmax.f32 %v1901_v1, %v1902_v7 }
 0x1c3   : > { %v1899_v52 = vmax.f32 %v1897_v53, %v1898_v27  ;;  %v1919_v43 = vmax.f32 %v4785_v21, %v1918_v14  ;;  %v2001_v40 = vrot.slane %v2000_v36, 1  ;;  %4421 = vpow2.f32 %v1974_v44 }
 0x1c4   : > { %4423 = vpow2.f32 %v1976_v32  ;;  %v1910_v54 = vrot.slane %v1909_v45, 1  ;;  %v1924_v58 = vrot.slane %v4806_v31, 4  ;;  %v2009_v0 = vadd.f32 %v2008_v42, %v2007_v4 }
 0x1c5   : > { %v4917_v55 = vpop.eup %4413  ;;  %v1912_v30 = vrot.slane %v4778_v19, 4  ;;  %v1920_v2 = vrot.slane %v1919_v43, 2  ;;  %v2002_v49 = vadd.f32 %v2001_v40, %v2000_v36  ;;  %v1955_v39 = vsub.f32 %v4707_v48, %v1899_v52 }
 0x1c6   : > { %v760_v23 = vsel %vm621_vm0, %v4917_v55, 0.0  ;;  %v4924_v33 = vpop.eup %4415  ;;  %v1911_v63 = vmax.f32 %v1909_v45, %v1910_v54  ;;  %v1925_v1 = vmax.f32 %v4806_v31, %v1924_v58  ;;  %4425 = vrcp.f32 %v2009_v0 }
 0x1c7   : > { %761 = vadd.xlane.f32.xlu1 %v760_v23  ;;  %v4927_v3 = vpop.eup %4417  ;;  %v2017_v26 = vsel %vm621_vm0, %v4924_v33, 0.0  ;;  %v1904_v23 = vrot.slane %v1903_v6, 1  ;;  %v1913_v16 = vmax.f32 %v4778_v19, %v1912_v30  ;;  %v1921_v20 = vmax.f32 %v1919_v43, %v1920_v2 }
 0x1c8   : > { %v2024_v10 = vsel %vm621_vm0, %v4927_v3, 0.0  ;;  %v4936_v28 = vpop.eup %4419  ;;  %v2018_v51 = vrot.slane %v2017_v26, 4  ;;  %4427 = vrcp.f32 %v2002_v49  ;;  %v1978_v7 = vmul.f32 1.442695, %v1955_v39 }
 0x1c9   : > { %v2025_v47 = vrot.slane %v2024_v10, 4  ;;  %v2010_v22 = vsel %vm621_vm0, %v4936_v28, 0.0  ;;  %v4944_v35 = vpop.eup %4421  ;;  %v1905_v50 = vmax.f32 %v1903_v6, %v1904_v23  ;;  %v1957_v14 = vsub.f32 %v4728_v60, %v1911_v63 }
 0x1ca   : > { %v2019_v25 = vadd.f32 %v2018_v51, %v2017_v26  ;;  %v2011_v21 = vrot.slane %v2010_v22, 4  ;;  %v4947_v15 = vpop.eup %4423  ;;  %v2031_v48 = vsel %vm621_vm0, %v4944_v35, 0.0  ;;  %v1926_v26 = vrot.slane %v1925_v1, 2 }
 0x1cb   : > { %v2026_v34 = vadd.f32 %v2025_v47, %v2024_v10  ;;  %v2038_v31 = vsel %vm621_vm0, %v4947_v15, 0.0  ;;  %v1914_v36 = vrot.slane %v1913_v16, 2  ;;  %v1930_v44 = vrot.slane %v4812_v38, 4 }
 0x1cc   : > { %v2020_v4 = vrot.slane %v2019_v25, 2  ;;  %v2012_v10 = vadd.f32 %v2011_v21, %v2010_v22  ;;  %v1956_v19 = vsub.f32 %v4724_v56, %v1905_v50  ;;  %v4426_v32 = vpop.eup %4425  ;;  %v1922_v45 = vrot.slane %v1921_v20, 1 }
 0x1cd   : > { %v2027_v53 = vrot.slane %v2026_v34, 2  ;;  %4429 = vpow2.f32 %v1978_v7  ;;  %v2039_v6 = vrot.slane %v2038_v31, 4  ;;  %v2032_v51 = vrot.slane %v2031_v48, 4 }
 0x1ce   : > { %v2021_v42 = vadd.f32 %v2020_v4, %v2019_v25  ;;  %v2013_v47 = vrot.slane %v2012_v10, 2  ;;  %v4428_v52 = vpop.eup %4427  ;;  %v1927_v43 = vmax.f32 %v1925_v1, %v1926_v26  ;;  %v1982_v22 = vmul.f32 1.442695, %v1957_v14 }
 0x1cf   : > { %v2028_v27 = vadd.f32 %v2027_v53, %v2026_v34  ;;  %v1915_v54 = vmax.f32 %v1913_v16, %v1914_v36  ;;  %v1931_v58 = vmax.f32 %v4812_v38, %v1930_v44  ;;  %v2125_v60 = vmul.f32 %v4426_v32, %v4891_v18 }
 0x1d0   : > { %v1980_v0 = vmul.f32 1.442695, %v1956_v19  ;;  %v1923_v34 = vmax.f32 %v1921_v20, %v1922_v45  ;;  %v2022_v23 = vrot.slane %v2021_v42, 1  ;;  %v2124_v56 = vmul.f32 %v4428_v52, %v4894_v37 }
 0x1d1   : > { %v2029_v40 = vrot.slane %v2028_v27, 1  ;;  %v2014_v30 = vadd.f32 %v2013_v47, %v2012_v10  ;;  %v2040_v2 = vadd.f32 %v2039_v6, %v2038_v31  ;;  %v2033_v49 = vadd.f32 %v2032_v51, %v2031_v48 }
 0x1d2   : > { %v1928_v39 = vrot.slane %v1927_v43, 1  ;;  %v1936_v21 = vrot.slane %v4817_v41, 4  ;;  %4431 = vpow2.f32 %v1982_v22  ;;  %v1916_v1 = vrot.slane %v1915_v54, 1 }
 0x1d3   : > { %v4960_v25 = vpop.eup %4429  ;;  %v2030_v63 = vadd.f32 %v2029_v40, %v2028_v27  ;;  %v1932_v53 = vrot.slane %v1931_v58, 2  ;;  %v2141_v38 = vpack.c.bf16 %v2125_v60, %v2125_v60  ;;  %4433 = vpow2.f32 %v1980_v0 }
 0x1d4   : > { %v1942_v18 = vrot.slane %v4802_v29, 4  ;;  %v2023_v50 = vadd.f32 %v2022_v23, %v2021_v42  ;;  %v1959_v16 = vsub.f32 %v4730_v61, %v1923_v34  ;;  %v2140_v37 = vpack.c.bf16 %v2124_v56, %v2124_v56 }
 0x1d5   : > { %v2015_v20 = vrot.slane %v2014_v30, 1  ;;  %v2045_v4 = vsel %vm621_vm0, %v4960_v25, 0.0  ;;  %v1929_v7 = vmax.f32 %v1927_v43, %v1928_v39  ;;  %v1937_v10 = vmax.f32 %v4817_v41, %v1936_v21 }
 0x1d6   : > { %4435 = vrcp.f32 %v2030_v63  ;;  %v2041_v48 = vrot.slane %v2040_v2, 2  ;;  %v1917_v26 = vmax.f32 %v1915_v54, %v1916_v1  ;;  %v1933_v27 = vmax.f32 %v1931_v58, %v1932_v53 }
 0x1d7   : > { %v2034_v31 = vrot.slane %v2033_v49, 2  ;;  %v1943_v36 = vmax.f32 %v4802_v29, %v1942_v18  ;;  %4437 = vrcp.f32 %v2023_v50  ;;  %v2046_v61 = vrot.slane %v2045_v4, 4 }
 0x1d8   : > { %v4968_v14 = vpop.eup %4431  ;;  %v1986_v44 = vmul.f32 1.442695, %v1959_v16  ;;  %v1938_v32 = vrot.slane %v1937_v10, 2  ;;  %v2016_v45 = vadd.f32 %v2015_v20, %v2014_v30  ;;  %v2042_v42 = vadd.f32 %v2041_v48, %v2040_v2 }
 0x1d9   : > { %v4971_v19 = vpop.eup %4433  ;;  %v1960_v41 = vsub.f32 %v4732_v8, %v1929_v7  ;;  %v1934_v47 = vrot.slane %v1933_v27, 1  ;;  %v2035_v6 = vadd.f32 %v2034_v31, %v2033_v49  ;;  %v2059_v51 = vsel %vm621_vm0, %v4968_v14, 0.0 }
 0x1da   : > { %v1958_v52 = vsub.f32 %v4726_v57, %v1917_v26  ;;  %v1944_v40 = vrot.slane %v1943_v36, 2  ;;  %v2047_v29 = vadd.f32 %v2046_v61, %v2045_v4  ;;  %v2052_v22 = vsel %vm621_vm0, %v4971_v19, 0.0 }
 0x1db   : > { %4439 = vpow2.f32 %v1986_v44  ;;  %v1939_v58 = vmax.f32 %v1937_v10, %v1938_v32  ;;  %v2043_v60 = vrot.slane %v2042_v42, 1  ;;  %v2060_v0 = vrot.slane %v2059_v51, 4 }
 0x1dc   : > { %v4436_v43 = vpop.eup %4435  ;;  %v1988_v34 = vmul.f32 1.442695, %v1960_v41  ;;  %v1935_v8 = vmax.f32 %v1933_v27, %v1934_v47  ;;  %v2053_v56 = vrot.slane %v2052_v22, 4  ;;  %v1984_v30 = vmul.f32 1.442695, %v1958_v52 }
 0x1dd   : > { %v4438_v54 = vpop.eup %4437  ;;  %v2128_v23 = vmul.f32 %v4436_v43, %v4927_v3  ;;  %v1945_v2 = vmax.f32 %v1943_v36, %v1944_v40  ;;  %4441 = vrcp.f32 %v2016_v45  ;;  %v2036_v57 = vrot.slane %v2035_v6, 1 }
 0x1de   : > { %v2048_v49 = vrot.slane %v2047_v29, 2  ;;  %v2127_v39 = vmul.f32 %v4438_v54, %v4924_v33  ;;  %v1940_v63 = vrot.slane %v1939_v58, 1  ;;  %v2044_v1 = vadd.f32 %v2043_v60, %v2042_v42 }
 0x1df   : > { %v2061_v53 = vadd.f32 %v2060_v0, %v2059_v51  ;;  %4443 = vpow2.f32 %v1988_v34  ;;  %v2054_v18 = vadd.f32 %v2053_v56, %v2052_v22  ;;  %v1961_v50 = vsub.f32 %v4734_v9, %v1935_v8  ;;  %v4497_v56 = vld [vmem:[%s4605_s11 + $0x24] sm:$0xf] }
 0x1e0   : > { %4445 = vpow2.f32 %v1984_v30  ;;  %v1946_v3 = vrot.slane %v1945_v2, 1  ;;  %v2037_v16 = vadd.f32 %v2036_v57, %v2035_v6  ;;  %v2143_v20 = vpack.c.bf16 %v2127_v39, %v2127_v39 }
 0x1e1   : > { %v4981_v21 = vpop.eup %4439  ;;  %v1941_v7 = vmax.f32 %v1939_v58, %v1940_v63  ;;  %4447 = vrcp.f32 %v2044_v1  ;;  %v2062_v10 = vrot.slane %v2061_v53, 2  ;;  %v2055_v48 = vrot.slane %v2054_v18, 2  ;;  %v4498_v63 = vld [vmem:[%s4605_s11 + $0x20] sm:$0xf] }
 0x1e2   : > { %v2073_v4 = vsel %vm621_vm0, %v4981_v21, 0.0  ;;  %v1990_v26 = vmul.f32 1.442695, %v1961_v50  ;;  %v1947_v31 = vmax.f32 %v1945_v2, %v1946_v3  ;;  %4449 = vrcp.f32 %v2037_v16 }
 0x1e3   : > { %v4442_v33 = vpop.eup %4441  ;;  %v2074_v36 = vrot.slane %v2073_v4, 4  ;;  %v2063_v32 = vadd.f32 %v2062_v10, %v2061_v53  ;;  %v1962_v45 = vsub.f32 %v4736_v11, %v1941_v7  ;;  %v2056_v42 = vadd.f32 %v2055_v48, %v2054_v18  ;;  %v4499_v7 = vld [vmem:[%s4605_s11 + $0x28] sm:$0xf] }
 0x1e4   : > { %v2126_v44 = vmul.f32 %v4442_v33, %v4936_v28  ;;  %4451 = vpow2.f32 %v1990_v26  ;;  %v1963_v43 = vsub.f32 %v4738_v12, %v1947_v31  ;;  %v990_v30 = vsel %vm817_vm1, %v4497_v56, 0 }
 0x1e5   : > { %v4986_v27 = vpop.eup %4443  ;;  %v2075_v51 = vadd.f32 %v2074_v36, %v2073_v4  ;;  %v2064_v28 = vrot.slane %v2063_v32, 1  ;;  %v1992_v54 = vmul.f32 1.442695, %v1962_v45  ;;  %v2057_v58 = vrot.slane %v2056_v42, 1  ;;  %999 = vmatpush.bf16.msra.mxu1 %v990_v30  ;;  %v4503_v30 = vld [vmem:[%s4605_s11 + $0x38] sm:$0xf] }
 0x1e6   : > { %v4988_v61 = vpop.eup %4445  ;;  %v2080_v41 = vsel %vm621_vm0, %v4986_v27, 0.0  ;;  %v2142_v40 = vpack.c.bf16 %v2126_v44, %v2126_v44  ;;  %v1994_v34 = vmul.f32 1.442695, %v1963_v43  ;;  %v971_v1 = vsel %vm817_vm1, %v4498_v63, 0  ;;  %v4500_v44 = vld [vmem:[%s4605_s11 + $0x2c] sm:$0xf] }
 0x1e7   : > { %2191 = vxpose.xlu0.c.b16.start.end [1/1] (short) (narrow) %v2141_v38, 16  ;;  %v2144_v38 = vpack.c.bf16 %v2128_v23, %v2128_v23  ;;  %v4448_v47 = vpop.eup %4447  ;;  %v2066_v52 = vsel %vm621_vm0, %v4988_v61, 0.0  ;;  %v2081_v22 = vrot.slane %v2080_v41, 4  ;;  %v2076_v0 = vrot.slane %v2075_v51, 2  ;;  %980 = vmatpush.bf16.msra.mxu0 %v971_v1 }
 0x1e8   : > { %v2130_v11 = vmul.f32 %v4448_v47, %v4947_v15  ;;  %v2067_v60 = vrot.slane %v2066_v52, 4  ;;  %v2065_v12 = vadd.f32 %v2064_v28, %v2063_v32  ;;  %v1009_v10 = vsel %vm817_vm1, %v4499_v7, 0 }
 0x1e9   : > { %2156 = vxpose.xlu2.c.b16.start.end [1/1] (short) (narrow) %v2140_v37, 16  ;;  %v2049_v37 = vadd.f32 %v2048_v49, %v2047_v29  ;;  %v4450_v29 = vpop.eup %4449  ;;  %v2082_v2 = vadd.f32 %v2081_v22, %v2080_v41  ;;  %v2058_v49 = vadd.f32 %v2057_v58, %v2056_v42  ;;  %v2077_v39 = vadd.f32 %v2076_v0, %v2075_v51  ;;  %v4502_v41 = vld [vmem:[%s4605_s11 + $0x34] sm:$0xf] }
 0x1ea   : > { %v4998_v8 = vpop.eup %4451  ;;  %v2129_v23 = vmul.f32 %v4450_v29, %v4944_v35  ;;  %v2146_v57 = vpack.c.bf16 %v2130_v11, %v2130_v11  ;;  %v2068_v15 = vadd.f32 %v2067_v60, %v2066_v52  ;;  %1018 = vmatpush.bf16.msra.mxu2 %v1009_v10  ;;  %v1028_v32 = vsel %vm817_vm1, %v4500_v44, 0 }
 0x1eb   : > { %v2050_v9 = vrot.slane %v2049_v37, 1  ;;  %v2087_v53 = vsel %vm621_vm0, %v4998_v8, 0.0  ;;  %v2083_v18 = vrot.slane %v2082_v2, 2  ;;  %1037 = vmatpush.bf16.msra.mxu3 %v1028_v32  ;;  %v1066_v47 = vsel %vm817_vm1, %v4502_v41, 0  ;;  %v5043_v32 = vld [vmem:[%s5850_s2 + $0x78] sm:$0xff] }
 0x1ec   : > { %v2145_v35 = vpack.c.bf16 %v2129_v23, %v2129_v23  ;;  %v2069_v50 = vrot.slane %v2068_v15, 2  ;;  %v2088_v3 = vrot.slane %v2087_v53, 4  ;;  %1075 = vmatpush.bf16.msrb.mxu1 %v1066_v47 }
 0x1ed   : > { %v2051_v6 = vadd.f32 %v2050_v9, %v2049_v37  ;;  %v2078_v37 = vrot.slane %v2077_v39, 1  ;;  %v2084_v33 = vadd.f32 %v2083_v18, %v2082_v2  ;;  %v1085_v2 = vsel %vm817_vm1, %v4503_v30, 0 }
 0x1ee   : > { %v2070_v48 = vadd.f32 %v2069_v50, %v2068_v15  ;;  %v2089_v26 = vadd.f32 %v2088_v3, %v2087_v53  ;;  %1094 = vmatpush.bf16.msrb.mxu2 %v1085_v2  ;;  %v4504_v3 = vld [vmem:[%s4605_s11 + $0x3c] sm:$0xf]  ;;  %v5102_v2 = vld [vmem:[%s5850_s2 + $0x20] sm:$0xff] }
 0x1ef   : > { %4453 = vrcp.f32 %v2051_v6  ;;  %v2079_v36 = vadd.f32 %v2078_v37, %v2077_v39  ;;  %v2085_v52 = vrot.slane %v2084_v33, 1  ;;  %v1104_v37 = vsel %vm817_vm1, %v4504_v3, 0 }
 0x1f0   : > { %4455 = vpow2.f32 %v1992_v54  ;;  %v2071_v29 = vrot.slane %v2070_v48, 1  ;;  %v2090_v28 = vrot.slane %v2089_v26, 2  ;;  %1113 = vmatpush.bf16.msrb.mxu3 %v1104_v37  ;;  %v5132_v37 = vld [vmem:[%s4626_s14 + $0x1c] sm:$0xf] }
 0x1f1   : > { %4457 = vpow2.f32 %v1994_v34  ;;  %v2086_v58 = vadd.f32 %v2085_v52, %v2084_v33 }
 0x1f2   : > { %4459 = vrcp.f32 %v2065_v12  ;;  %v2072_v34 = vadd.f32 %v2071_v29, %v2070_v48  ;;  %v2091_v23 = vadd.f32 %v2090_v28, %v2089_v26 }
 0x1f3   : > { %4461 = vrcp.f32 %v2058_v49 }
 0x1f4   : > { %4463 = vrcp.f32 %v2079_v36 }
 0x1f5   : > { %4465 = vrcp.f32 %v2086_v58 }
 0x1f6   : > { %4467 = vrcp.f32 %v2072_v34 }
 0x1f7   : > { %2296 = vxpose.xlu0.c.b16.start.end [1/1] (short) (narrow) %v2144_v38, 16  ;;  %v4454_v38 = vpop.eup %4453 }
 0x1f8   : > { %v5007_v16 = vpop.eup %4455 }
 0x1f9   : > { %2261 = vxpose.xlu2.c.b16.start.end [1/1] (short) (narrow) %v2143_v20, 16  ;;  %v2131_v20 = vmul.f32 %v4454_v38, %v4960_v25  ;;  %v5010_v4 = vpop.eup %4457  ;;  %v2094_v31 = vsel %vm621_vm0, %v5007_v16, 0.0  ;;  %v4501_v25 = vld [vmem:[%s4605_s11 + $0x30] sm:$0xf] }
 0x1fa   : > { %v4460_v9 = vpop.eup %4459  ;;  %v1047_v42 = vsel %vm817_vm1, %v4501_v25, 0  ;;  %v2101_v6 = vsel %vm621_vm0, %v5010_v4, 0.0  ;;  %v2095_v43 = vrot.slane %v2094_v31, 4 }
 0x1fb   : > { %v2147_v45 = vpack.c.bf16 %v2131_v20, %v2131_v20  ;;  %v4462_v51 = vpop.eup %4461  ;;  %1056 = vmatpush.bf16.msrb.mxu0 %v1047_v42  ;;  %v2102_v22 = vrot.slane %v2101_v6, 4 }
 0x1fc   : > { %v2132_v11 = vmul.f32 %v4462_v51, %v4971_v19  ;;  %v2096_v60 = vadd.f32 %v2095_v43, %v2094_v31  ;;  %v2092_v19 = vrot.slane %v2091_v23, 1  ;;  %v5063_v43 = vld [vmem:[%s5850_s2 + $0x30] sm:$0xff] }
 0x1fd   : > { %v2103_v12 = vadd.f32 %v2102_v22, %v2101_v6  ;;  %v5057_v6 = vld [vmem:[%s5850_s2 + $0x70] sm:$0xff] }
 0x1fe   : > { %v2148_v56 = vpack.c.bf16 %v2132_v11, %v2132_v11  ;;  %v2093_v38 = vadd.f32 %v2092_v19, %v2091_v23 }
 0x1ff   : > { %v2104_v39 = vrot.slane %v2103_v12, 2 }
 0x201   : > { %2226 = vxpose.xlu1.c.b16.start.end [1/1] (short) (narrow) %v2142_v40, 16  ;;  %v2133_v40 = vmul.f32 %v4460_v9, %v4968_v14  ;;  %v4464_v14 = vpop.eup %4463  ;;  %v2105_v50 = vadd.f32 %v2104_v39, %v2103_v12 }
 0x202   : > { %v2135_v53 = vmul.f32 %v4464_v14, %v4981_v21  ;;  %v4466_v18 = vpop.eup %4465  ;;  %v5107_v14 = vld [vmem:[%s5850_s2 + $0x60] sm:$0xff] }
 0x203   : > { %v2149_v0 = vpack.c.bf16 %v2133_v40, %v2133_v40  ;;  %v4468_v20 = vpop.eup %4467  ;;  %v2136_v21 = vmul.f32 %v4466_v18, %v4986_v27  ;;  %v5049_v27 = vld [vmem:[%s5850_s2 + $0x38] sm:$0xff] }
 0x204   : > { %v2151_v33 = vpack.c.bf16 %v2135_v53, %v2135_v53  ;;  %v5114_v53 = vld [vmem:[%s5850_s2 + $0xa8] sm:$0xff] }
 0x205   : > { %v2152_v47 = vpack.c.bf16 %v2136_v21, %v2136_v21  ;;  %v5157_v21 = vld [vmem:[%s5850_s2 + $0x50] sm:$0xff] }
 0x207   : > { %2366 = vxpose.xlu0.c.b16.start.end [1/1] (short) (narrow) %v2146_v57, 16  ;;  %v2097_v57 = vrot.slane %v2096_v60, 2 }
 0x209   : > { %2331 = vxpose.xlu2.c.b16.start.end [1/1] (short) (narrow) %v2145_v35, 16  ;;  %v2098_v35 = vadd.f32 %v2097_v57, %v2096_v60 }
 0x20b   : > { %v2099_v48 = vrot.slane %v2098_v35, 1 }
 0x211   : > { %2401 = vxpose.xlu1.c.b16.start.end [1/1] (short) (narrow) %v2147_v45, 16  ;;  %v5025_v54 = vpop.f32.mrf.mxu0  ;;  %v2106_v45 = vrot.slane %v2105_v50, 1 }
 0x217   : > { %2471 = vxpose.xlu0.c.b16.start.end [1/1] (short) (narrow) %v2149_v0, 16  ;;  %v5075_v0 = vld [vmem:[%s5850_s2 + $0xb8] sm:$0xff] }
 0x219   : > { %v747_v49 = vpop.xlane.xlu1 %746  ;;  %2436 = vxpose.xlu2.c.b16.start.end [1/1] (short) (narrow) %v2148_v56, 16  ;;  %v832_v63 = vpop.f32.mrf.mxu0 }
 0x21a   : > { %4469 = vrcp.f32 %v747_v49  ;;  %v744_v15 = vpop.xlane.xlu0 %743 }
 0x21b   : > { %4471 = vrcp.f32 %v744_v15  ;;  %v5030_v1 = vpop.f32.mrf.mxu1 }
 0x21c   : > { %4473 = vrcp.f32 %v2093_v38 }
 0x220   : > { %v4470_v7 = vpop.eup %4469  ;;  %v5035_v10 = vpop.f32.mrf.mxu2 }
 0x221   : > { %v4472_v26 = vpop.eup %4471  ;;  %v791_v31 = vmul.f32 %v4470_v7, %v4852_v24  ;;  %2541 = vxpose.xlu1.c.b16.start.end [1/1] (short) (narrow) %v2151_v33, 16  ;;  %v2134_v24 = vmul.f32 %v4468_v20, %v4988_v61  ;;  %v2107_v61 = vadd.f32 %v2106_v45, %v2105_v50  ;;  %v5129_v50 = vld [vmem:[%s5850_s2 + $0x58] sm:$0xff]  ;;  %v5139_v20 = vld [vmem:[%s5850_s2 + $0xa0] sm:$0xff]  ;;  %v5145_v7 = vld [vmem:[%s5850_s2 + $0x10] sm:$0xff] }
 0x222   : > { %v750_v9 = vpop.xlane.xlu2 %749  ;;  %v790_v36 = vmul.f32 %v4472_v26, %v4855_v5  ;;  %v2100_v5 = vadd.f32 %v2099_v48, %v2098_v35  ;;  %v4474_v51 = vpop.eup %4473 }
 0x223   : > { %4475 = vrcp.f32 %v750_v9  ;;  %v753_v44 = vpop.xlane.xlu0 %752  ;;  %v807_v25 = vpack.c.bf16 %v791_v31, %v791_v31  ;;  %v851_v42 = vpop.f32.mrf.mxu1  ;;  %v2150_v52 = vpack.c.bf16 %v2134_v24, %v2134_v24  ;;  %v2137_v23 = vmul.f32 %v4474_v51, %v4998_v8  ;;  %v5095_v8 = vld [vmem:[%s5850_s2 + $0xb0] sm:$0xff]  ;;  %v5150_v31 = vld [vmem:[%s4626_s14 + $0x18] sm:$0xf] }
 0x224   : > { %4477 = vrcp.f32 %v753_v44  ;;  %v806_v41 = vpack.c.bf16 %v790_v36, %v790_v36  ;;  %v1125_v9 = vunpack.c.l.bf16 %v5150_v31 }
 0x225   : > { %3925 = vmatmul.msk.bf16.vlgmr.msra.gmra.mxu1 %vm621_vm0, %v807_v25  ;;  %4479 = vrcp.f32 %v2100_v5  ;;  %v2153_v30 = vpack.c.bf16 %v2137_v23, %v2137_v23 }
 0x226   : > { %3924 = vmatmul.msk.bf16.vlgmr.msra.gmra.mxu0 %vm621_vm0, %v806_v41  ;;  %1523 = vmatpush.bf16.msra.mxu1 %v5043_v32  ;;  %4481 = vrcp.f32 %v2107_v61 }
 0x227   : > { %2576 = vxpose.xlu0.c.b16.start.end [1/1] (short) (narrow) %v2152_v47, 16  ;;  %1474 = vmatpush.bf16.msra.mxu0 %v5049_v27 }
 0x228   : > { %v870_v29 = vpop.f32.mrf.mxu2 }
 0x229   : > { %v4476_v40 = vpop.eup %4475  ;;  %v5065_v28 = vpop.f32.mrf.mxu3  ;;  %2506 = vxpose.xlu2.c.b16.start.end [1/1] (short) (narrow) %v2150_v52, 16 }
 0x22a   : > { %v4478_v22 = vpop.eup %4477  ;;  %v792_v11 = vmul.f32 %v4476_v40, %v4867_v62  ;;  %v5069_v60 = vpop.f32.mrf.mxu0  ;;  %1524 = vmatpush.bf16.msra.mxu1 %v5057_v6  ;;  %v5082_v62 = vld [vmem:[%s5850_s2 + $0x28] sm:$0xff]  ;;  %v5177_v40 = vld [vmem:[%s5850_s2 + $0x98] sm:$0xff] }
 0x22b   : > { %v793_v58 = vmul.f32 %v4478_v22, %v4870_v13  ;;  %1475 = vmatpush.bf16.msra.mxu0 %v5063_v43  ;;  %v5087_v13 = vld [vmem:[%s5850_s2 + $0x68] sm:$0xff]  ;;  %v4480_v56 = vpop.eup %4479 }
 0x22c   : > { %v808_v34 = vpack.c.bf16 %v792_v11, %v792_v11  ;;  %v4482_v57 = vpop.eup %4481  ;;  %v2138_v15 = vmul.f32 %v4480_v56, %v5007_v16  ;;  %v5124_v16 = vld [vmem:[%s5850_s2 + $0x18] sm:$0xff]  ;;  %v5191_v11 = vld [vmem:[%s5850_s2] sm:$0xff] }
 0x22d   : > { %v809_v12 = vpack.c.bf16 %v793_v58, %v793_v58  ;;  %v2139_v18 = vmul.f32 %v4482_v57, %v5010_v4  ;;  %v1126_v4 = vunpack.c.l.bf16 %v5132_v37  ;;  %v5207_v56 = vld [vmem:[%s5850_s2 + $0x40] sm:$0xff] }
 0x22e   : > { %3926 = vmatmul.msk.bf16.vlgmr.msra.gmra.mxu2 %vm621_vm0, %v808_v34  ;;  %1525 = vmatpush.bf16.msra.mxu1 %v5087_v13  ;;  %v2154_v3 = vpack.c.bf16 %v2138_v15, %v2138_v15  ;;  %v5218_v15 = vld [vmem:[%s5850_s2 + $0x88] sm:$0xff] }
 0x22f   : > { %3927 = vmatmul.msk.bf16.vlgmr.msra.gmra.mxu3 %vm621_vm0, %v809_v12  ;;  %1572 = vmatpush.bf16.msra.mxu2 %v5075_v0  ;;  %v2155_v33 = vpack.c.bf16 %v2139_v18, %v2139_v18  ;;  %v5202_v12 = vld [vmem:[%s5850_s2 + $0x90] sm:$0xff] }
 0x230   : > { %1476 = vmatpush.bf16.msra.mxu0 %v5082_v62 }
 0x231   : > { %v889_v49 = vpop.f32.mrf.mxu3  ;;  %2611 = vxpose.xlu1.c.b16.start.end [1/1] (short) (narrow) %v2153_v30, 16  ;;  %v765_v19 = vpop.xlane.xlu0 %764 }
 0x232   : > { %4483 = vrcp.f32 %v765_v19  ;;  %v756_v39 = vpop.xlane.xlu1 %755  ;;  %v908_v63 = vpop.f32.mrf.mxu0  ;;  %1526 = vmatpush.bf16.msra.mxu1 %v5107_v14 }
 0x233   : > { %1573 = vmatpush.bf16.msra.mxu2 %v5095_v8  ;;  %4485 = vrcp.f32 %v756_v39  ;;  %v5116_v35 = vpop.f32.mrf.mxu1  ;;  %v759_v38 = vpop.xlane.xlu2 %758  ;;  %v4507_v39 = vld [vmem:[%s4626_s14 + $0x4] sm:$0xf] }
 0x234   : > { %1477 = vmatpush.bf16.msra.mxu0 %v5102_v2  ;;  %4487 = vrcp.f32 %v759_v38  ;;  %v1120_v63 = vunpack.c.l.bf16 %v4507_v39  ;;  %v1152_v38 = vpack.c.bf16 %v5030_v1, %v5030_v1 }
 0x236   : > { %1527 = vmatpush.bf16.msra.mxu1 %v5129_v50 }
 0x237   : > { %1574 = vmatpush.bf16.msra.mxu2 %v5114_v53  ;;  %2646 = vxpose.xlu0.c.b16.start.end [1/1] (short) (narrow) %v2154_v3, 16  ;;  %v4508_v3 = vld [vmem:[%s4626_s14] sm:$0xf] }
 0x238   : > { %1478 = vmatpush.bf16.msra.mxu0 %v5124_v16  ;;  %v4484_v48 = vpop.eup %4483 }
 0x239   : > { %v5147_v26 = vpop.f32.mrf.mxu3  ;;  %v4486_v36 = vpop.eup %4485  ;;  %v797_v44 = vmul.f32 %v4484_v48, %v4897_v46  ;;  %2681 = vxpose.xlu2.c.b16.start.end [1/1] (short) (narrow) %v2155_v33, 16  ;;  %v5170_v46 = vld [vmem:[%s5850_s2 + $0x8] sm:$0xff]  ;;  %v5231_v33 = vld [vmem:[%s5850_s2 + $0x80] sm:$0xff]  ;;  %v1136_v48 = vmul.f32 %v1120_v63, %v5030_v1 }
 0x23a   : > { %v1142_v45 = vmul.f32 %v1126_v4, %v5147_v26  ;;  %v4488_v25 = vpop.eup %4487  ;;  %v794_v42 = vmul.f32 %v4486_v36, %v4900_v17  ;;  %v762_v24 = vpop.xlane.xlu1 %761  ;;  %1528 = vmatpush.bf16.msra.mxu1 %v5157_v21  ;;  %v1151_v4 = vpack.c.bf16 %v5025_v54, %v5025_v54  ;;  %v4270_v36 = vld [vmem:[%s4626_s14] sm:$0xff] }
 0x23b   : > { %v5162_v41 = vpop.f32.mrf.mxu2  ;;  %1575 = vmatpush.bf16.msra.mxu2 %v5139_v20  ;;  %v813_v5 = vpack.c.bf16 %v797_v44, %v797_v44  ;;  %v795_v47 = vmul.f32 %v4488_v25, %v4906_v59  ;;  %v927_v61 = vpop.f32.mrf.mxu1  ;;  %4489 = vrcp.f32 %v762_v24  ;;  %v5182_v59 = vld [vmem:[%s5850_s2 + $0x48] sm:$0xff]  ;;  %v1168_v25 = vpack.c.bf16 %v1136_v48, %v1136_v48 }
 0x23c   : > { %1479 = vmatpush.bf16.msra.mxu0 %v5145_v7  ;;  %v810_v51 = vpack.c.bf16 %v794_v42, %v794_v42  ;;  %v1174_v52 = vpack.c.bf16 %v1142_v45, %v1142_v45  ;;  %v1141_v17 = vmul.f32 %v1125_v9, %v5162_v41  ;;  %v1248_v9 = vunpack.c.l.b16 %v1152_v38 }
 0x23d   : > { %v811_v29 = vpack.c.bf16 %v795_v47, %v795_v47  ;;  %v1247_v45 = vunpack.c.l.b16 %v1151_v4 }
 0x23e   : > { %v1173_v22 = vpack.c.bf16 %v1141_v17, %v1141_v17  ;;  %3928 = vmatmul.msk.bf16.vlgmr.msrb.gmra.mxu0 %vm621_vm0, %v810_v51  ;;  %v5193_v58 = vunpack.c.l.b16 %v1174_v52  ;;  %1529 = vmatpush.bf16.msra.mxu1 %v5182_v59  ;;  %v5238_v51 = vld [vmem:[%s4626_s14 + $0xc] sm:$0xf]  ;;  %v1154_v52 = vpack.c.bf16 %v5065_v28, %v5065_v28 }
 0x23f   : > { %3931 = vmatmul.msk.bf16.vlgmr.msrb.gmra.mxu3 %vm621_vm0, %v813_v5  ;;  %3929 = vmatmul.msk.bf16.vlgmr.msrb.gmra.mxu1 %vm621_vm0, %v811_v29  ;;  %v1263_v42 = vpack.c.b16 %v1248_v9, %v1247_v45  ;;  %v1296_v5 = vunpack.c.l.b16 %v1168_v25  ;;  %v1122_v1 = vunpack.c.l.bf16 %v5238_v51  ;;  %v1153_v29 = vpack.c.bf16 %v5035_v10, %v5035_v10  ;;  %v5251_v9 = vld [vmem:[%s4626_s14 + $0x14] sm:$0xf] }
 0x240   : > { %1480 = vmatpush.bf16.msra.mxu0 %v5170_v46  ;;  %v5195_v34 = vunpack.c.l.b16 %v1173_v22  ;;  %1576 = vmatpush.bf16.msra.mxu2 %v5177_v40 }
 0x241   : > { %v965_v23 = vpop.f32.mrf.mxu3  ;;  %v4490_v30 = vpop.eup %4489  ;;  %v1138_v22 = vmul.f32 %v1122_v1, %v5065_v28  ;;  %v1124_v28 = vunpack.c.l.bf16 %v5251_v9  ;;  %v4513_v1 = vld [vmem:[%s4626_s14 + $0x24] sm:$0xf] }
 0x242   : > { %v1314_v49 = vpack.c.b16 %v5193_v58, %v5195_v34  ;;  %v796_v19 = vmul.f32 %v4490_v30, %v4917_v55  ;;  %1530 = vmatpush.bf16.msra.mxu1 %v5207_v56  ;;  %v1119_v55 = vunpack.c.l.bf16 %v4508_v3  ;;  %v1250_v23 = vunpack.c.l.b16 %v1154_v52  ;;  %v4271_v30 = vld [vmem:[%s4626_s14 + $0x8] sm:$0xff]  ;;  %v5288_v34 = vld [vmem:[%s4626_s14 + $0x20] sm:$0xf] }
 0x243   : > { %v946_v57 = vpop.f32.mrf.mxu2  ;;  %v1170_v63 = vpack.c.bf16 %v1138_v22, %v1138_v22  ;;  %v1140_v25 = vmul.f32 %v1124_v28, %v5116_v35  ;;  %v2491_v52 = vsel %vm817_vm1, %v4513_v1, 0  ;;  %v4274_v28 = vld [vmem:[%s4626_s14 + $0x20] sm:$0xff]  ;;  %v1128_v58 = vunpack.c.l.bf16 %v4513_v1 }
 0x244   : > { %1481 = vmatpush.bf16.msra.mxu0 %v5191_v11  ;;  %1577 = vmatpush.bf16.msra.mxu2 %v5202_v12  ;;  %v812_v18 = vpack.c.bf16 %v796_v19, %v796_v19  ;;  %v1135_v44 = vmul.f32 %v1119_v55, %v5025_v54  ;;  %v4510_v54 = vld [vmem:[%s4626_s14 + $0x8] sm:$0xf]  ;;  %v1249_v19 = vunpack.c.l.b16 %v1153_v29 }
 0x245   : > { %v1121_v17 = vunpack.c.l.bf16 %v4510_v54  ;;  %v1298_v4 = vunpack.c.l.b16 %v1170_v63 }
 0x246   : > { %3930 = vmatmul.msk.bf16.vlgmr.msrb.gmra.mxu2 %vm621_vm0, %v812_v18  ;;  %v1167_v24 = vpack.c.bf16 %v1135_v44, %v1135_v44  ;;  %v1264_v38 = vpack.c.b16 %v1250_v23, %v1249_v19  ;;  %v2176_v18 = vsel %vm817_vm1, %v4508_v3, 0  ;;  %v5257_v44 = vld [vmem:[%s4626_s14 + $0x10] sm:$0xf]  ;;  %v1155_v3 = vpack.c.bf16 %v5069_v60, %v5069_v60  ;;  %v4273_v19 = vld [vmem:[%s4626_s14 + $0x18] sm:$0xff] }
 0x247   : > { %v1137_v57 = vmul.f32 %v1121_v17, %v5035_v10  ;;  %2185 = vmatpush.bf16.msra.mxu3 %v2176_v18  ;;  %v1156_v10 = vpack.c.bf16 %v5116_v35, %v5116_v35  ;;  %v1123_v45 = vunpack.c.l.bf16 %v5257_v44  ;;  %v1172_v17 = vpack.c.bf16 %v1140_v25, %v1140_v25 }
 0x248   : > { %1578 = vmatpush.bf16.msra.mxu2 %v5218_v15  ;;  %v1295_v47 = vunpack.c.l.b16 %v1167_v24  ;;  %v4272_v24 = vld [vmem:[%s4626_s14 + $0x10] sm:$0xff]  ;;  %2500 = vmatpush.bf16.msrb.mxu0 %v2491_v52 }
 0x249   : > { %v1169_v55 = vpack.c.bf16 %v1137_v57, %v1137_v57  ;;  %v1300_v35 = vunpack.c.l.b16 %v1172_v17 }
 0x24a   : > { %v1311_v61 = vpack.c.b16 %v1296_v5, %v1295_v47  ;;  %v1139_v5 = vmul.f32 %v1123_v45, %v5069_v60  ;;  %v1251_v47 = vunpack.c.l.b16 %v1155_v3  ;;  %v1157_v60 = vpack.c.bf16 %v5162_v41, %v5162_v41  ;;  %v4515_v41 = vld [vmem:[%s4626_s14 + $0x28] sm:$0xf] }
 0x24b   : > { %v1297_v48 = vunpack.c.l.b16 %v1169_v55  ;;  %v4275_v45 = vld [vmem:[%s4626_s14 + $0x28] sm:$0xff] }
 0x24c   : > { %1579 = vmatpush.bf16.msra.mxu2 %v5231_v33  ;;  %v1171_v22 = vpack.c.bf16 %v1139_v5, %v1139_v5  ;;  %v1253_v57 = vunpack.c.l.b16 %v1157_v60 }
 0x24e   : > { %1482 = vmatmul.bf16.vlgmr.msra.gmra.mxu0 %v4270_v36  ;;  %v1312_v36 = vpack.c.b16 %v1298_v4, %v1297_v48  ;;  %v1299_v23 = vunpack.c.l.b16 %v1171_v22  ;;  %v2246_v4 = vsel %vm817_vm1, %v4510_v54, 0 }
 0x24f   : > { %1531 = vmatmul.bf16.vlgmr.msra.gmra.mxu1 %v1263_v42  ;;  %v1252_v42 = vunpack.c.l.b16 %v1156_v10 }
 0x251   : > { %v1265_v29 = vpack.c.b16 %v1252_v42, %v1251_v47 }
 0x256   : > { %1580 = vmatmul.bf16.vlgmr.msra.gmra.mxu2 %v1311_v61  ;;  %v2211_v61 = vsel %vm817_vm1, %v4507_v39, 0  ;;  %v1158_v39 = vpack.c.bf16 %v5147_v26, %v5147_v26  ;;  %v2526_v26 = vsel %vm817_vm1, %v4515_v41, 0 }
 0x257   : > { %2220 = vmatpush.bf16.msrb.mxu3 %v2211_v61  ;;  %2535 = vmatpush.bf16.msrb.mxu1 %v2526_v26 }
 0x258   : > { %v1254_v63 = vunpack.c.l.b16 %v1158_v39 }
 0x25a   : > { %v1266_v55 = vpack.c.b16 %v1254_v63, %v1253_v57  ;;  %v1129_v57 = vunpack.c.l.bf16 %v4515_v41 }
 0x25e   : > { %1487 = vmatmul.bf16.gmra.mxu0 %v4271_v30  ;;  %v1313_v30 = vpack.c.b16 %v1300_v35, %v1299_v23  ;;  %v4276_v23 = vld [vmem:[%s4626_s14 + $0x30] sm:$0xff] }
 0x25f   : > { %1536 = vmatmul.bf16.gmra.mxu1 %v1264_v38  ;;  %v4514_v38 = vld [vmem:[%s4626_s14 + $0x2c] sm:$0xf] }
 0x260   : > { %v2561_v18 = vsel %vm817_vm1, %v4514_v38, 0 }
 0x261   : > { %2570 = vmatpush.bf16.msrb.mxu2 %v2561_v18 }
 0x266   : > { %1585 = vmatmul.bf16.gmra.mxu2 %v1312_v36  ;;  %v2281_v36 = vsel %vm817_vm1, %v5238_v51, 0 }
 0x26e   : > { %1492 = vmatmul.bf16.gmra.mxu0 %v4272_v24 }
 0x26f   : > { %1541 = vmatmul.bf16.gmra.mxu1 %v1265_v29 }
 0x276   : > { %1590 = vmatmul.bf16.gmra.mxu2 %v1313_v30  ;;  %v2316_v30 = vsel %vm817_vm1, %v5257_v44, 0 }
 0x27e   : > { %1497 = vmatmul.bf16.gmra.mxu0 %v4273_v19  ;;  %v1130_v19 = vunpack.c.l.bf16 %v4514_v38 }
 0x27f   : > { %1546 = vmatmul.bf16.gmra.mxu1 %v1266_v55 }
 0x286   : > { %1595 = vmatmul.bf16.gmra.mxu2 %v1314_v49  ;;  %v1127_v49 = vunpack.c.l.bf16 %v5288_v34 }
 0x28a   : > { %v2164_v48 = vpop.trf.xlu2 }
 0x28b   : > { %4060 = vmatmul.msk.bf16.vlgmr.msra.gmra.mxu3 %vm621_vm0, %v2164_v48 }
 0x28c   : > { %2255 = vmatpush.bf16.msra.mxu3 %v2246_v4 }
 0x28e   : > { %1502 = vmatmul.bf16.gmra.mxu0 %v4274_v28 }
 0x293   : > { %v2199_v10 = vpop.trf.xlu0 }
 0x29b   : > { %4061 = vmatmul.msk.bf16.vlgmr.msrb.gmra.mxu3 %vm621_vm0, %v2199_v10 }
 0x29c   : > { %2290 = vmatpush.bf16.msrb.mxu3 %v2281_v36 }
 0x29e   : > { %1507 = vmatmul.bf16.gmra.mxu0 %v4275_v45 }
 0x2a2   : > { %v1001_v54 = vpop.f32.mrf.mxu1 }
 0x2a3   : > { %v1144_v3 = vmul.f32 %v1128_v58, %v1001_v54  ;;  %v1160_v25 = vpack.c.bf16 %v1001_v54, %v1001_v54  ;;  %v982_v42 = vpop.f32.mrf.mxu0  ;;  %v5296_v54 = vld [vmem:[%s4626_s14 + $0x34] sm:$0xf] }
 0x2a4   : > { %v1143_v24 = vmul.f32 %v1127_v49, %v982_v42  ;;  %v1159_v5 = vpack.c.bf16 %v982_v42, %v982_v42  ;;  %v4277_v42 = vld [vmem:[%s4626_s14 + $0x38] sm:$0xff] }
 0x2a5   : > { %v1176_v47 = vpack.c.bf16 %v1144_v3, %v1144_v3  ;;  %v1256_v61 = vunpack.c.l.b16 %v1160_v25  ;;  %v1132_v3 = vunpack.c.l.bf16 %v5296_v54 }
 0x2a6   : > { %v1175_v51 = vpack.c.bf16 %v1143_v24, %v1143_v24  ;;  %v1255_v52 = vunpack.c.l.b16 %v1159_v5  ;;  %v2269_v5 = vpop.trf.xlu2 }
 0x2a7   : > { %v1304_v17 = vunpack.c.l.b16 %v1176_v47  ;;  %v5301_v47 = vld [vmem:[%s4626_s14 + $0x30] sm:$0xf] }
 0x2a8   : > { %v1303_v29 = vunpack.c.l.b16 %v1175_v51  ;;  %v1267_v22 = vpack.c.b16 %v1256_v61, %v1255_v52  ;;  %v1131_v61 = vunpack.c.l.bf16 %v5301_v47  ;;  %v2351_v52 = vsel %vm817_vm1, %v5251_v9, 0  ;;  %v5310_v9 = vld [vmem:[%s5851_s3] ss:$0 sm:$0xff] }
 0x2aa   : > { %v1003_v35 = vpop.f32.mrf.mxu1  ;;  %1551 = vmatmul.bf16.gmra.mxu1 %v1267_v22  ;;  %v1315_v1 = vpack.c.b16 %v1304_v17, %v1303_v29 }
 0x2ab   : > { %v984_v60 = vpop.f32.mrf.mxu0 }
 0x2ac   : > { %1600 = vmatmul.bf16.gmra.mxu2 %v1315_v1 }
 0x2ad   : > { %v2234_v39 = vpop.trf.xlu1 }
 0x2ae   : > { %4062 = vmatmul.msk.bf16.vlgmr.msra.gmra.mxu3 %vm621_vm0, %v2234_v39  ;;  %1512 = vmatmul.bf16.gmra.mxu0 %v4276_v23 }
 0x2af   : > { %2325 = vmatpush.bf16.msra.mxu3 %v2316_v30 }
 0x2b1   : > { %v1020_v63 = vpop.f32.mrf.mxu2 }
 0x2b2   : > { %v1145_v18 = vmul.f32 %v1129_v57, %v1020_v63  ;;  %v1039_v55 = vpop.f32.mrf.mxu3  ;;  %v1161_v26 = vpack.c.bf16 %v1020_v63, %v1020_v63 }
 0x2b3   : > { %v1146_v4 = vmul.f32 %v1130_v19, %v1039_v55  ;;  %v1162_v48 = vpack.c.bf16 %v1039_v55, %v1039_v55 }
 0x2b4   : > { %v1177_v28 = vpack.c.bf16 %v1145_v18, %v1145_v18  ;;  %v1257_v44 = vunpack.c.l.b16 %v1161_v26 }
 0x2b5   : > { %v1178_v10 = vpack.c.bf16 %v1146_v4, %v1146_v4  ;;  %v1258_v36 = vunpack.c.l.b16 %v1162_v48  ;;  %v5313_v48 = vld [vmem:[%s4626_s14 + $0x38] sm:$0xf] }
 0x2b6   : > { %v1305_v41 = vunpack.c.l.b16 %v1177_v28  ;;  %v1133_v28 = vunpack.c.l.bf16 %v5313_v48 }
 0x2b7   : > { %v1306_v45 = vunpack.c.l.b16 %v1178_v10  ;;  %v1268_v49 = vpack.c.b16 %v1258_v36, %v1257_v44  ;;  %v2304_v44 = vpop.trf.xlu0 }
 0x2b9   : > { %v1022_v58 = vpop.f32.mrf.mxu2  ;;  %v1316_v25 = vpack.c.b16 %v1306_v45, %v1305_v41  ;;  %v5317_v45 = vld [vmem:[%s4626_s14 + $0x3c] sm:$0xf] }
 0x2ba   : > { %v1041_v38 = vpop.f32.mrf.mxu3  ;;  %1556 = vmatmul.bf16.gmra.mxu1 %v1268_v49  ;;  %v1134_v41 = vunpack.c.l.bf16 %v5317_v45 }
 0x2bb   : > { %v1058_v24 = vpop.f32.mrf.mxu0  ;;  %v2386_v38 = vsel %vm817_vm1, %v5150_v31, 0 }
 0x2bc   : > { %v1077_v51 = vpop.f32.mrf.mxu1  ;;  %1605 = vmatmul.bf16.gmra.mxu2 %v1316_v25  ;;  %v1147_v29 = vmul.f32 %v1131_v61, %v1058_v24  ;;  %v1163_v1 = vpack.c.bf16 %v1058_v24, %v1058_v24 }
 0x2bd   : > { %v1148_v17 = vmul.f32 %v1132_v3, %v1077_v51  ;;  %v1164_v22 = vpack.c.bf16 %v1077_v51, %v1077_v51 }
 0x2be   : > { %4063 = vmatmul.msk.bf16.vlgmr.msrb.gmra.mxu3 %vm621_vm0, %v2269_v5  ;;  %1517 = vmatmul.bf16.gmra.mxu0 %v4277_v42  ;;  %v1179_v30 = vpack.c.bf16 %v1147_v29, %v1147_v29  ;;  %v1259_v19 = vunpack.c.l.b16 %v1163_v1 }
 0x2bf   : > { %2360 = vmatpush.bf16.msrb.mxu3 %v2351_v52  ;;  %v1180_v23 = vpack.c.bf16 %v1148_v17, %v1148_v17  ;;  %v1260_v39 = vunpack.c.l.b16 %v1164_v22 }
 0x2c0   : > { %v1307_v18 = vunpack.c.l.b16 %v1179_v30 }
 0x2c1   : > { %v1308_v63 = vunpack.c.l.b16 %v1180_v23  ;;  %v1269_v55 = vpack.c.b16 %v1260_v39, %v1259_v19  ;;  %v2339_v39 = vpop.trf.xlu2 }
 0x2c2   : > { %v1115_v35 = vpop.f32.mrf.mxu3 }
 0x2c3   : > { %v1060_v60 = vpop.f32.mrf.mxu0  ;;  %v1317_v10 = vpack.c.b16 %v1308_v63, %v1307_v18  ;;  %v1150_v42 = vmul.f32 %v1134_v41, %v1115_v35  ;;  %v1166_v5 = vpack.c.bf16 %v1115_v35, %v1115_v35  ;;  %v4546_v18 = vmov 8.0  }
 0x2c4   : > { %v1079_v57 = vpop.f32.mrf.mxu1  ;;  %4491 = vrcp.f32 %v4546_v18 }
 0x2c5   : > { %v1182_v17 = vpack.c.bf16 %v1150_v42, %v1150_v42  ;;  %v1262_v1 = vunpack.c.l.b16 %v1166_v5 }
 0x2c7   : > { %v1310_v60 = vunpack.c.l.b16 %v1182_v17  ;;  %v2631_v17 = vsel %vm817_vm1, %v5296_v54, 0 }
 0x2c8   : > { %2640 = vmatpush.bf16.msra.mxu0 %v2631_v17 }
 0x2c9   : > { %v1096_v4 = vpop.f32.mrf.mxu2 }
 0x2ca   : > { %v1117_v26 = vpop.f32.mrf.mxu3  ;;  %1561 = vmatmul.bf16.gmra.mxu1 %v1269_v55  ;;  %v1149_v3 = vmul.f32 %v1133_v28, %v1096_v4  ;;  %v1165_v24 = vpack.c.bf16 %v1096_v4, %v1096_v4 }
 0x2cb   : > { %v1483_v36 = vpop.f32.mrf.mxu0  ;;  %v2421_v26 = vsel %vm817_vm1, %v5132_v37, 0 }
 0x2cc   : > { %v1484_v58 = vadd.f32 %v5310_v9, %v1483_v36  ;;  %v1532_v49 = vpop.f32.mrf.mxu1  ;;  %1610 = vmatmul.bf16.gmra.mxu2 %v1317_v10  ;;  %v1181_v61 = vpack.c.bf16 %v1149_v3, %v1149_v3  ;;  %v1261_v29 = vunpack.c.l.b16 %v1165_v24  ;;  %v2374_v36 = vpop.trf.xlu0 }
 0x2ce   : > { %v1533_v25 = vadd.f32 %v1532_v49, %v1484_v58  ;;  %4064 = vmatmul.msk.bf16.vlgmr.msra.gmra.mxu3 %vm621_vm0, %v2304_v44  ;;  %v1309_v23 = vunpack.c.l.b16 %v1181_v61  ;;  %v1270_v30 = vpack.c.b16 %v1262_v1, %v1261_v29  ;;  %v5329_v58 = vpop.trf.xlu2  ;;  %v5331_v49 = vpop.eup %4491 }
 0x2cf   : > { %2395 = vmatpush.bf16.msra.mxu3 %v2386_v38  ;;  %v1734_v37 = vmul.f32 8.0, %v5331_v49  ;;  %vm1738_vm2 = vweird.f32 %v5331_v49 }
 0x2d0   : > { %v1318_v57 = vpack.c.b16 %v1310_v60, %v1309_v23 }
 0x2d1   : > { %v1098_v51 = vpop.f32.mrf.mxu2  ;;  %v1735_v1 = vsub.f32 1.0, %v1734_v37 }
 0x2d2   : > { %v5334_v51 = vpop.trf.xlu1 }
 0x2d3   : > { %v1485_v52 = vpop.f32.mrf.mxu0 }
 0x2d4   : > { %v1534_v22 = vpop.f32.mrf.mxu1  ;;  %v1486_v4 = vadd.f32 %v5310_v9, %v1485_v52  ;;  %v2479_v52 = vpop.trf.xlu0 }
 0x2d5   : > { %4069 = vmatmul.msk.bf16.vlgmr.msrb.gmra.mxu0 %vm621_vm0, %v2479_v52 }
 0x2d6   : > { %v1535_v44 = vadd.f32 %v1534_v22, %v1486_v4  ;;  %2973 = vmatpush.bf16.msrb.mxu0 %v5043_v32  ;;  %v1736_v4 = vmul.f32 %v5331_v49, %v1735_v1 }
 0x2d9   : > { %v1581_v31 = vpop.f32.mrf.mxu2 }
 0x2da   : > { %1566 = vmatmul.bf16.gmra.mxu1 %v1270_v30  ;;  %v1582_v19 = vadd.f32 %v1581_v31, %v1533_v25  ;;  %v2514_v30 = vpop.trf.xlu2  ;;  %v2666_v31 = vsel %vm817_vm1, %v5313_v48, 0  ;;  %2974 = vmatpush.bf16.msrb.mxu0 %v5057_v6 }
 0x2db   : > { %v1488_v63 = vpop.f32.mrf.mxu0  ;;  %2675 = vmatpush.bf16.msra.mxu1 %v2666_v31 }
 0x2dc   : > { %v1489_v35 = vadd.f32 %v5310_v9, %v1488_v63  ;;  %v1537_v55 = vpop.f32.mrf.mxu1  ;;  %1615 = vmatmul.bf16.gmra.mxu2 %v1318_v57  ;;  %v1621_v28 = vmax.f32 %v1582_v19, 0.0 }
 0x2de   : > { %v1538_v10 = vadd.f32 %v1537_v55, %v1489_v35  ;;  %4065 = vmatmul.msk.bf16.vlgmr.msrb.gmra.mxu3 %vm621_vm0, %v2339_v39  ;;  %v1637_v41 = vrot.slane %v1621_v28, 4  ;;  %2975 = vmatpush.bf16.msrb.mxu0 %v5087_v13 }
 0x2df   : > { %2430 = vmatpush.bf16.msrb.mxu3 %v2421_v26  ;;  %v2456_v26 = vsel %vm817_vm1, %v5288_v34, 0 }
 0x2e0   : > { %v1638_v24 = vadd.f32 %v1637_v41, %v1621_v28  ;;  %v1757_v29 = vmax.f32 %v1621_v28, %v1637_v41 }
 0x2e1   : > { %v1583_v38 = vpop.f32.mrf.mxu2 }
 0x2e2   : > { %v1584_v3 = vadd.f32 %v1583_v38, %v1535_v44  ;;  %v1639_v22 = vrot.slane %v1638_v24, 2  ;;  %v1758_v18 = vrot.slane %v1757_v29, 2  ;;  %2976 = vmatpush.bf16.msrb.mxu0 %v5107_v14 }
 0x2e3   : > { %v1490_v25 = vpop.f32.mrf.mxu0 }
 0x2e4   : > { %v1539_v42 = vpop.f32.mrf.mxu1  ;;  %v1622_v5 = vmax.f32 %v1584_v3, 0.0  ;;  %v1640_v32 = vadd.f32 %v1639_v22, %v1638_v24  ;;  %v1491_v41 = vadd.f32 %v5310_v9, %v1490_v25  ;;  %v2549_v3 = vpop.trf.xlu1  ;;  %v1759_v37 = vmax.f32 %v1757_v29, %v1758_v18 }
 0x2e5   : > { %v1737_v25 = vadd.f32 %v5331_v49, %v1736_v4 }
 0x2e6   : > { %v1643_v61 = vrot.slane %v1622_v5, 4  ;;  %2977 = vmatpush.bf16.msrb.mxu0 %v5129_v50 }
 0x2e8   : > { %v1644_v23 = vadd.f32 %v1643_v61, %v1622_v5  ;;  %v1763_v60 = vmax.f32 %v1622_v5, %v1643_v61  ;;  %v5353_v61 = vpop.trf.xlu0 }
 0x2e9   : > { %v1586_v39 = vpop.f32.mrf.mxu2 }
 0x2ea   : > { %4070 = vmatmul.msk.bf16.vlgmr.msrb.gmra.mxu1 %vm621_vm0, %v2514_v30  ;;  %v1645_v57 = vrot.slane %v1644_v23, 2  ;;  %v1764_v19 = vrot.slane %v1763_v60, 2  ;;  %v1587_v54 = vadd.f32 %v1586_v39, %v1538_v10  ;;  %2978 = vmatpush.bf16.msrb.mxu0 %v5157_v21 }
 0x2eb   : > { %v1493_v63 = vpop.f32.mrf.mxu0  ;;  %3022 = vmatpush.bf16.msrb.mxu1 %v5075_v0  ;;  %v1641_v0 = vrot.slane %v1640_v32, 1 }
 0x2ec   : > { %v1494_v35 = vadd.f32 %v5310_v9, %v1493_v63  ;;  %v1542_v55 = vpop.f32.mrf.mxu1  ;;  %v1646_v28 = vadd.f32 %v1645_v57, %v1644_v23  ;;  %v1623_v44 = vmax.f32 %v1587_v54, 0.0  ;;  %v1765_v48 = vmax.f32 %v1763_v60, %v1764_v19  ;;  %4071 = vmatmul.msk.bf16.vlgmr.msrb.gmra.mxu2 %vm621_vm0, %v2549_v3  ;;  %v2619_v63 = vpop.trf.xlu1 }
 0x2ed   : > { %v1642_v30 = vadd.f32 %v1641_v0, %v1640_v32  ;;  %v5360_v57 = vsel %vm1738_vm2, %v5331_v49, %v1737_v25  ;;  %4073 = vmatmul.msk.bf16.vlgmr.msra.gmra.mxu0 %vm621_vm0, %v2619_v63  ;;  %v2596_v3 = vsel %vm817_vm1, %v5301_v47, 0 }
 0x2ee   : > { %v1543_v10 = vadd.f32 %v1542_v55, %v1494_v35  ;;  %4066 = vmatmul.msk.bf16.vlgmr.msra.gmra.mxu3 %vm621_vm0, %v2374_v36  ;;  %v1649_v38 = vrot.slane %v1623_v44, 4  ;;  %v1647_v34 = vrot.slane %v1646_v28, 1  ;;  %v1766_v52 = vrot.slane %v1765_v48, 1  ;;  %2979 = vmatpush.bf16.msrb.mxu0 %v5182_v59 }
 0x2ef   : > { %2465 = vmatpush.bf16.msra.mxu3 %v2456_v26  ;;  %3023 = vmatpush.bf16.msrb.mxu1 %v5095_v8  ;;  %v1540_v36 = vadd.f32 %v1539_v42, %v1491_v41  ;;  %v1760_v8 = vrot.slane %v1759_v37, 1 }
 0x2f0   : > { %v1650_v24 = vadd.f32 %v1649_v38, %v1623_v44  ;;  %v1769_v5 = vmax.f32 %v1623_v44, %v1649_v38  ;;  %v1648_v1 = vadd.f32 %v1647_v34, %v1646_v28  ;;  %v1767_v42 = vmax.f32 %v1765_v48, %v1766_v52  ;;  %v2654_v32 = vpop.trf.xlu0 }
 0x2f1   : > { %v1588_v17 = vpop.f32.mrf.mxu2  ;;  %v1761_v18 = vmax.f32 %v1759_v37, %v1760_v8 }
 0x2f2   : > { %v1651_v6 = vrot.slane %v1650_v24, 2  ;;  %v1770_v29 = vrot.slane %v1769_v5, 2  ;;  %v1589_v23 = vadd.f32 %v1588_v17, %v1540_v36  ;;  %v1741_v35 = vmul.f32 %v5360_v57, %v1648_v1  ;;  %2980 = vmatpush.bf16.msrb.mxu0 %v5207_v56 }
 0x2f3   : > { %v1495_v22 = vpop.f32.mrf.mxu0  ;;  %3024 = vmatpush.bf16.msrb.mxu1 %v5114_v53  ;;  %v1740_v53 = vmul.f32 %v5360_v57, %v1642_v30  ;;  %v3350_v14 = vsel %vm3311_vm3, %v1767_v42, %v1761_v18 }
 0x2f4   : > { %v1544_v60 = vpop.f32.mrf.mxu1  ;;  %v1652_v39 = vadd.f32 %v1651_v6, %v1650_v24  ;;  %v1771_v31 = vmax.f32 %v1769_v5, %v1770_v29  ;;  %v1624_v19 = vmax.f32 %v1589_v23, 0.0  ;;  %v1496_v25 = vadd.f32 %v5310_v9, %v1495_v22 }
 0x2f5   : > { %v3312_v37 = vsel %vm3311_vm3, %v1741_v35, %v1740_v53 }
 0x2f6   : > { %v1653_v13 = vrot.slane %v1652_v39, 1  ;;  %v1772_v54 = vrot.slane %v1771_v31, 1  ;;  %v1655_v55 = vrot.slane %v1624_v19, 4  ;;  %v1545_v29 = vadd.f32 %v1544_v60, %v1496_v25 }
 0x2f7   : > { %3025 = vmatpush.bf16.msrb.mxu1 %v5139_v20 }
 0x2f8   : > { %v1654_v49 = vadd.f32 %v1653_v13, %v1652_v39  ;;  %v1773_v26 = vmax.f32 %v1771_v31, %v1772_v54  ;;  %v1656_v4 = vadd.f32 %v1655_v55, %v1624_v19  ;;  %v1775_v28 = vmax.f32 %v1624_v19, %v1655_v55 }
 0x2f9   : > { %v1591_v44 = vpop.f32.mrf.mxu2 }
 0x2fa   : > { %4074 = vmatmul.msk.bf16.vlgmr.msra.gmra.mxu1 %vm621_vm0, %v2654_v32  ;;  %v1742_v48 = vmul.f32 %v5360_v57, %v1654_v49  ;;  %v3351_v20 = vsel %vm3313_vm4, %v1773_v26, %v3350_v14  ;;  %v1592_v41 = vadd.f32 %v1591_v44, %v1543_v10  ;;  %v1657_v34 = vrot.slane %v1656_v4, 2 }
 0x2fb   : > { %v1498_v38 = vpop.f32.mrf.mxu0  ;;  %v1776_v0 = vrot.slane %v1775_v28, 2  ;;  %3026 = vmatpush.bf16.msrb.mxu1 %v5177_v40 }
 0x2fc   : > { %v1499_v24 = vadd.f32 %v5310_v9, %v1498_v38  ;;  %v1547_v5 = vpop.f32.mrf.mxu1  ;;  %v3314_v50 = vsel %vm3313_vm4, %v1742_v48, %v3312_v37  ;;  %v1625_v52 = vmax.f32 %v1592_v41, 0.0  ;;  %v1658_v36 = vadd.f32 %v1657_v34, %v1656_v4 }
 0x2fd   : > { %v1777_v10 = vmax.f32 %v1775_v28, %v1776_v0 }
 0x2fe   : > { %v1548_v17 = vadd.f32 %v1547_v5, %v1499_v24  ;;  %4067 = vmatmul.msk.bf16.vlgmr.msrb.gmra.mxu3 %vm621_vm0, %v5334_v51  ;;  %v1661_v47 = vrot.slane %v1625_v52, 4  ;;  %v1659_v6 = vrot.slane %v1658_v36, 1 }
 0x2ff   : > { %2605 = vmatpush.bf16.msrb.mxu3 %v2596_v3  ;;  %3027 = vmatpush.bf16.msrb.mxu1 %v5202_v12  ;;  %v1778_v1 = vrot.slane %v1777_v10, 1 }
 0x300   : > { %v1662_v40 = vadd.f32 %v1661_v47, %v1625_v52  ;;  %v1781_v8 = vmax.f32 %v1625_v52, %v1661_v47  ;;  %v1660_v31 = vadd.f32 %v1659_v6, %v1658_v36 }
 0x301   : > { %v1593_v23 = vpop.f32.mrf.mxu2  ;;  %v1779_v19 = vmax.f32 %v1777_v10, %v1778_v1 }
 0x302   : > { %v1663_v22 = vrot.slane %v1662_v40, 2  ;;  %v1782_v30 = vrot.slane %v1781_v8, 2  ;;  %v1594_v39 = vadd.f32 %v1593_v23, %v1545_v29  ;;  %v1743_v54 = vmul.f32 %v5360_v57, %v1660_v31 }
 0x303   : > { %3028 = vmatpush.bf16.msrb.mxu1 %v5218_v15  ;;  %v3352_v15 = vsel %vm3315_vm5, %v1779_v19, %v3351_v20  ;;  %v1500_v55 = vpop.f32.mrf.mxu0 }
 0x304   : > { %v1664_v51 = vadd.f32 %v1663_v22, %v1662_v40  ;;  %v1783_v21 = vmax.f32 %v1781_v8, %v1782_v30  ;;  %v1626_v42 = vmax.f32 %v1594_v39, 0.0  ;;  %v3316_v14 = vsel %vm3315_vm5, %v1743_v54, %v3314_v50  ;;  %v1549_v41 = vpop.f32.mrf.mxu1  ;;  %v4521_v8 = vld [vmem:[%s4605_s11] sm:$0xf]  ;;  %v2689_v39 = vpop.trf.xlu2  ;;  %v4522_v54 = vld [vmem:[%s4605_s11 + $0x4] sm:$0xf] }
 0x305   : > { %v1501_v20 = vadd.f32 %v5310_v9, %v1500_v55  ;;  %v2716_v1 = vunpack.c.l.bf16 %v4521_v8 }
 0x306   : > { %v1665_v12 = vrot.slane %v1664_v51, 1  ;;  %v1784_v60 = vrot.slane %v1783_v21, 1  ;;  %v1667_v13 = vrot.slane %v1626_v42, 4 }
 0x307   : > { %3029 = vmatpush.bf16.msrb.mxu1 %v5231_v33  ;;  %v2701_v33 = vsel %vm817_vm1, %v5317_v45, 0  ;;  %v1550_v5 = vadd.f32 %v1549_v41, %v1501_v20 }
 0x308   : > { %v1666_v59 = vadd.f32 %v1665_v12, %v1664_v51  ;;  %v1785_v63 = vmax.f32 %v1783_v21, %v1784_v60  ;;  %v1668_v18 = vadd.f32 %v1667_v13, %v1626_v42  ;;  %v1787_v35 = vmax.f32 %v1626_v42, %v1667_v13  ;;  %2710 = vmatpush.bf16.msra.mxu2 %v2701_v33 }
 0x309   : > { %v1596_v53 = vpop.f32.mrf.mxu2 }
 0x30a   : > { %v1744_v49 = vmul.f32 %v5360_v57, %v1666_v59  ;;  %v3353_v56 = vsel %vm3317_vm6, %v1785_v63, %v3352_v15  ;;  %v1669_v26 = vrot.slane %v1668_v18, 2  ;;  %v1788_v32 = vrot.slane %v1787_v35, 2 }
 0x30b   : > { %v1597_v4 = vadd.f32 %v1596_v53, %v1548_v17  ;;  %v5404_v22 = vpop.f32.mrf.mxu0  ;;  %4075 = vmatmul.msk.bf16.vlgmr.msra.gmra.mxu2 %vm621_vm0, %v2689_v39  ;;  %v2717_v59 = vunpack.c.l.bf16 %v4522_v54 }
 0x30c   : > { %v3318_v28 = vsel %vm3317_vm6, %v1744_v49, %v3316_v14  ;;  %v1670_v44 = vadd.f32 %v1669_v26, %v1668_v18  ;;  %v1789_v48 = vmax.f32 %v1787_v35, %v1788_v32 }
 0x30d   : > { %v1627_v38 = vmax.f32 %v1597_v4, 0.0 }
 0x30e   : > { %4068 = vmatmul.msk.bf16.vlgmr.msra.gmra.mxu3 %vm621_vm0, %v5329_v58  ;;  %v2187_v3 = vpop.f32.mrf.mxu3  ;;  %v1671_v37 = vrot.slane %v1670_v44, 1  ;;  %v1790_v34 = vrot.slane %v1789_v48, 1 }
 0x30f   : > { %2924 = vmatpush.bf16.msra.mxu3 %v5049_v27  ;;  %v1673_v0 = vrot.slane %v1627_v38, 4  ;;  %v2732_v12 = vmul.f32 %v2716_v1, %v2187_v3  ;;  %v2748_v18 = vpack.c.bf16 %v2187_v3, %v2187_v3 }
 0x310   : > { %v1672_v45 = vadd.f32 %v1671_v37, %v1670_v44  ;;  %v1791_v24 = vmax.f32 %v1789_v48, %v1790_v34 }
 0x311   : > { %v1674_v50 = vadd.f32 %v1673_v0, %v1627_v38  ;;  %v1793_v25 = vmax.f32 %v1627_v38, %v1673_v0  ;;  %v1598_v52 = vpop.f32.mrf.mxu2  ;;  %v2764_v55 = vpack.c.bf16 %v2732_v12, %v2732_v12  ;;  %v2844_v14 = vunpack.c.l.b16 %v2748_v18  ;;  %v4312_v18 = vld [vmem:[%s5852_s4 + $0x10] sm:$0xff] }
 0x312   : > { %v1745_v36 = vmul.f32 %v5360_v57, %v1672_v45  ;;  %v3354_v10 = vsel %vm3319_vm7, %v1791_v24, %v3353_v56  ;;  %v1599_v17 = vadd.f32 %v1598_v52, %v1550_v5  ;;  %v4278_v45 = vld [vmem:[%s4605_s11] sm:$0xff] }
 0x313   : > { %2925 = vmatpush.bf16.msra.mxu3 %v5063_v43  ;;  %v1675_v58 = vrot.slane %v1674_v50, 2  ;;  %v1794_v47 = vrot.slane %v1793_v25, 2  ;;  %v5416_v4 = vpop.f32.mrf.mxu0  ;;  %v2892_v20 = vunpack.c.l.b16 %v2764_v55 }
 0x314   : > { %v3320_v27 = vsel %vm3319_vm7, %v1745_v36, %v3318_v28  ;;  %v1628_v6 = vmax.f32 %v1599_v17, 0.0 }
 0x315   : > { %v1676_v29 = vadd.f32 %v1675_v58, %v1674_v50  ;;  %v1795_v40 = vmax.f32 %v1793_v25, %v1794_v47  ;;  %v4317_v25 = vld [vmem:[%s5852_s4 + $0x38] sm:$0xff]  ;;  %v4523_v58 = vld [vmem:[%s4605_s11 + $0x8] sm:$0xf] }
 0x316   : > { %v2189_v23 = vpop.f32.mrf.mxu3  ;;  %v1679_v30 = vrot.slane %v1628_v6, 4  ;;  %3694 = vmatpush.bf16.msrb.mxu2 %v4317_v25  ;;  %v2718_v47 = vunpack.c.l.bf16 %v4523_v58 }
 0x317   : > { %2926 = vmatpush.bf16.msra.mxu3 %v5082_v62  ;;  %v1677_v31 = vrot.slane %v1676_v29, 1  ;;  %v1796_v51 = vrot.slane %v1795_v40, 1 }
 0x318   : > { %v1680_v43 = vadd.f32 %v1679_v30, %v1628_v6  ;;  %v1799_v21 = vmax.f32 %v1628_v6, %v1679_v30  ;;  %v4524_v6 = vld [vmem:[%s4605_s11 + $0xc] sm:$0xf]  ;;  %v4314_v30 = vld [vmem:[%s5852_s4 + $0x20] sm:$0xff] }
 0x319   : > { %v1678_v42 = vadd.f32 %v1677_v31, %v1676_v29  ;;  %v1797_v19 = vmax.f32 %v1795_v40, %v1796_v51  ;;  %v2719_v29 = vunpack.c.l.bf16 %v4524_v6  ;;  %v4323_v6 = vld [vmem:[%s5852_s4 + $0x68] sm:$0xff] }
 0x31a   : > { %v1681_v60 = vrot.slane %v1680_v43, 2  ;;  %v1800_v13 = vrot.slane %v1799_v21, 2 }
 0x31b   : > { %2927 = vmatpush.bf16.msra.mxu3 %v5102_v2  ;;  %v1746_v63 = vmul.f32 %v5360_v57, %v1678_v42  ;;  %v3355_v62 = vsel %vm3321_vm8, %v1797_v19, %v3354_v10  ;;  %v1508_v24 = vpop.f32.mrf.mxu0  ;;  %v4316_v10 = vld [vmem:[%s5852_s4 + $0x30] sm:$0xff]  ;;  %v4313_v42 = vld [vmem:[%s5852_s4 + $0x18] sm:$0xff] }
 0x31c   : > { %v1682_v35 = vadd.f32 %v1681_v60, %v1680_v43  ;;  %v1801_v15 = vmax.f32 %v1799_v21, %v1800_v13  ;;  %3695 = vmatpush.bf16.msrb.mxu2 %v4316_v10 }
 0x31d   : > { %v3322_v49 = vsel %vm3321_vm8, %v1746_v63, %v3320_v27  ;;  %v4315_v27 = vld [vmem:[%s5852_s4 + $0x28] sm:$0xff] }
 0x31e   : > { %4072 = vmatmul.msk.bf16.vlgmr.msrb.gmra.mxu3 %vm621_vm0, %v5353_v61  ;;  %v2222_v53 = vpop.f32.mrf.mxu3  ;;  %v1683_v56 = vrot.slane %v1682_v35, 1  ;;  %v1802_v26 = vrot.slane %v1801_v15, 1 }
 0x31f   : > { %v2733_v32 = vmul.f32 %v2717_v59, %v2222_v53  ;;  %v2749_v2 = vpack.c.bf16 %v2222_v53, %v2222_v53  ;;  %2928 = vmatpush.bf16.msra.mxu3 %v5124_v16 }
 0x320   : > { %v1684_v33 = vadd.f32 %v1683_v56, %v1682_v35  ;;  %v1803_v28 = vmax.f32 %v1801_v15, %v1802_v26  ;;  %3696 = vmatpush.bf16.msrb.mxu2 %v4315_v27  ;;  %v1506_v35 = vadd.f32 %v5310_v9, %v5416_v4  ;;  %v4280_v56 = vld [vmem:[%s4605_s11 + $0x10] sm:$0xff]  ;;  %v1509_v26 = vadd.f32 %v5310_v9, %v1508_v24 }
 0x321   : > { %v2765_v44 = vpack.c.bf16 %v2733_v32, %v2733_v32  ;;  %v2845_v48 = vunpack.c.l.b16 %v2749_v2  ;;  %v4311_v2 = vld [vmem:[%s5852_s4 + $0x8] sm:$0xff] }
 0x322   : > { %v1747_v61 = vmul.f32 %v5360_v57, %v1684_v33  ;;  %v5421_v3 = vsel %vm3323_vm9, %v1803_v28, %v3355_v62 }
 0x323   : > { %v2860_v41 = vpack.c.b16 %v2845_v48, %v2844_v14  ;;  %v2893_v38 = vunpack.c.l.b16 %v2765_v44  ;;  %2929 = vmatpush.bf16.msra.mxu3 %v5145_v7  ;;  %v1510_v52 = vpop.f32.mrf.mxu0 }
 0x324   : > { %v5424_v37 = vsel %vm3323_vm9, %v1747_v61, %v3322_v49  ;;  %3697 = vmatpush.bf16.msrb.mxu2 %v4314_v30  ;;  %v1504_v49 = vadd.f32 %v5310_v9, %v5404_v22  ;;  %v1511_v32 = vadd.f32 %v5310_v9, %v1510_v52  ;;  %v4310_v61 = vld [vmem:[%s5852_s4] sm:$0xff] }
 0x325   : > { %v2908_v16 = vpack.c.b16 %v2893_v38, %v2892_v20  ;;  %2981 = vmatmul.bf16.vlgmr.msrb.gmra.mxu0 %v2860_v41  ;;  %v4325_v38 = vld [vmem:[%s5852_s4 + $0x78] sm:$0xff] }
 0x326   : > { %v2224_v34 = vpop.f32.mrf.mxu3 }
 0x327   : > { %2930 = vmatpush.bf16.msra.mxu3 %v5170_v46  ;;  %3030 = vmatmul.bf16.vlgmr.msrb.gmra.mxu1 %v2908_v16  ;;  %v1552_v0 = vpop.f32.mrf.mxu1 }
 0x328   : > { %3698 = vmatpush.bf16.msrb.mxu2 %v4313_v42  ;;  %v1553_v33 = vadd.f32 %v1552_v0, %v1504_v49 }
 0x32b   : > { %2931 = vmatpush.bf16.msra.mxu3 %v5191_v11  ;;  %v4279_v11 = vld [vmem:[%s4605_s11 + $0x8] sm:$0xff]  ;;  %v1513_v40 = vpop.f32.mrf.mxu0 }
 0x32c   : > { %3699 = vmatpush.bf16.msrb.mxu2 %v4312_v18  ;;  %v1514_v4 = vadd.f32 %v5310_v9, %v1513_v40 }
 0x32e   : > { %2932 = vmatmul.bf16.vlgmr.msra.gmra.mxu3 %v4278_v45 }
 0x32f   : > { %v1554_v7 = vpop.f32.mrf.mxu1  ;;  %v5429_v5 = vpop.f32.mrf.mxu2 }
 0x330   : > { %v1555_v14 = vadd.f32 %v1554_v7, %v1506_v35  ;;  %3700 = vmatpush.bf16.msrb.mxu2 %v4311_v2  ;;  %v1602_v41 = vadd.f32 %v5429_v5, %v1553_v33  ;;  %v4324_v5 = vld [vmem:[%s5852_s4 + $0x70] sm:$0xff]  ;;  %v4321_v35 = vld [vmem:[%s5852_s4 + $0x58] sm:$0xff] }
 0x331   : > { %v2257_v50 = vpop.f32.mrf.mxu3 }
 0x332   : > { %v2734_v8 = vmul.f32 %v2718_v47, %v2257_v50  ;;  %v2750_v39 = vpack.c.bf16 %v2257_v50, %v2257_v50  ;;  %v5475_v52 = vmax.f32 %v1602_v41, 0.0 }
 0x333   : > { %v1515_v53 = vpop.f32.mrf.mxu0 }
 0x334   : > { %v2766_v21 = vpack.c.bf16 %v2734_v8, %v2734_v8  ;;  %v2846_v19 = vunpack.c.l.b16 %v2750_v39  ;;  %3701 = vmatpush.bf16.msrb.mxu2 %v4310_v61  ;;  %v1516_v7 = vadd.f32 %v5310_v9, %v1515_v53  ;;  %v1685_v27 = vrot.slane %v5475_v52, 4  ;;  %v4525_v8 = vld [vmem:[%s4605_s11 + $0x10] sm:$0xf] }
 0x336   : > { %v2894_v59 = vunpack.c.l.b16 %v2766_v21 }
 0x337   : > { %v1557_v46 = vpop.f32.mrf.mxu1  ;;  %v1603_v36 = vpop.f32.mrf.mxu2 }
 0x338   : > { %v1558_v28 = vadd.f32 %v1557_v46, %v1509_v26  ;;  %v1604_v44 = vadd.f32 %v1603_v36, %v1555_v14  ;;  %3708 = vmatpush.bf16.msra.mxu2 %v4325_v38 }
 0x339   : > { %v2259_v17 = vpop.f32.mrf.mxu3 }
 0x33a   : > { %v5472_v24 = vmax.f32 %v1604_v44, 0.0 }
 0x33b   : > { %v1518_v25 = vpop.f32.mrf.mxu0 }
 0x33c   : > { %3709 = vmatpush.bf16.msra.mxu2 %v4324_v5  ;;  %v1691_v10 = vrot.slane %v5472_v24, 4  ;;  %v1519_v39 = vadd.f32 %v5310_v9, %v1518_v25 }
 0x33e   : > { %2937 = vmatmul.bf16.gmra.mxu3 %v4279_v11 }
 0x33f   : > { %v1559_v1 = vpop.f32.mrf.mxu1  ;;  %v1606_v23 = vpop.f32.mrf.mxu2 }
 0x340   : > { %v1560_v48 = vadd.f32 %v1559_v1, %v1511_v32  ;;  %v1607_v16 = vadd.f32 %v1606_v23, %v1558_v28  ;;  %v2720_v1 = vunpack.c.l.bf16 %v4525_v8  ;;  %3710 = vmatpush.bf16.msra.mxu2 %v4323_v6 }
 0x341   : > { %v2292_v31 = vpop.f32.mrf.mxu3 }
 0x342   : > { %v2735_v51 = vmul.f32 %v2719_v29, %v2292_v31  ;;  %v2751_v43 = vpack.c.bf16 %v2292_v31, %v2292_v31  ;;  %v5480_v46 = vmax.f32 %v1607_v16, 0.0  ;;  %v4281_v31 = vld [vmem:[%s4605_s11 + $0x18] sm:$0xff] }
 0x344   : > { %v2767_v12 = vpack.c.bf16 %v2735_v51, %v2735_v51  ;;  %v2847_v60 = vunpack.c.l.b16 %v2751_v43  ;;  %v1697_v29 = vrot.slane %v5480_v46, 4  ;;  %v4322_v51 = vld [vmem:[%s5852_s4 + $0x60] sm:$0xff]  ;;  %v1692_v43 = vadd.f32 %v1691_v10, %v5472_v24 }
 0x345   : > { %3711 = vmatpush.bf16.msra.mxu2 %v4322_v51 }
 0x346   : > { %v2895_v13 = vunpack.c.l.b16 %v2767_v12  ;;  %v2861_v54 = vpack.c.b16 %v2847_v60, %v2846_v19  ;;  %v1686_v19 = vadd.f32 %v1685_v27, %v5475_v52  ;;  %v1698_v12 = vadd.f32 %v1697_v29, %v5480_v46 }
 0x347   : > { %v1562_v63 = vpop.f32.mrf.mxu1  ;;  %v1608_v62 = vpop.f32.mrf.mxu2 }
 0x348   : > { %2986 = vmatmul.bf16.gmra.mxu0 %v2861_v54  ;;  %v2909_v55 = vpack.c.b16 %v2895_v13, %v2894_v59  ;;  %v1563_v34 = vadd.f32 %v1562_v63, %v1514_v4  ;;  %v1609_v45 = vadd.f32 %v1608_v62, %v1560_v48  ;;  %v1520_v59 = vpop.f32.mrf.mxu0  ;;  %v4526_v62 = vld [vmem:[%s4605_s11 + $0x14] sm:$0xf]  ;;  %v1687_v2 = vrot.slane %v1686_v19, 2 }
 0x349   : > { %v2294_v15 = vpop.f32.mrf.mxu3  ;;  %v2721_v18 = vunpack.c.l.bf16 %v4526_v62  ;;  %v1699_v14 = vrot.slane %v1698_v12, 2  ;;  %v1521_v44 = vadd.f32 %v5310_v9, %v1520_v59  ;;  %3712 = vmatpush.bf16.msra.mxu2 %v4321_v35  ;;  %v4282_v35 = vld [vmem:[%s4605_s11 + $0x20] sm:$0xff] }
 0x34a   : > { %3035 = vmatmul.bf16.gmra.mxu1 %v2909_v55  ;;  %v5482_v36 = vmax.f32 %v1609_v45, 0.0  ;;  %v1693_v15 = vrot.slane %v1692_v43, 2 }
 0x34b   : > { %v1700_v25 = vadd.f32 %v1699_v14, %v1698_v12  ;;  %v4319_v12 = vld [vmem:[%s5852_s4 + $0x48] sm:$0xff]  ;;  %v1817_v14 = vmax.f32 %v5480_v46, %v1697_v29 }
 0x34c   : > { %v1703_v40 = vrot.slane %v5482_v36, 4  ;;  %v1694_v61 = vadd.f32 %v1693_v15, %v1692_v43  ;;  %v1811_v15 = vmax.f32 %v5472_v24, %v1691_v10 }
 0x34d   : > { %v1818_v29 = vrot.slane %v1817_v14, 2 }
 0x34e   : > { %2942 = vmatmul.bf16.gmra.mxu3 %v4280_v56  ;;  %v1704_v60 = vadd.f32 %v1703_v40, %v5482_v36 }
 0x34f   : > { %v1564_v22 = vpop.f32.mrf.mxu1  ;;  %v1611_v20 = vpop.f32.mrf.mxu2 }
 0x350   : > { %v1612_v50 = vadd.f32 %v1611_v20, %v1563_v34  ;;  %v1565_v17 = vadd.f32 %v1564_v22, %v1516_v7  ;;  %v1705_v4 = vrot.slane %v1704_v60, 2  ;;  %v4320_v7 = vld [vmem:[%s5852_s4 + $0x50] sm:$0xff] }
 0x351   : > { %v5470_v0 = vpop.f32.mrf.mxu3  ;;  %3713 = vmatpush.bf16.msra.mxu2 %v4320_v7 }
 0x352   : > { %v5485_v11 = vmax.f32 %v1612_v50, 0.0  ;;  %v2736_v13 = vmul.f32 %v2720_v1, %v5470_v0  ;;  %v2752_v53 = vpack.c.bf16 %v5470_v0, %v5470_v0  ;;  %v1688_v50 = vadd.f32 %v1687_v2, %v1686_v19 }
 0x353   : > { %v1706_v9 = vadd.f32 %v1705_v4, %v1704_v60  ;;  %v1695_v1 = vrot.slane %v1694_v61, 1  ;;  %v1701_v60 = vrot.slane %v1700_v25, 1 }
 0x354   : > { %v1709_v21 = vrot.slane %v5485_v11, 4  ;;  %v2768_v33 = vpack.c.bf16 %v2736_v13, %v2736_v13  ;;  %v2848_v38 = vunpack.c.l.b16 %v2752_v53  ;;  %v1689_v59 = vrot.slane %v1688_v50, 1  ;;  %v4318_v53 = vld [vmem:[%s5852_s4 + $0x40] sm:$0xff] }
 0x355   : > { %3714 = vmatpush.bf16.msra.mxu2 %v4319_v12  ;;  %v1702_v2 = vadd.f32 %v1701_v60, %v1700_v25 }
 0x356   : > { %v1710_v55 = vadd.f32 %v1709_v21, %v5485_v11  ;;  %v2896_v5 = vunpack.c.l.b16 %v2768_v33  ;;  %v1690_v24 = vadd.f32 %v1689_v59, %v1688_v50 }
 0x357   : > { %v1567_v58 = vpop.f32.mrf.mxu1  ;;  %v1613_v47 = vpop.f32.mrf.mxu2  ;;  %v1750_v46 = vmul.f32 %v5360_v57, %v1702_v2  ;;  %v4283_v2 = vld [vmem:[%s4605_s11 + $0x28] sm:$0xff] }
 0x358   : > { %v1614_v23 = vadd.f32 %v1613_v47, %v1565_v17  ;;  %v1568_v63 = vadd.f32 %v1567_v58, %v1519_v39  ;;  %v1711_v41 = vrot.slane %v1710_v55, 2  ;;  %v5535_v17 = vpop.f32.mrf.mxu0 }
 0x359   : > { %v2329_v30 = vpop.f32.mrf.mxu3  ;;  %3715 = vmatpush.bf16.msra.mxu2 %v4318_v53 }
 0x35a   : > { %v5503_v42 = vmax.f32 %v1614_v23, 0.0  ;;  %v1712_v23 = vadd.f32 %v1711_v41, %v1710_v55 }
 0x35c   : > { %v1715_v54 = vrot.slane %v5503_v42, 4  ;;  %v1713_v55 = vrot.slane %v1712_v23, 1 }
 0x35e   : > { %2947 = vmatmul.bf16.gmra.mxu3 %v4281_v31  ;;  %v1716_v26 = vadd.f32 %v1715_v54, %v5503_v42  ;;  %v1835_v7 = vmax.f32 %v5503_v42, %v1715_v54 }
 0x35f   : > { %v1569_v49 = vpop.f32.mrf.mxu1  ;;  %v1616_v56 = vpop.f32.mrf.mxu2 }
 0x360   : > { %v1617_v32 = vadd.f32 %v1616_v56, %v1568_v63  ;;  %v1717_v16 = vrot.slane %v1716_v26, 2  ;;  %v1570_v58 = vadd.f32 %v1569_v49, %v1521_v44  ;;  %v1707_v63 = vrot.slane %v1706_v9, 1  ;;  %v2504_v33 = vpop.f32.mrf.mxu0 }
 0x361   : > { %v2362_v28 = vpop.f32.mrf.mxu3  ;;  %v1805_v49 = vmax.f32 %v5475_v52, %v1685_v27  ;;  %v1696_v56 = vadd.f32 %v1695_v1, %v1694_v61  ;;  %v1812_v44 = vrot.slane %v1811_v15, 2  ;;  %v1714_v52 = vadd.f32 %v1713_v55, %v1712_v23 }
 0x362   : > { %v5529_v48 = vmax.f32 %v1617_v32, 0.0  ;;  %v2737_v22 = vmul.f32 %v2721_v18, %v2362_v28  ;;  %v2753_v20 = vpack.c.bf16 %v2362_v28, %v2362_v28  ;;  %v1718_v31 = vadd.f32 %v1717_v16, %v1716_v26 }
 0x363   : > { %v1708_v10 = vadd.f32 %v1707_v63, %v1706_v9  ;;  %v1749_v61 = vmul.f32 %v5360_v57, %v1696_v56  ;;  %v1829_v16 = vmax.f32 %v5485_v11, %v1709_v21  ;;  %v1813_v25 = vmax.f32 %v1811_v15, %v1812_v44  ;;  %v4527_v56 = vld [vmem:[%s4605_s11 + $0x18] sm:$0xf] }
 0x364   : > { %v1721_v34 = vrot.slane %v5529_v48, 4  ;;  %v2769_v45 = vpack.c.bf16 %v2737_v22, %v2737_v22  ;;  %v2849_v0 = vunpack.c.l.b16 %v2753_v20  ;;  %v1719_v26 = vrot.slane %v1718_v31, 1 }
 0x365   : > { %v1823_v22 = vmax.f32 %v5482_v36, %v1703_v40  ;;  %v1806_v20 = vrot.slane %v1805_v49, 2  ;;  %v1748_v36 = vmul.f32 %v5360_v57, %v1690_v24  ;;  %v1751_v40 = vmul.f32 %v5360_v57, %v1708_v10 }
 0x366   : > { %v1722_v47 = vadd.f32 %v1721_v34, %v5529_v48  ;;  %v2897_v6 = vunpack.c.l.b16 %v2769_v45  ;;  %v2862_v8 = vpack.c.b16 %v2849_v0, %v2848_v38  ;;  %v1720_v41 = vadd.f32 %v1719_v26, %v1718_v31 }
 0x367   : > { %v1618_v30 = vpop.f32.mrf.mxu2  ;;  %v5540_v39 = vpop.f32.mrf.mxu1  ;;  %v1824_v9 = vrot.slane %v1823_v22, 2  ;;  %v1841_v11 = vmax.f32 %v5529_v48, %v1721_v34  ;;  %v3325_v21 = vsel %vm3311_vm3, %v1749_v61, %v1748_v36  ;;  %v1830_v23 = vrot.slane %v1829_v16, 2  ;;  %v4528_v61 = vld [vmem:[%s4605_s11 + $0x1c] sm:$0xf] }
 0x368   : > { %v1723_v51 = vrot.slane %v1722_v47, 2  ;;  %2991 = vmatmul.bf16.gmra.mxu0 %v2862_v8  ;;  %v1619_v43 = vadd.f32 %v1618_v30, %v1570_v58  ;;  %v2910_v19 = vpack.c.b16 %v2897_v6, %v2896_v5  ;;  %v1752_v5 = vmul.f32 %v5360_v57, %v1714_v52 }
 0x369   : > { %v2364_v13 = vpop.f32.mrf.mxu3  ;;  %v1753_v58 = vmul.f32 %v5360_v57, %v1720_v41  ;;  %v1819_v8 = vmax.f32 %v1817_v14, %v1818_v29  ;;  %v3326_v1 = vsel %vm3313_vm4, %v1750_v46, %v3325_v21  ;;  %v1807_v30 = vmax.f32 %v1805_v49, %v1806_v20 }
 0x36a   : > { %v1724_v62 = vadd.f32 %v1723_v51, %v1722_v47  ;;  %v1636_v18 = vmax.f32 %v1619_v43, 0.0  ;;  %3040 = vmatmul.bf16.gmra.mxu1 %v2910_v19  ;;  %v5581_v54 = vpop.f32.mrf.mxu0  ;;  %v3327_v31 = vsel %vm3315_vm5, %v1751_v40, %v3326_v1  ;;  %v1836_v51 = vrot.slane %v1835_v7, 2 }
 0x36b   : > { %v1825_v48 = vmax.f32 %v1823_v22, %v1824_v9  ;;  %v3328_v34 = vsel %vm3317_vm6, %v1752_v5, %v3327_v31  ;;  %v1842_v19 = vrot.slane %v1841_v11, 2  ;;  %v1814_v60 = vrot.slane %v1813_v25, 1 }
 0x36c   : > { %v1727_v32 = vrot.slane %v1636_v18, 4  ;;  %v1725_v4 = vrot.slane %v1724_v62, 1  ;;  %v3329_v13 = vsel %vm3319_vm7, %v1753_v58, %v3328_v34  ;;  %v1808_v53 = vrot.slane %v1807_v30, 1 }
 0x36d   : > { %v1837_v49 = vmax.f32 %v1835_v7, %v1836_v51  ;;  %v2722_v26 = vunpack.c.l.bf16 %v4527_v56  ;;  %v1826_v14 = vrot.slane %v1825_v48, 1  ;;  %v1815_v24 = vmax.f32 %v1813_v25, %v1814_v60 }
 0x36e   : > { %v1728_v28 = vadd.f32 %v1727_v32, %v1636_v18  ;;  %2952 = vmatmul.bf16.gmra.mxu3 %v4282_v35  ;;  %v1726_v45 = vadd.f32 %v1725_v4, %v1724_v62  ;;  %v1847_v6 = vmax.f32 %v1636_v18, %v1727_v32  ;;  %v1820_v62 = vrot.slane %v1819_v8, 1 }
 0x36f   : > { %v2539_v27 = vpop.f32.mrf.mxu1  ;;  %v1831_v18 = vmax.f32 %v1829_v16, %v1830_v23  ;;  %v5590_v55 = vpop.f32.mrf.mxu2  ;;  %v1843_v4 = vmax.f32 %v1841_v11, %v1842_v19  ;;  %v1809_v52 = vmax.f32 %v1807_v30, %v1808_v53  ;;  %v2723_v41 = vunpack.c.l.bf16 %v4528_v61 }
 0x370   : > { %v1729_v38 = vrot.slane %v1728_v28, 2  ;;  %v1754_v42 = vmul.f32 %v5360_v57, %v1726_v45  ;;  %v1848_v63 = vrot.slane %v1847_v6, 2  ;;  %v1838_v27 = vrot.slane %v1837_v49, 1 }
 0x371   : > { %v5566_v0 = vpop.f32.mrf.mxu3  ;;  %v1832_v44 = vrot.slane %v1831_v18, 1  ;;  %v1844_v46 = vrot.slane %v1843_v4, 1  ;;  %v3357_v16 = vsel %vm3311_vm3, %v1815_v24, %v1809_v52  ;;  %v2758_v61 = vpack.c.bf16 %v5540_v39, %v5540_v39 }
 0x372   : > { %v1730_v50 = vadd.f32 %v1729_v38, %v1728_v28  ;;  %v3330_v15 = vsel %vm3321_vm8, %v1754_v42, %v3329_v13  ;;  %v1849_v10 = vmax.f32 %v1847_v6, %v1848_v63  ;;  %v1821_v28 = vmax.f32 %v1819_v8, %v1820_v62  ;;  %v2644_v22 = vpop.f32.mrf.mxu0  ;;  %v4284_v13 = vld [vmem:[%s4605_s11 + $0x30] sm:$0xff] }
 0x373   : > { %v2738_v20 = vmul.f32 %v2722_v26, %v5566_v0  ;;  %v1827_v38 = vmax.f32 %v1825_v48, %v1826_v14  ;;  %v1833_v40 = vmax.f32 %v1831_v18, %v1832_v44  ;;  %v1839_v25 = vmax.f32 %v1837_v49, %v1838_v27  ;;  %v4530_v18 = vld [vmem:[%s4605_s11 + $0x20] sm:$0xf]  ;;  %v4285_v27 = vld [vmem:[%s4605_s11 + $0x38] sm:$0xff] }
 0x374   : > { %v1731_v47 = vrot.slane %v1730_v50, 1  ;;  %v1850_v45 = vrot.slane %v1849_v10, 1  ;;  %v3358_v36 = vsel %vm3313_vm4, %v1821_v28, %v3357_v16  ;;  %v1845_v58 = vmax.f32 %v1843_v4, %v1844_v46 }
 0x375   : > { %v2770_v9 = vpack.c.bf16 %v2738_v20, %v2738_v20  ;;  %v3359_v21 = vsel %vm3315_vm5, %v1827_v38, %v3358_v36  ;;  %v2757_v62 = vpack.c.bf16 %v5535_v17, %v5535_v17 }
 0x376   : > { %v1732_v43 = vadd.f32 %v1731_v47, %v1730_v50  ;;  %v1851_v47 = vmax.f32 %v1849_v10, %v1850_v45  ;;  %v4532_v10 = vld [vmem:[%s4605_s11 + $0x2c] sm:$0xf] }
 0x377   : > { %v5585_v12 = vpop.f32.mrf.mxu1  ;;  %v2574_v50 = vpop.f32.mrf.mxu2  ;;  %v2898_v42 = vunpack.c.l.b16 %v2770_v9  ;;  %v2853_v49 = vunpack.c.l.b16 %v2757_v62  ;;  %v2727_v28 = vunpack.c.l.bf16 %v4532_v10  ;;  %v4534_v9 = vld [vmem:[%s4605_s11 + $0x30] sm:$0xf] }
 0x378   : > { %v1755_v59 = vmul.f32 %v5360_v57, %v1732_v43  ;;  %v4529_v43 = vld [vmem:[%s4605_s11 + $0x24] sm:$0xf]  ;;  %v4533_v50 = vld [vmem:[%s4605_s11 + $0x34] sm:$0xf] }
 0x379   : > { %v2399_v35 = vpop.f32.mrf.mxu3  ;;  %v2725_v48 = vunpack.c.l.bf16 %v4529_v43  ;;  %v2743_v52 = vmul.f32 %v2727_v28, %v5590_v55 }
 0x37a   : > { %v3331_v32 = vsel %vm3323_vm9, %v1755_v59, %v3330_v15  ;;  %v2724_v35 = vunpack.c.l.bf16 %v4530_v18 }
 0x37b   : > { %v3430_v33 = vpack.c.bf16 %v3331_v32, %v5424_v37  ;;  %v2754_v37 = vpack.c.bf16 %v5566_v0, %v5566_v0  ;;  %v3360_v0 = vsel %vm3317_vm6, %v1833_v40, %v3359_v21  ;;  %v2741_v63 = vmul.f32 %v2725_v48, %v5535_v17 }
 0x37c   : > { %v3361_v23 = vsel %vm3319_vm7, %v1839_v25, %v3360_v0  ;;  %v2775_v46 = vpack.c.bf16 %v2743_v52, %v2743_v52  ;;  %v2729_v25 = vunpack.c.l.bf16 %v4533_v50 }
 0x37d   : > { %3702 = vmatmul.bf16.vlgmr.msrb.gmra.mxu2 %v3430_v33  ;;  %v2850_v6 = vunpack.c.l.b16 %v2754_v37  ;;  %v3362_v51 = vsel %vm3321_vm8, %v1845_v58, %v3361_v23  ;;  %v2773_v15 = vpack.c.bf16 %v2741_v63, %v2741_v63  ;;  %v2761_v58 = vpack.c.bf16 %v5581_v54, %v5581_v54 }
 0x37e   : > { %2957 = vmatmul.bf16.gmra.mxu3 %v4283_v2  ;;  %v3363_v19 = vsel %vm3323_vm9, %v1851_v47, %v3362_v51  ;;  %v2903_v36 = vunpack.c.l.b16 %v2775_v46  ;;  %v2745_v21 = vmul.f32 %v2729_v25, %v5581_v54  ;;  %v5633_v51 = vld [vmem:[%s5851_s3] ss:$0 sm:$0xff] }
 0x37f   : > { %v2679_v29 = vpop.f32.mrf.mxu1  ;;  %v3431_v59 = vpack.c.bf16 %v3363_v19, %v5421_v3  ;;  %v2901_v32 = vunpack.c.l.b16 %v2773_v15  ;;  %v4531_v3 = vld [vmem:[%s4605_s11 + $0x28] sm:$0xf]  ;;  %v4536_v19 = vld [vmem:[%s4605_s11 + $0x38] sm:$0xf] }
 0x380   : > { %v2726_v4 = vunpack.c.l.bf16 %v4531_v3  ;;  %v2854_v29 = vunpack.c.l.b16 %v2758_v61 }
 0x381   : > { %v2432_v7 = vpop.f32.mrf.mxu3 }
 0x382   : > { %v2739_v5 = vmul.f32 %v2723_v41, %v2432_v7  ;;  %v2755_v11 = vpack.c.bf16 %v2432_v7, %v2432_v7  ;;  %v2742_v22 = vmul.f32 %v2726_v4, %v5540_v39  ;;  %v2759_v41 = vpack.c.bf16 %v5590_v55, %v5590_v55 }
 0x384   : > { %v2771_v8 = vpack.c.bf16 %v2739_v5, %v2739_v5  ;;  %v2851_v1 = vunpack.c.l.b16 %v2755_v11  ;;  %v2774_v38 = vpack.c.bf16 %v2742_v22, %v2742_v22  ;;  %v2855_v16 = vunpack.c.l.b16 %v2759_v41 }
 0x385   : > { %v2728_v5 = vunpack.c.l.bf16 %v4534_v9 }
 0x386   : > { %v2899_v30 = vunpack.c.l.b16 %v2771_v8  ;;  %v2863_v31 = vpack.c.b16 %v2851_v1, %v2850_v6  ;;  %v2902_v37 = vunpack.c.l.b16 %v2774_v38  ;;  %v2865_v7 = vpack.c.b16 %v2855_v16, %v2854_v29 }
 0x387   : > { %v2777_v6 = vpack.c.bf16 %v2745_v21, %v2745_v21  ;;  %v2857_v1 = vunpack.c.l.b16 %v2761_v58 }
 0x388   : > { %2996 = vmatmul.bf16.gmra.mxu0 %v2863_v31  ;;  %v2911_v34 = vpack.c.b16 %v2899_v30, %v2898_v42  ;;  %v2913_v11 = vpack.c.b16 %v2903_v36, %v2902_v37 }
 0x389   : > { %v2434_v60 = vpop.f32.mrf.mxu3  ;;  %v2905_v30 = vunpack.c.l.b16 %v2777_v6 }
 0x38a   : > { %3045 = vmatmul.bf16.gmra.mxu1 %v2911_v34  ;;  %v2730_v60 = vunpack.c.l.bf16 %v4536_v19 }
 0x38d   : > { %3716 = vmatmul.bf16.vlgmr.msra.gmra.mxu2 %v3431_v59 }
 0x38e   : > { %2962 = vmatmul.bf16.gmra.mxu3 %v4284_v13  ;;  %v5619_v20 = vpop.f32.mrf.mxu2  ;;  %v4537_v13 = vld [vmem:[%s4605_s11 + $0x3c] sm:$0xf] }
 0x38f   : > { %v2731_v59 = vunpack.c.l.bf16 %v4537_v13  ;;  %v2763_v3 = vpack.c.bf16 %v5619_v20, %v5619_v20 }
 0x391   : > { %v2467_v53 = vpop.f32.mrf.mxu3  ;;  %v2747_v15 = vmul.f32 %v2731_v59, %v5619_v20  ;;  %v2859_v52 = vunpack.c.l.b16 %v2763_v3 }
 0x392   : > { %v2740_v56 = vmul.f32 %v2724_v35, %v2467_v53  ;;  %v2756_v26 = vpack.c.bf16 %v2467_v53, %v2467_v53  ;;  %v2746_v35 = vmul.f32 %v2730_v60, %v5585_v12 }
 0x393   : > { %v2779_v10 = vpack.c.bf16 %v2747_v15, %v2747_v15 }
 0x394   : > { %v2772_v2 = vpack.c.bf16 %v2740_v56, %v2740_v56  ;;  %v2852_v14 = vunpack.c.l.b16 %v2756_v26  ;;  %v2762_v26 = vpack.c.bf16 %v5585_v12, %v5585_v12 }
 0x395   : > { %v2907_v41 = vunpack.c.l.b16 %v2779_v10 }
 0x396   : > { %v2900_v33 = vunpack.c.l.b16 %v2772_v2  ;;  %v2864_v24 = vpack.c.b16 %v2853_v49, %v2852_v14  ;;  %v2714_v40 = vpop.f32.mrf.mxu2 }
 0x398   : > { %3001 = vmatmul.bf16.gmra.mxu0 %v2864_v24  ;;  %v2912_v17 = vpack.c.b16 %v2901_v32, %v2900_v33  ;;  %v2778_v33 = vpack.c.bf16 %v2746_v35, %v2746_v35 }
 0x399   : > { %v2469_v44 = vpop.f32.mrf.mxu3 }
 0x39a   : > { %3050 = vmatmul.bf16.gmra.mxu1 %v2912_v17  ;;  %v2858_v44 = vunpack.c.l.b16 %v2762_v26  ;;  %v2906_v61 = vunpack.c.l.b16 %v2778_v33 }
 0x39c   : > { %v2867_v37 = vpack.c.b16 %v2859_v52, %v2858_v44  ;;  %v2915_v40 = vpack.c.b16 %v2907_v41, %v2906_v61 }
 0x39e   : > { %2967 = vmatmul.bf16.gmra.mxu3 %v4285_v27 }
 0x3a1   : > { %v2607_v45 = vpop.f32.mrf.mxu3 }
 0x3a2   : > { %v2744_v55 = vmul.f32 %v2728_v5, %v2607_v45  ;;  %v2760_v47 = vpack.c.bf16 %v2607_v45, %v2607_v45  ;;  %v2982_v23 = vpop.f32.mrf.mxu0 }
 0x3a4   : > { %v2776_v8 = vpack.c.bf16 %v2744_v55, %v2744_v55  ;;  %v2856_v0 = vunpack.c.l.b16 %v2760_v47  ;;  %v3031_v48 = vpop.f32.mrf.mxu1 }
 0x3a6   : > { %v2904_v31 = vunpack.c.l.b16 %v2776_v8  ;;  %v2866_v54 = vpack.c.b16 %v2857_v1, %v2856_v0 }
 0x3a8   : > { %3006 = vmatmul.bf16.gmra.mxu0 %v2865_v7  ;;  %v2914_v62 = vpack.c.b16 %v2905_v30, %v2904_v31 }
 0x3a9   : > { %v2609_v39 = vpop.f32.mrf.mxu3 }
 0x3aa   : > { %3055 = vmatmul.bf16.gmra.mxu1 %v2913_v11  ;;  %v2984_v32 = vpop.f32.mrf.mxu0 }
 0x3ac   : > { %v3033_v24 = vpop.f32.mrf.mxu1 }
 0x3b1   : > { %v2933_v42 = vpop.f32.mrf.mxu3 }
 0x3b2   : > { %v2934_v43 = vadd.f32 %v5633_v51, %v2933_v42 }
 0x3b4   : > { %v2983_v34 = vadd.f32 %v2982_v23, %v2934_v43 }
 0x3b6   : > { %v3032_v63 = vadd.f32 %v3031_v48, %v2983_v34 }
 0x3b8   : > { %v3071_v18 = vmax.f32 %v3032_v63, 0.0  ;;  %3011 = vmatmul.bf16.gmra.mxu0 %v2866_v54 }
 0x3b9   : > { %v2935_v53 = vpop.f32.mrf.mxu3 }
 0x3ba   : > { %v3087_v49 = vrot.slane %v3071_v18, 4  ;;  %v2936_v56 = vadd.f32 %v5633_v51, %v2935_v53  ;;  %3060 = vmatmul.bf16.gmra.mxu1 %v2914_v62 }
 0x3bc   : > { %v3088_v2 = vadd.f32 %v3087_v49, %v3071_v18  ;;  %v3200_v14 = vmax.f32 %v3071_v18, %v3087_v49  ;;  %v2985_v4 = vadd.f32 %v2984_v32, %v2936_v56 }
 0x3be   : > { %v3089_v28 = vrot.slane %v3088_v2, 2  ;;  %v3034_v17 = vadd.f32 %v3033_v24, %v2985_v4  ;;  %v3201_v22 = vrot.slane %v3200_v14, 2 }
 0x3c0   : > { %v3072_v27 = vmax.f32 %v3034_v17, 0.0  ;;  %v3090_v12 = vadd.f32 %v3089_v28, %v3088_v2  ;;  %v3202_v16 = vmax.f32 %v3200_v14, %v3201_v22 }
 0x3c1   : > { %v2938_v38 = vpop.f32.mrf.mxu3 }
 0x3c2   : > { %v3093_v46 = vrot.slane %v3072_v27, 4  ;;  %v2939_v29 = vadd.f32 %v5633_v51, %v2938_v38  ;;  %v3091_v7 = vrot.slane %v3090_v12, 1  ;;  %v3203_v5 = vrot.slane %v3202_v16, 1 }
 0x3c4   : > { %v3094_v45 = vadd.f32 %v3093_v46, %v3072_v27  ;;  %v3206_v20 = vmax.f32 %v3072_v27, %v3093_v46  ;;  %v3092_v47 = vadd.f32 %v3091_v7, %v3090_v12  ;;  %v3204_v23 = vmax.f32 %v3202_v16, %v3203_v5 }
 0x3c5   : > { %v2987_v36 = vpop.f32.mrf.mxu0 }
 0x3c6   : > { %v3095_v50 = vrot.slane %v3094_v45, 2  ;;  %v3207_v25 = vrot.slane %v3206_v20, 2  ;;  %v2988_v9 = vadd.f32 %v2987_v36, %v2939_v29  ;;  %v3183_v48 = vmul.f32 %v3092_v47, %v5360_v57 }
 0x3c7   : > { %v3036_v21 = vpop.f32.mrf.mxu1 }
 0x3c8   : > { %v3096_v11 = vadd.f32 %v3095_v50, %v3094_v45  ;;  %v3208_v39 = vmax.f32 %v3206_v20, %v3207_v25  ;;  %3016 = vmatmul.bf16.gmra.mxu0 %v2867_v37  ;;  %v3037_v55 = vadd.f32 %v3036_v21, %v2988_v9 }
 0x3c9   : > { %v2940_v58 = vpop.f32.mrf.mxu3 }
 0x3ca   : > { %v3097_v6 = vrot.slane %v3096_v11, 1  ;;  %v3209_v8 = vrot.slane %v3208_v39, 1  ;;  %3065 = vmatmul.bf16.gmra.mxu1 %v2915_v40  ;;  %v2941_v1 = vadd.f32 %v5633_v51, %v2940_v58  ;;  %v3073_v0 = vmax.f32 %v3037_v55, 0.0 }
 0x3cc   : > { %v3098_v42 = vadd.f32 %v3097_v6, %v3096_v11  ;;  %v3210_v30 = vmax.f32 %v3208_v39, %v3209_v8  ;;  %v3099_v31 = vrot.slane %v3073_v0, 4 }
 0x3cd   : > { %v2989_v43 = vpop.f32.mrf.mxu0 }
 0x3ce   : > { %v3184_v34 = vmul.f32 %v3098_v42, %v5360_v57  ;;  %v3414_v54 = vsel %vm3311_vm3, %v3210_v30, %v3204_v23  ;;  %v2990_v19 = vadd.f32 %v2989_v43, %v2941_v1  ;;  %v3100_v60 = vadd.f32 %v3099_v31, %v3073_v0 }
 0x3cf   : > { %v3212_v13 = vmax.f32 %v3073_v0, %v3099_v31  ;;  %v3038_v63 = vpop.f32.mrf.mxu1 }
 0x3d0   : > { %v3382_v59 = vsel %vm3311_vm3, %v3184_v34, %v3183_v48  ;;  %v3101_v62 = vrot.slane %v3100_v60, 2  ;;  %v3039_v35 = vadd.f32 %v3038_v63, %v2990_v19 }
 0x3d1   : > { %v3213_v18 = vrot.slane %v3212_v13, 2  ;;  %v2943_v61 = vpop.f32.mrf.mxu3 }
 0x3d2   : > { %v3102_v15 = vadd.f32 %v3101_v62, %v3100_v60  ;;  %v3074_v49 = vmax.f32 %v3039_v35, 0.0  ;;  %v2944_v29 = vadd.f32 %v5633_v51, %v2943_v61 }
 0x3d3   : > { %v3214_v53 = vmax.f32 %v3212_v13, %v3213_v18 }
 0x3d4   : > { %v3103_v56 = vrot.slane %v3102_v15, 1  ;;  %v3105_v32 = vrot.slane %v3074_v49, 4 }
 0x3d5   : > { %v3215_v26 = vrot.slane %v3214_v53, 1 }
 0x3d6   : > { %v3104_v2 = vadd.f32 %v3103_v56, %v3102_v15  ;;  %v3106_v3 = vadd.f32 %v3105_v32, %v3074_v49  ;;  %v3218_v4 = vmax.f32 %v3074_v49, %v3105_v32 }
 0x3d7   : > { %v3216_v14 = vmax.f32 %v3214_v53, %v3215_v26 }
 0x3d8   : > { %v3185_v33 = vmul.f32 %v3104_v2, %v5360_v57  ;;  %v3107_v10 = vrot.slane %v3106_v3, 2  ;;  %v3219_v28 = vrot.slane %v3218_v4, 2 }
 0x3d9   : > { %v3415_v24 = vsel %vm3313_vm4, %v3216_v14, %v3414_v54  ;;  %v2945_v36 = vpop.f32.mrf.mxu3 }
 0x3da   : > { %v3383_v17 = vsel %vm3313_vm4, %v3185_v33, %v3382_v59  ;;  %v3108_v44 = vadd.f32 %v3107_v10, %v3106_v3  ;;  %v3220_v22 = vmax.f32 %v3218_v4, %v3219_v28  ;;  %v2946_v50 = vadd.f32 %v5633_v51, %v2945_v36 }
 0x3dc   : > { %v3109_v52 = vrot.slane %v3108_v44, 1  ;;  %v3221_v27 = vrot.slane %v3220_v22, 1 }
 0x3de   : > { %v3110_v41 = vadd.f32 %v3109_v52, %v3108_v44  ;;  %v3222_v38 = vmax.f32 %v3220_v22, %v3221_v27 }
 0x3e0   : > { %v3186_v12 = vmul.f32 %v3110_v41, %v5360_v57  ;;  %v3416_v46 = vsel %vm3315_vm5, %v3222_v38, %v3415_v24 }
 0x3e1   : > { %v2948_v55 = vpop.f32.mrf.mxu3 }
 0x3e2   : > { %v3384_v16 = vsel %vm3315_vm5, %v3186_v12, %v3383_v17  ;;  %v2949_v2 = vadd.f32 %v5633_v51, %v2948_v55 }
 0x3e5   : > { %v2992_v45 = vpop.f32.mrf.mxu0 }
 0x3e6   : > { %v2993_v20 = vadd.f32 %v2992_v45, %v2944_v29 }
 0x3e7   : > { %v3041_v37 = vpop.f32.mrf.mxu1 }
 0x3e8   : > { %v3042_v40 = vadd.f32 %v3041_v37, %v2993_v20 }
 0x3e9   : > { %v2950_v59 = vpop.f32.mrf.mxu3 }
 0x3ea   : > { %v3075_v7 = vmax.f32 %v3042_v40, 0.0  ;;  %v2951_v28 = vadd.f32 %v5633_v51, %v2950_v59 }
 0x3ec   : > { %v3111_v25 = vrot.slane %v3075_v7, 4 }
 0x3ed   : > { %v2994_v9 = vpop.f32.mrf.mxu0 }
 0x3ee   : > { %v3112_v5 = vadd.f32 %v3111_v25, %v3075_v7  ;;  %v3224_v11 = vmax.f32 %v3075_v7, %v3111_v25  ;;  %v2995_v39 = vadd.f32 %v2994_v9, %v2946_v50 }
 0x3ef   : > { %v3043_v21 = vpop.f32.mrf.mxu1 }
 0x3f0   : > { %v3113_v58 = vrot.slane %v3112_v5, 2  ;;  %v3225_v47 = vrot.slane %v3224_v11, 2  ;;  %v3044_v6 = vadd.f32 %v3043_v21, %v2995_v39 }
 0x3f1   : > { %v5666_v14 = vpop.f32.mrf.mxu3 }
 0x3f2   : > { %v3114_v8 = vadd.f32 %v3113_v58, %v3112_v5  ;;  %v3226_v1 = vmax.f32 %v3224_v11, %v3225_v47  ;;  %v3076_v0 = vmax.f32 %v3044_v6, 0.0  ;;  %v4333_v47 = vld [vmem:[%s5852_s4 + $0xb8] sm:$0xff] }
 0x3f3   : > { %3722 = vmatpush.bf16.msrb.mxu2 %v4333_v47 }
 0x3f4   : > { %v3115_v23 = vrot.slane %v3114_v8, 1  ;;  %v3227_v42 = vrot.slane %v3226_v1, 1  ;;  %v3117_v30 = vrot.slane %v3076_v0, 4 }
 0x3f6   : > { %v3116_v31 = vadd.f32 %v3115_v23, %v3114_v8  ;;  %v3228_v43 = vmax.f32 %v3226_v1, %v3227_v42  ;;  %v3118_v48 = vadd.f32 %v3117_v30, %v3076_v0  ;;  %v3230_v34 = vmax.f32 %v3076_v0, %v3117_v30  ;;  %v4332_v30 = vld [vmem:[%s5852_s4 + $0xb0] sm:$0xff] }
 0x3f7   : > { %3723 = vmatpush.bf16.msrb.mxu2 %v4332_v30 }
 0x3f8   : > { %v3187_v54 = vmul.f32 %v3116_v31, %v5360_v57  ;;  %v3417_v19 = vsel %vm3317_vm6, %v3228_v43, %v3416_v46  ;;  %v3119_v60 = vrot.slane %v3118_v48, 2  ;;  %v3231_v13 = vrot.slane %v3230_v34, 2 }
 0x3f9   : > { %v2955_v22 = vpop.f32.mrf.mxu3 }
 0x3fa   : > { %v3385_v63 = vsel %vm3317_vm6, %v3187_v54, %v3384_v16  ;;  %v3120_v62 = vadd.f32 %v3119_v60, %v3118_v48  ;;  %v3232_v18 = vmax.f32 %v3230_v34, %v3231_v13  ;;  %v4331_v60 = vld [vmem:[%s5852_s4 + $0xa8] sm:$0xff] }
 0x3fb   : > { %3724 = vmatpush.bf16.msrb.mxu2 %v4331_v60 }
 0x3fc   : > { %v3121_v35 = vrot.slane %v3120_v62, 1  ;;  %v3233_v15 = vrot.slane %v3232_v18, 1 }
 0x3fe   : > { %v3122_v53 = vadd.f32 %v3121_v35, %v3120_v62  ;;  %v3234_v49 = vmax.f32 %v3232_v18, %v3233_v15  ;;  %v4329_v18 = vld [vmem:[%s5852_s4 + $0x98] sm:$0xff] }
 0x400   : > { %v3188_v56 = vmul.f32 %v3122_v53, %v5360_v57  ;;  %v3418_v26 = vsel %vm3319_vm7, %v3234_v49, %v3417_v19  ;;  %v4328_v53 = vld [vmem:[%s5852_s4 + $0x90] sm:$0xff] }
 0x401   : > { %v2958_v11 = vpop.f32.mrf.mxu3 }
 0x402   : > { %v3386_v32 = vsel %vm3319_vm7, %v3188_v56, %v3385_v63  ;;  %v4330_v63 = vld [vmem:[%s5852_s4 + $0xa0] sm:$0xff]  ;;  %v2954_v56 = vadd.f32 %v5633_v51, %v5666_v14 }
 0x403   : > { %3725 = vmatpush.bf16.msrb.mxu2 %v4330_v63  ;;  %v4326_v14 = vld [vmem:[%s5852_s4 + $0x80] sm:$0xff] }
 0x405   : > { %v2997_v3 = vpop.f32.mrf.mxu0 }
 0x406   : > { %v2998_v4 = vadd.f32 %v2997_v3, %v2949_v2  ;;  %v4327_v2 = vld [vmem:[%s5852_s4 + $0x88] sm:$0xff] }
 0x407   : > { %v3046_v33 = vpop.f32.mrf.mxu1  ;;  %3726 = vmatpush.bf16.msrb.mxu2 %v4329_v18 }
 0x408   : > { %v3047_v24 = vadd.f32 %v3046_v33, %v2998_v4 }
 0x409   : > { %v2960_v19 = vpop.f32.mrf.mxu3 }
 0x40a   : > { %v3077_v10 = vmax.f32 %v3047_v24, 0.0  ;;  %v2961_v33 = vadd.f32 %v5633_v51, %v2960_v19 }
 0x40b   : > { %3727 = vmatpush.bf16.msrb.mxu2 %v4328_v53 }
 0x40c   : > { %v3123_v17 = vrot.slane %v3077_v10, 4 }
 0x40d   : > { %v2999_v44 = vpop.f32.mrf.mxu0 }
 0x40e   : > { %v3124_v52 = vadd.f32 %v3123_v17, %v3077_v10  ;;  %v3236_v27 = vmax.f32 %v3077_v10, %v3123_v17  ;;  %v3000_v61 = vadd.f32 %v2999_v44, %v2951_v28 }
 0x40f   : > { %v3048_v41 = vpop.f32.mrf.mxu1  ;;  %3728 = vmatpush.bf16.msrb.mxu2 %v4327_v2 }
 0x410   : > { %v3125_v38 = vrot.slane %v3124_v52, 2  ;;  %v3237_v12 = vrot.slane %v3236_v27, 2  ;;  %v3049_v46 = vadd.f32 %v3048_v41, %v3000_v61 }
 0x411   : > { %v2963_v35 = vpop.f32.mrf.mxu3 }
 0x412   : > { %v3126_v29 = vadd.f32 %v3125_v38, %v3124_v52  ;;  %v3238_v16 = vmax.f32 %v3236_v27, %v3237_v12  ;;  %v3078_v45 = vmax.f32 %v3049_v46, 0.0  ;;  %v2964_v4 = vadd.f32 %v5633_v51, %v2963_v35  ;;  %v4340_v46 = vld [vmem:[%s5852_s4 + $0xf0] sm:$0xff] }
 0x413   : > { %3729 = vmatpush.bf16.msrb.mxu2 %v4326_v14 }
 0x414   : > { %v3127_v20 = vrot.slane %v3126_v29, 1  ;;  %v3239_v37 = vrot.slane %v3238_v16, 1  ;;  %v3129_v36 = vrot.slane %v3078_v45, 4 }
 0x415   : > { %v3002_v40 = vpop.f32.mrf.mxu0 }
 0x416   : > { %v3128_v7 = vadd.f32 %v3127_v20, %v3126_v29  ;;  %v3240_v50 = vmax.f32 %v3238_v16, %v3239_v37  ;;  %v3130_v25 = vadd.f32 %v3129_v36, %v3078_v45  ;;  %v3242_v9 = vmax.f32 %v3078_v45, %v3129_v36 }
 0x417   : > { %v3051_v5 = vpop.f32.mrf.mxu1  ;;  %v3003_v24 = vadd.f32 %v3002_v40, %v2954_v56 }
 0x418   : > { %v3189_v39 = vmul.f32 %v3128_v7, %v5360_v57  ;;  %v3419_v21 = vsel %vm3321_vm8, %v3240_v50, %v3418_v26  ;;  %v3131_v55 = vrot.slane %v3130_v25, 2  ;;  %v3243_v58 = vrot.slane %v3242_v9, 2  ;;  %v4339_v50 = vld [vmem:[%s5852_s4 + $0xe8] sm:$0xff] }
 0x419   : > { %v2956_v26 = vadd.f32 %v5633_v51, %v2955_v22  ;;  %v2965_v28 = vpop.f32.mrf.mxu3  ;;  %v4341_v22 = vld [vmem:[%s5852_s4 + $0xf8] sm:$0xff]  ;;  %v3052_v41 = vadd.f32 %v3051_v5, %v3003_v24 }
 0x41a   : > { %v3132_v6 = vadd.f32 %v3131_v55, %v3130_v25  ;;  %v3244_v8 = vmax.f32 %v3242_v9, %v3243_v58  ;;  %v3387_v1 = vsel %vm3321_vm8, %v3189_v39, %v3386_v32  ;;  %v2959_v32 = vadd.f32 %v5633_v51, %v2958_v11  ;;  %3736 = vmatpush.bf16.msra.mxu2 %v4341_v22 }
 0x41b   : > { %v2966_v45 = vadd.f32 %v5633_v51, %v2965_v28  ;;  %v5718_v20 = vmax.f32 %v3052_v41, 0.0 }
 0x41c   : > { %v3133_v0 = vrot.slane %v3132_v6, 1  ;;  %v3245_v23 = vrot.slane %v3244_v8, 1 }
 0x41d   : > { %v3004_v42 = vpop.f32.mrf.mxu0  ;;  %v3135_v55 = vrot.slane %v5718_v20, 4 }
 0x41e   : > { %v3134_v31 = vadd.f32 %v3133_v0, %v3132_v6  ;;  %v3246_v43 = vmax.f32 %v3244_v8, %v3245_v23  ;;  %v3005_v3 = vadd.f32 %v3004_v42, %v2956_v26  ;;  %3737 = vmatpush.bf16.msra.mxu2 %v4340_v46 }
 0x41f   : > { %v3053_v48 = vpop.f32.mrf.mxu1  ;;  %v3136_v42 = vadd.f32 %v3135_v55, %v5718_v20 }
 0x420   : > { %v3190_v34 = vmul.f32 %v3134_v31, %v5360_v57  ;;  %v5680_v54 = vsel %vm3323_vm9, %v3246_v43, %v3419_v21  ;;  %v3054_v52 = vadd.f32 %v3053_v48, %v3005_v3  ;;  %v4338_v21 = vld [vmem:[%s5852_s4 + $0xe0] sm:$0xff]  ;;  %v4337_v43 = vld [vmem:[%s5852_s4 + $0xd8] sm:$0xff] }
 0x421   : > { %v2968_v5 = vpop.f32.mrf.mxu3  ;;  %v3137_v18 = vrot.slane %v3136_v42, 2 }
 0x422   : > { %v5686_v13 = vsel %vm3323_vm9, %v3190_v34, %v3387_v1  ;;  %v5715_v29 = vmax.f32 %v3054_v52, 0.0  ;;  %3738 = vmatpush.bf16.msra.mxu2 %v4339_v50  ;;  %v2969_v0 = vadd.f32 %v5633_v51, %v2968_v5  ;;  %v3248_v5 = vmax.f32 %v5718_v20, %v3135_v55 }
 0x424   : > { %v3141_v25 = vrot.slane %v5715_v29, 4 }
 0x425   : > { %v3007_v59 = vpop.f32.mrf.mxu0 }
 0x426   : > { %v3008_v10 = vadd.f32 %v3007_v59, %v2959_v32  ;;  %v3142_v8 = vadd.f32 %v3141_v25, %v5715_v29  ;;  %3739 = vmatpush.bf16.msra.mxu2 %v4338_v21 }
 0x427   : > { %v3056_v62 = vpop.f32.mrf.mxu1 }
 0x428   : > { %v3057_v38 = vadd.f32 %v3056_v62, %v3008_v10  ;;  %v3143_v34 = vrot.slane %v3142_v8, 2  ;;  %v4336_v62 = vld [vmem:[%s5852_s4 + $0xd0] sm:$0xff] }
 0x42a   : > { %v5720_v37 = vmax.f32 %v3057_v38, 0.0  ;;  %3740 = vmatpush.bf16.msra.mxu2 %v4337_v43  ;;  %v3144_v56 = vadd.f32 %v3143_v34, %v3142_v8  ;;  %v4348_v34 = vld [vmem:[%s5854_s6 + $0x30] sm:$0xff] }
 0x42c   : > { %v3147_v58 = vrot.slane %v5720_v37, 4 }
 0x42d   : > { %v3009_v15 = vpop.f32.mrf.mxu0 }
 0x42e   : > { %v3010_v44 = vadd.f32 %v3009_v15, %v2961_v33  ;;  %v3148_v30 = vadd.f32 %v3147_v58, %v5720_v37  ;;  %v2970_v15 = vpop.f32.mrf.mxu3  ;;  %3741 = vmatpush.bf16.msra.mxu2 %v4336_v62  ;;  %v3138_v33 = vadd.f32 %v3137_v18, %v3136_v42  ;;  %v4349_v42 = vld [vmem:[%s5854_s6 + $0x38] sm:$0xff]  ;;  %v3260_v20 = vmax.f32 %v5720_v37, %v3147_v58 }
 0x42f   : > { %v3058_v49 = vpop.f32.mrf.mxu1  ;;  %v2971_v3 = vadd.f32 %v5633_v51, %v2970_v15  ;;  %v4334_v51 = vld [vmem:[%s5852_s4 + $0xc0] sm:$0xff]  ;;  %3821 = vmatpush.bf16.msrb.mxu3 %v4349_v42  ;;  %v4344_v42 = vld [vmem:[%s5854_s6 + $0x10] sm:$0xff] }
 0x430   : > { %v3059_v12 = vadd.f32 %v3058_v49, %v3010_v44  ;;  %v3149_v35 = vrot.slane %v3148_v30, 2  ;;  %v3145_v44 = vrot.slane %v3144_v56, 1  ;;  %v3139_v38 = vrot.slane %v3138_v33, 1 }
 0x432   : > { %v5722_v40 = vmax.f32 %v3059_v12, 0.0  ;;  %v3150_v24 = vadd.f32 %v3149_v35, %v3148_v30  ;;  %v3140_v21 = vadd.f32 %v3139_v38, %v3138_v33  ;;  %v3254_v30 = vmax.f32 %v5715_v29, %v3141_v25 }
 0x433   : > { %3822 = vmatpush.bf16.msrb.mxu3 %v4348_v34 }
 0x434   : > { %v3153_v47 = vrot.slane %v5722_v40, 4  ;;  %v3151_v12 = vrot.slane %v3150_v24, 1  ;;  %v3255_v62 = vrot.slane %v3254_v30, 2 }
 0x435   : > { %v3012_v17 = vpop.f32.mrf.mxu0 }
 0x436   : > { %v3013_v27 = vadd.f32 %v3012_v17, %v2964_v4  ;;  %v3154_v48 = vadd.f32 %v3153_v47, %v5722_v40  ;;  %v4335_v4 = vld [vmem:[%s5852_s4 + $0xc8] sm:$0xff]  ;;  %v3152_v8 = vadd.f32 %v3151_v12, %v3150_v24 }
 0x437   : > { %v3061_v61 = vpop.f32.mrf.mxu1  ;;  %3742 = vmatpush.bf16.msra.mxu2 %v4335_v4  ;;  %v3256_v4 = vmax.f32 %v3254_v30, %v3255_v62  ;;  %v4343_v62 = vld [vmem:[%s5854_s6 + $0x8] sm:$0xff] }
 0x438   : > { %v3062_v16 = vadd.f32 %v3061_v61, %v3013_v27  ;;  %v3155_v49 = vrot.slane %v3154_v48, 2 }
 0x439   : > { %v3257_v38 = vrot.slane %v3256_v4, 1 }
 0x43a   : > { %v5728_v9 = vmax.f32 %v3062_v16, 0.0  ;;  %v3156_v17 = vadd.f32 %v3155_v49, %v3154_v48 }
 0x43b   : > { %3743 = vmatpush.bf16.msra.mxu2 %v4334_v51 }
 0x43c   : > { %v3159_v1 = vrot.slane %v5728_v9, 4  ;;  %v3157_v16 = vrot.slane %v3156_v17, 1 }
 0x43d   : > { %v3014_v36 = vpop.f32.mrf.mxu0 }
 0x43e   : > { %v3015_v7 = vadd.f32 %v3014_v36, %v2966_v45  ;;  %v3160_v19 = vadd.f32 %v3159_v1, %v5728_v9  ;;  %v3146_v36 = vadd.f32 %v3145_v44, %v3144_v56  ;;  %v3272_v37 = vmax.f32 %v5728_v9, %v3159_v1  ;;  %v4347_v9 = vld [vmem:[%s5854_s6 + $0x28] sm:$0xff]  ;;  %v4346_v44 = vld [vmem:[%s5854_s6 + $0x20] sm:$0xff] }
 0x43f   : > { %v3063_v11 = vpop.f32.mrf.mxu1  ;;  %3823 = vmatpush.bf16.msrb.mxu3 %v4347_v9 }
 0x440   : > { %v3064_v39 = vadd.f32 %v3063_v11, %v3015_v7  ;;  %v3161_v26 = vrot.slane %v3160_v19, 2  ;;  %v3192_v48 = vmul.f32 %v3146_v36, %v5360_v57 }
 0x442   : > { %v5736_v6 = vmax.f32 %v3064_v39, 0.0  ;;  %v3162_v22 = vadd.f32 %v3161_v26, %v3160_v19  ;;  %v3249_v19 = vrot.slane %v3248_v5, 2 }
 0x443   : > { %3824 = vmatpush.bf16.msrb.mxu3 %v4346_v44 }
 0x444   : > { %v3165_v23 = vrot.slane %v5736_v6, 4  ;;  %v3163_v7 = vrot.slane %v3162_v22, 1 }
 0x445   : > { %v3017_v31 = vpop.f32.mrf.mxu0 }
 0x446   : > { %v3018_v60 = vadd.f32 %v3017_v31, %v2969_v0  ;;  %v3166_v63 = vadd.f32 %v3165_v23, %v5736_v6  ;;  %v3158_v31 = vadd.f32 %v3157_v16, %v3156_v17  ;;  %v3164_v55 = vadd.f32 %v3163_v7, %v3162_v22  ;;  %v4345_v7 = vld [vmem:[%s5854_s6 + $0x18] sm:$0xff] }
 0x447   : > { %v3066_v59 = vpop.f32.mrf.mxu1  ;;  %v3278_v35 = vmax.f32 %v5736_v6, %v3165_v23  ;;  %v3273_v6 = vrot.slane %v3272_v37, 2  ;;  %3825 = vmatpush.bf16.msrb.mxu3 %v4345_v7 }
 0x448   : > { %v3067_v53 = vadd.f32 %v3066_v59, %v3018_v60  ;;  %v3167_v2 = vrot.slane %v3166_v63, 2  ;;  %v3266_v60 = vmax.f32 %v5722_v40, %v3153_v47  ;;  %v3191_v59 = vmul.f32 %v3140_v21, %v5360_v57 }
 0x449   : > { %v3194_v18 = vmul.f32 %v3158_v31, %v5360_v57  ;;  %v3261_v47 = vrot.slane %v3260_v20, 2  ;;  %v3279_v24 = vrot.slane %v3278_v35, 2 }
 0x44a   : > { %v3085_v32 = vmax.f32 %v3067_v53, 0.0  ;;  %v3168_v61 = vadd.f32 %v3167_v2, %v3166_v63  ;;  %v3193_v63 = vmul.f32 %v3152_v8, %v5360_v57  ;;  %v3389_v40 = vsel %vm3311_vm3, %v3192_v48, %v3191_v59 }
 0x44b   : > { %v3195_v53 = vmul.f32 %v3164_v55, %v5360_v57  ;;  %v3267_v1 = vrot.slane %v3266_v60, 2  ;;  %v3280_v12 = vmax.f32 %v3278_v35, %v3279_v24  ;;  %3826 = vmatpush.bf16.msrb.mxu3 %v4344_v42 }
 0x44c   : > { %v3171_v10 = vrot.slane %v3085_v32, 4  ;;  %v3169_v11 = vrot.slane %v3168_v61, 1 }
 0x44d   : > { %v3019_v28 = vpop.f32.mrf.mxu0  ;;  %v3268_v22 = vmax.f32 %v3266_v60, %v3267_v1  ;;  %v3281_v21 = vrot.slane %v3280_v12, 1 }
 0x44e   : > { %v3020_v14 = vadd.f32 %v3019_v28, %v2971_v3  ;;  %v3172_v52 = vadd.f32 %v3171_v10, %v3085_v32  ;;  %v3170_v29 = vadd.f32 %v3169_v11, %v3168_v61  ;;  %v3284_v49 = vmax.f32 %v3085_v32, %v3171_v10 }
 0x44f   : > { %v3068_v27 = vpop.f32.mrf.mxu1  ;;  %v3390_v3 = vsel %vm3313_vm4, %v3193_v63, %v3389_v40  ;;  %v3250_v10 = vmax.f32 %v3248_v5, %v3249_v19  ;;  %v3262_v28 = vmax.f32 %v3260_v20, %v3261_v47  ;;  %v3269_v5 = vrot.slane %v3268_v22, 1  ;;  %3827 = vmatpush.bf16.msrb.mxu3 %v4343_v62 }
 0x450   : > { %v3069_v41 = vadd.f32 %v3068_v27, %v3020_v14  ;;  %v3173_v46 = vrot.slane %v3172_v52, 2  ;;  %v3196_v56 = vmul.f32 %v3170_v29, %v5360_v57  ;;  %v3391_v33 = vsel %vm3315_vm5, %v3194_v18, %v3390_v3 }
 0x451   : > { %v3392_v17 = vsel %vm3317_vm6, %v3195_v53, %v3391_v33  ;;  %v3285_v14 = vrot.slane %v3284_v49, 2  ;;  %v3263_v16 = vrot.slane %v3262_v28, 1  ;;  %v3270_v30 = vmax.f32 %v3268_v22, %v3269_v5 }
 0x452   : > { %v3086_v45 = vmax.f32 %v3069_v41, 0.0  ;;  %v3174_v50 = vadd.f32 %v3173_v46, %v3172_v52  ;;  %v3393_v52 = vsel %vm3319_vm7, %v3196_v56, %v3392_v17  ;;  %v3274_v41 = vmax.f32 %v3272_v37, %v3273_v6 }
 0x453   : > { %v3264_v8 = vmax.f32 %v3262_v28, %v3263_v16  ;;  %v3282_v20 = vmax.f32 %v3280_v12, %v3281_v21 }
 0x454   : > { %v3177_v39 = vrot.slane %v3086_v45, 4  ;;  %v3175_v0 = vrot.slane %v3174_v50, 1  ;;  %v3275_v11 = vrot.slane %v3274_v41, 1 }
 0x456   : > { %v3178_v43 = vadd.f32 %v3177_v39, %v3086_v45  ;;  %v3176_v58 = vadd.f32 %v3175_v0, %v3174_v50  ;;  %v3290_v2 = vmax.f32 %v3086_v45, %v3177_v39  ;;  %v3286_v45 = vmax.f32 %v3284_v49, %v3285_v14 }
 0x457   : > { %v3251_v50 = vrot.slane %v3250_v10, 1  ;;  %v3258_v39 = vmax.f32 %v3256_v4, %v3257_v38 }
 0x458   : > { %v3179_v25 = vrot.slane %v3178_v43, 2  ;;  %v3197_v23 = vmul.f32 %v3176_v58, %v5360_v57  ;;  %v3291_v61 = vrot.slane %v3290_v2, 2  ;;  %v3287_v0 = vrot.slane %v3286_v45, 1  ;;  %v3703_v58 = vpop.f32.mrf.mxu2 }
 0x45a   : > { %v3180_v15 = vadd.f32 %v3179_v25, %v3178_v43  ;;  %v3394_v51 = vsel %vm3321_vm8, %v3197_v23, %v3393_v52  ;;  %v3276_v43 = vmax.f32 %v3274_v41, %v3275_v11  ;;  %v3288_v34 = vmax.f32 %v3286_v45, %v3287_v0 }
 0x45c   : > { %v3181_v26 = vrot.slane %v3180_v15, 1 }
 0x45e   : > { %v3182_v32 = vadd.f32 %v3181_v26, %v3180_v15  ;;  %v4342_v15 = vld [vmem:[%s5854_s6] sm:$0xff] }
 0x45f   : > { %3828 = vmatpush.bf16.msrb.mxu3 %v4342_v15 }
 0x460   : > { %v3198_v27 = vmul.f32 %v3182_v32, %v5360_v57  ;;  %v3292_v57 = vmax.f32 %v3290_v2, %v3291_v61  ;;  %v3705_v18 = vpop.f32.mrf.mxu2 }
 0x462   : > { %v3395_v46 = vsel %vm3323_vm9, %v3198_v27, %v3394_v51  ;;  %v3293_v31 = vrot.slane %v3292_v57, 1 }
 0x463   : > { %v3432_v36 = vpack.c.bf16 %v3395_v46, %v5686_v13  ;;  %v3252_v13 = vmax.f32 %v3250_v10, %v3251_v50  ;;  %v4362_v10 = vld [vmem:[%s5855_s7] ss:$0 sm:$0xff] }
 0x464   : > { %v3294_v60 = vmax.f32 %v3292_v57, %v3293_v31 }
 0x465   : > { %3730 = vmatmul.bf16.vlgmr.msrb.gmra.mxu2 %v3432_v36  ;;  %v3421_v48 = vsel %vm3311_vm3, %v3258_v39, %v3252_v13 }
 0x466   : > { %v3422_v55 = vsel %vm3313_vm4, %v3264_v8, %v3421_v48 }
 0x467   : > { %v3423_v19 = vsel %vm3315_vm5, %v3270_v30, %v3422_v55 }
 0x468   : > { %v3424_v29 = vsel %vm3317_vm6, %v3276_v43, %v3423_v19  ;;  %v3717_v35 = vpop.f32.mrf.mxu2 }
 0x469   : > { %v3425_v25 = vsel %vm3319_vm7, %v3282_v20, %v3424_v29 }
 0x46a   : > { %v3426_v59 = vsel %vm3321_vm8, %v3288_v34, %v3425_v25 }
 0x46b   : > { %v3427_v63 = vsel %vm3323_vm9, %v3294_v60, %v3426_v59 }
 0x46c   : > { %v3433_v37 = vpack.c.bf16 %v3427_v63, %v5680_v54  ;;  %v4361_v54 = vld [vmem:[%s5853_s5] ss:$0 sm:$0xff] }
 0x46d   : > { %v3704_v49 = vadd.f32 %v4361_v54, %v3703_v58  ;;  %v3706_v56 = vadd.f32 %v4361_v54, %v3705_v18 }
 0x46f   : > { %v3718_v1 = vadd.f32 %v3717_v35, %v3704_v49 }
 0x470   : > { %v3719_v40 = vpop.f32.mrf.mxu2 }
 0x471   : > { %v3720_v2 = vadd.f32 %v3719_v40, %v3706_v56 }
 0x475   : > { %3744 = vmatmul.bf16.vlgmr.msra.gmra.mxu2 %v3433_v37 }
 0x4e8   : > { %v3731_v47 = vpop.f32.mrf.mxu2 }
 0x4e9   : > { %v3732_v26 = vadd.f32 %v3731_v47, %v3718_v1 }
 0x4f0   : > { %v3733_v53 = vpop.f32.mrf.mxu2 }
 0x4f1   : > { %v3734_v6 = vadd.f32 %v3733_v53, %v3720_v2 }
 0x4f8   : > { %v3745_v9 = vpop.f32.mrf.mxu2 }
 0x4f9   : > { %v3746_v3 = vadd.f32 %v3745_v9, %v3732_v26 }
 0x4fb   : > { %4493 = vtanh.f32 %v3746_v3 }
 0x500   : > { %v3747_v23 = vpop.f32.mrf.mxu2 }
 0x501   : > { %v3748_v4 = vadd.f32 %v3747_v23, %v3734_v6  ;;  %v4494_v33 = vpop.eup %4493 }
 0x503   : > { %4495 = vtanh.f32 %v3748_v4 }
 0x509   : > { %v4496_v24 = vpop.eup %4495 }
 0x50a   : > { %v3752_v32 = vpack.c.bf16 %v4496_v24, %v4494_v33 }
 0x50c   : > { %3829 = vmatmul.bf16.vlgmr.msrb.gmra.mxu3 %v3752_v32 }
 0x58f   : > { %v3830_v28 = vpop.f32.mrf.mxu3 }
 0x590   : > { %v3831_v17 = vadd.f32 %v4362_v10, %v3830_v28 }
 0x592   : > { %3835 = vst [vmem:[%s329_s21] sm:$0xff] %v3831_v17 }
 0x597   : > { %v3832_v14 = vpop.f32.mrf.mxu3 }
 0x598   : > { %v3833_v44 = vadd.f32 %v4362_v10, %v3832_v14 }
 0x59a   : > { %3836 = vst [vmem:[%s329_s21 + $0x8] sm:$0xff] %v3833_v44 }
 0x59b PF: > { %s18_s27 = sadd.s32 1, %s4544_s27  }
 0x59c   : > { %p15_p5 = scmp.ge.s32.totalorder %s18_s27, 4  }
 0x59e   :  { %17 = sbr.rel (!%p15_p5) target bundleno = 1 (0x1), region = 85 }

</bundles_post_ra>
